<compile_context>
chip_gen: v7x
topology: tpu7x:2x2x1
jax: 0.10.0
libtpu: 0.0.40
codegen_flags: <defaults>
</compile_context>

<pallas_src>
import functools

import jax
import jax.numpy as jnp
from jax import lax
from jax.experimental import pallas as pl
from jax.experimental.pallas import tpu as pltpu

HIDDEN = 128      # stand-in for 768
VOCAB = 512       # stand-in for 21128
T_DEC = 50        # hardcoded `for i in range(50)` in the reference forward
UNROLL = 5        # manual unroll factor of the recurrent loop
assert T_DEC % UNROLL == 0


# -----------------------------------------------------------------------------
# Fused kernel:
#   prologue : h0 = sum_s(masked_emb[b, s, :]); c0 = h0
#              XW = x_flat @ W_ih + (b_ih + b_hh)           (all 50 steps at once)
#   loop     : 50 x LSTMCell step (PyTorch gate order i,f,g,o), only h @ W_hh
#              inside the recurrence; hs written to VMEM scratch
#   epilogue : logits = hs @ W_fc + b_fc                    (lane-dense output)
# -----------------------------------------------------------------------------
def fused_lstm_fc_kernel(memb_ref, x_ref, wih_ref, whh_ref, b_ref,
                         wfc_ref, bfc_ref, logits_ref, xw_scr, hs_scr,
                         *, b_pad):
    # ---- h0 from the masked "BERT" keyword embeddings (padded rows are 0) ----
    h0 = jnp.sum(memb_ref[...], axis=1)                    # (B_pad, H) f32
    c0 = h0                                                # c = h.clone()

    # ---- hoisted input projection: one well-shaped MXU matmul + one bias add --
    xw_scr[...] = (
        jnp.dot(x_ref[...], wih_ref[...], preferred_element_type=jnp.float32)
        + b_ref[...])                                      # (T*B_pad, 4H) f32

    whh = whh_ref[...]                                     # (H, 4H) bf16, invariant

    def unrolled_steps(u, carry):
        h, c = carry
        for j in range(UNROLL):                            # manual unroll
            t = u * UNROLL + j
            row = pl.multiple_of(t * b_pad, b_pad)
            gates = (xw_scr[pl.ds(row, b_pad), :]
                     + jnp.dot(h.astype(jnp.bfloat16), whh,
                               preferred_element_type=jnp.float32))  # (B_pad, 4H)
            i_g = jax.nn.sigmoid(gates[:, 0 * HIDDEN:1 * HIDDEN])
            f_g = jax.nn.sigmoid(gates[:, 1 * HIDDEN:2 * HIDDEN])
            g_g = jnp.tanh(gates[:, 2 * HIDDEN:3 * HIDDEN])
            o_g = jax.nn.sigmoid(gates[:, 3 * HIDDEN:4 * HIDDEN])
            c = f_g * c + i_g * g_g
            h = o_g * jnp.tanh(c)
            hs_scr[pl.ds(row, b_pad), :] = h               # time-major, sublane-dense
        return h, c

    lax.fori_loop(0, T_DEC // UNROLL, unrolled_steps, (h0, c0))

    # ---- fused final Linear(H -> V) over all T*B_pad rows, lane-dense output --
    logits_ref[...] = (
        jnp.dot(hs_scr[...].astype(jnp.bfloat16), wfc_ref[...],
                preferred_element_type=jnp.float32)
        + bfc_ref[...])


# -----------------------------------------------------------------------------
# Parameter init (deterministic, in-script)
# -----------------------------------------------------------------------------
def init_params(key):
    k_emb, k_wih, k_whh, k_bi, k_bh, k_wfc, k_bfc = jax.random.split(key, 7)
    scale = 1.0 / jnp.sqrt(jnp.float32(HIDDEN))
    return {
        "embedding": jax.random.normal(k_emb, (VOCAB, HIDDEN), jnp.float32) * 0.02,
        # stored pre-transposed: (H, 4H)  (PyTorch keeps (4H, H))
        "w_ih": jax.random.uniform(k_wih, (HIDDEN, 4 * HIDDEN), jnp.float32,
                                   -scale, scale),
        "w_hh": jax.random.uniform(k_whh, (HIDDEN, 4 * HIDDEN), jnp.float32,
                                   -scale, scale),
        "b_ih": jax.random.uniform(k_bi, (4 * HIDDEN,), jnp.float32, -scale, scale),
        "b_hh": jax.random.uniform(k_bh, (4 * HIDDEN,), jnp.float32, -scale, scale),
        # fc stored pre-transposed: (H, V)
        "w_fc": jax.random.uniform(k_wfc, (HIDDEN, VOCAB), jnp.float32,
                                   -scale, scale),
        "b_fc": jax.random.uniform(k_bfc, (VOCAB,), jnp.float32, -scale, scale),
    }


# -----------------------------------------------------------------------------
# Forward (is_train=True path of the reference module)
# -----------------------------------------------------------------------------
def bert_lstm1_forward(params, keyword_ids, attention_mask, real_title_ids):
    B = keyword_ids.shape[0]
    B_pad = max(8, ((B + 7) // 8) * 8)          # sublane-dense batch rows
    emb_table = params["embedding"]

    # --- "BERT" stand-in: masked input-token embeddings (fuses with the gather) -
    kw_emb = jnp.take(emb_table, keyword_ids, axis=0)               # (B, S, H)
    masked = kw_emb * attention_mask.astype(jnp.float32)[:, :, None]
    masked = jnp.pad(masked, ((0, B_pad - B), (0, 0), (0, 0)))      # (B_pad, S, H)

    # --- teacher-forced title embeddings: time-major, batch-padded, flattened ---
    title_emb = jnp.take(emb_table, real_title_ids[:, :T_DEC], axis=0)  # (B, T, H)
    title_emb = jnp.pad(title_emb, ((0, B_pad - B), (0, 0), (0, 0)))    # (B_pad,T,H)
    x_flat = (jnp.transpose(title_emb, (1, 0, 2))                       # (T,B_pad,H)
              .reshape(T_DEC * B_pad, HIDDEN)
              .astype(jnp.bfloat16))

    b_comb = (params["b_ih"] + params["b_hh"]).reshape(1, 4 * HIDDEN)

    logits_flat = pl.pallas_call(
        functools.partial(fused_lstm_fc_kernel, b_pad=B_pad),
        out_shape=jax.ShapeDtypeStruct((T_DEC * B_pad, VOCAB), jnp.float32),
        scratch_shapes=[
            pltpu.VMEM((T_DEC * B_pad, 4 * HIDDEN), jnp.float32),   # XW + bias
            pltpu.VMEM((T_DEC * B_pad, HIDDEN), jnp.float32),       # hidden states
        ],
    )(masked,
      x_flat,
      params["w_ih"].astype(jnp.bfloat16),
      params["w_hh"].astype(jnp.bfloat16),
      b_comb,
      params["w_fc"].astype(jnp.bfloat16),
      params["b_fc"].reshape(1, VOCAB))

    # kernel output is time-major (T, B_pad, V); drop padding, permute at the end
    logits = logits_flat.reshape(T_DEC, B_pad, VOCAB)[:, :B, :]
    return jnp.transpose(logits, (1, 0, 2))                         # (B, T, V)


if __name__ == "__main__":
    key = jax.random.PRNGKey(0)
    k_params, k_kw, k_title, k_mask = jax.random.split(key, 4)

    B, S_KW = 2, 8
    params = init_params(k_params)

    keyword_ids = jax.random.randint(k_kw, (B, S_KW), 0, VOCAB, jnp.int32)
    attention_mask = (jax.random.uniform(k_mask, (B, S_KW)) > 0.2).astype(jnp.int32)
    real_title_ids = jax.random.randint(k_title, (B, T_DEC), 0, VOCAB, jnp.int32)

    fwd = jax.jit(bert_lstm1_forward)
    out = fwd(params, keyword_ids, attention_mask, real_title_ids)
    out = jax.block_until_ready(out)

    assert out.shape == (B, T_DEC, VOCAB), out.shape
    assert jnp.all(jnp.isfinite(out))
    print("KERNEL_OK")
</pallas_src>

<mosaic_0001>
module attributes {stable_mosaic.version = 11 : i64} {
  func.func @fused_lstm_fc_kernel(%arg0: memref<8x8x128xf32, #tpu.memory_space<vmem>>, %arg1: memref<400x128xbf16, #tpu.memory_space<vmem>>, %arg2: memref<128x512xbf16, #tpu.memory_space<vmem>>, %arg3: memref<128x512xbf16, #tpu.memory_space<vmem>>, %arg4: memref<1x512xf32, #tpu.memory_space<vmem>>, %arg5: memref<128x512xbf16, #tpu.memory_space<vmem>>, %arg6: memref<1x512xf32, #tpu.memory_space<vmem>>, %arg7: memref<400x512xf32, #tpu.memory_space<vmem>>, %arg8: memref<400x512xf32, #tpu.memory_space<vmem>>, %arg9: memref<400x128xf32, #tpu.memory_space<vmem>>) attributes {dimension_semantics = [], scalar_prefetch = 0 : i64, scratch_operands = 2 : i64, tpu.core_type = #tpu.core_type<tc>} {
    %c0 = arith.constant 0 : index
    %c0_0 = arith.constant 0 : index
    %c0_1 = arith.constant 0 : index
    %0 = vector.load %arg0[%c0, %c0_0, %c0_1] : memref<8x8x128xf32, #tpu.memory_space<vmem>>, vector<8x8x128xf32>
    %cst = arith.constant dense<0.000000e+00> : vector<8x128xf32>
    %1 = vector.multi_reduction <add>, %0, %cst [1] : vector<8x8x128xf32> to vector<8x128xf32>
    %c0_2 = arith.constant 0 : index
    %c0_3 = arith.constant 0 : index
    %2 = vector.load %arg1[%c0_2, %c0_3] : memref<400x128xbf16, #tpu.memory_space<vmem>>, vector<400x128xbf16>
    %c0_4 = arith.constant 0 : index
    %c0_5 = arith.constant 0 : index
    %3 = vector.load %arg2[%c0_4, %c0_5] : memref<128x512xbf16, #tpu.memory_space<vmem>>, vector<128x512xbf16>
    %cst_6 = arith.constant dense<0.000000e+00> : vector<400x512xf32>
    %4 = tpu.matmul %2, %3, %cst_6 {dimension_numbers = #tpu.dot_dimension_numbers<[1], [0], [0], [1], [0, 0, 1, 1], [], []>} : vector<400x128xbf16>, vector<128x512xbf16>, vector<400x512xf32> -> vector<400x512xf32>
    %c0_7 = arith.constant 0 : index
    %c0_8 = arith.constant 0 : index
    %5 = vector.load %arg4[%c0_7, %c0_8] : memref<1x512xf32, #tpu.memory_space<vmem>>, vector<1x512xf32>
    %6 = vector.broadcast %5 : vector<1x512xf32> to vector<400x512xf32>
    %7 = arith.addf %4, %6 : vector<400x512xf32>
    %c0_9 = arith.constant 0 : index
    %c0_10 = arith.constant 0 : index
    %8 = vector.load %arg8[%c0_9, %c0_10] : memref<400x512xf32, #tpu.memory_space<vmem>>, vector<400x512xf32>
    tpu.vector_store %arg8[%c0_9, %c0_10], %7 {strides = array<i32>} : memref<400x512xf32, #tpu.memory_space<vmem>>, vector<400x512xf32>,
    %c0_11 = arith.constant 0 : index
    %c0_12 = arith.constant 0 : index
    %9 = vector.load %arg3[%c0_11, %c0_12] : memref<128x512xbf16, #tpu.memory_space<vmem>>, vector<128x512xbf16>
    %c0_i32 = arith.constant 0 : i32
    %c10_i32 = arith.constant 10 : i32
    %10 = arith.addi %c0_i32, %c10_i32 : i32
    %c1_i32 = arith.constant 1 : i32
    %11:2 = scf.for %arg10 = %c0_i32 to %10 step %c1_i32 iter_args(%arg11 = %1, %arg12 = %1) -> (vector<8x128xf32>, vector<8x128xf32>)  : i32 {
      %c5_i32 = arith.constant 5 : i32
      %20 = arith.muli %arg10, %c5_i32 : i32
      %c0_i32_23 = arith.constant 0 : i32
      %21 = arith.addi %20, %c0_i32_23 : i32
      %c8_i32 = arith.constant 8 : i32
      %22 = arith.muli %21, %c8_i32 : i32
      %23 = tpu.assume_multiple %22, 8 : i32
      %24 = arith.index_cast %23 : i32 to index
      %c0_24 = arith.constant 0 : index
      %25 = vector.load %arg8[%24, %c0_24] : memref<400x512xf32, #tpu.memory_space<vmem>>, vector<8x512xf32>
      %26 = arith.truncf %arg11 : vector<8x128xf32> to vector<8x128xbf16>
      %cst_25 = arith.constant dense<0.000000e+00> : vector<8x512xf32>
      %27 = tpu.matmul %26, %9, %cst_25 {dimension_numbers = #tpu.dot_dimension_numbers<[1], [0], [0], [1], [0, 0, 1, 1], [], []>} : vector<8x128xbf16>, vector<128x512xbf16>, vector<8x512xf32> -> vector<8x512xf32>
      %28 = arith.addf %25, %27 : vector<8x512xf32>
      %29 = vector.extract_strided_slice %28 {offsets = [0, 0], sizes = [8, 128], strides = [1, 1]} : vector<8x512xf32> to vector<8x128xf32>
      %30 = arith.negf %29 : vector<8x128xf32>
      %31 = math.exp %30 : vector<8x128xf32>
      %cst_26 = arith.constant 1.000000e+00 : f32
      %32 = vector.broadcast %cst_26 : f32 to vector<8x128xf32>
      %33 = arith.addf %32, %31 : vector<8x128xf32>
      %34 = arith.divf %32, %33 : vector<8x128xf32>
      %35 = vector.extract_strided_slice %28 {offsets = [0, 128], sizes = [8, 128], strides = [1, 1]} : vector<8x512xf32> to vector<8x128xf32>
      %36 = arith.negf %35 : vector<8x128xf32>
      %37 = math.exp %36 : vector<8x128xf32>
      %cst_27 = arith.constant 1.000000e+00 : f32
      %38 = vector.broadcast %cst_27 : f32 to vector<8x128xf32>
      %39 = arith.addf %38, %37 : vector<8x128xf32>
      %40 = arith.divf %38, %39 : vector<8x128xf32>
      %41 = vector.extract_strided_slice %28 {offsets = [0, 256], sizes = [8, 128], strides = [1, 1]} : vector<8x512xf32> to vector<8x128xf32>
      %42 = math.tanh %41 : vector<8x128xf32>
      %43 = vector.extract_strided_slice %28 {offsets = [0, 384], sizes = [8, 128], strides = [1, 1]} : vector<8x512xf32> to vector<8x128xf32>
      %44 = arith.negf %43 : vector<8x128xf32>
      %45 = math.exp %44 : vector<8x128xf32>
      %cst_28 = arith.constant 1.000000e+00 : f32
      %46 = vector.broadcast %cst_28 : f32 to vector<8x128xf32>
      %47 = arith.addf %46, %45 : vector<8x128xf32>
      %48 = arith.divf %46, %47 : vector<8x128xf32>
      %49 = arith.mulf %40, %arg12 : vector<8x128xf32>
      %50 = arith.mulf %34, %42 : vector<8x128xf32>
      %51 = arith.addf %49, %50 : vector<8x128xf32>
      %52 = math.tanh %51 : vector<8x128xf32>
      %53 = arith.mulf %48, %52 : vector<8x128xf32>
      %54 = arith.index_cast %23 : i32 to index
      %c0_29 = arith.constant 0 : index
      %55 = vector.load %arg9[%54, %c0_29] : memref<400x128xf32, #tpu.memory_space<vmem>>, vector<8x128xf32>
      tpu.vector_store %arg9[%54, %c0_29], %53 {strides = array<i32>} : memref<400x128xf32, #tpu.memory_space<vmem>>, vector<8x128xf32>,
      %c5_i32_30 = arith.constant 5 : i32
      %56 = arith.muli %arg10, %c5_i32_30 : i32
      %c1_i32_31 = arith.constant 1 : i32
      %57 = arith.addi %56, %c1_i32_31 : i32
      %c8_i32_32 = arith.constant 8 : i32
      %58 = arith.muli %57, %c8_i32_32 : i32
      %59 = tpu.assume_multiple %58, 8 : i32
      %60 = arith.index_cast %59 : i32 to index
      %c0_33 = arith.constant 0 : index
      %61 = vector.load %arg8[%60, %c0_33] : memref<400x512xf32, #tpu.memory_space<vmem>>, vector<8x512xf32>
      %62 = arith.truncf %53 : vector<8x128xf32> to vector<8x128xbf16>
      %cst_34 = arith.constant dense<0.000000e+00> : vector<8x512xf32>
      %63 = tpu.matmul %62, %9, %cst_34 {dimension_numbers = #tpu.dot_dimension_numbers<[1], [0], [0], [1], [0, 0, 1, 1], [], []>} : vector<8x128xbf16>, vector<128x512xbf16>, vector<8x512xf32> -> vector<8x512xf32>
      %64 = arith.addf %61, %63 : vector<8x512xf32>
      %65 = vector.extract_strided_slice %64 {offsets = [0, 0], sizes = [8, 128], strides = [1, 1]} : vector<8x512xf32> to vector<8x128xf32>
      %66 = arith.negf %65 : vector<8x128xf32>
      %67 = math.exp %66 : vector<8x128xf32>
      %cst_35 = arith.constant 1.000000e+00 : f32
      %68 = vector.broadcast %cst_35 : f32 to vector<8x128xf32>
      %69 = arith.addf %68, %67 : vector<8x128xf32>
      %70 = arith.divf %68, %69 : vector<8x128xf32>
      %71 = vector.extract_strided_slice %64 {offsets = [0, 128], sizes = [8, 128], strides = [1, 1]} : vector<8x512xf32> to vector<8x128xf32>
      %72 = arith.negf %71 : vector<8x128xf32>
      %73 = math.exp %72 : vector<8x128xf32>
      %cst_36 = arith.constant 1.000000e+00 : f32
      %74 = vector.broadcast %cst_36 : f32 to vector<8x128xf32>
      %75 = arith.addf %74, %73 : vector<8x128xf32>
      %76 = arith.divf %74, %75 : vector<8x128xf32>
      %77 = vector.extract_strided_slice %64 {offsets = [0, 256], sizes = [8, 128], strides = [1, 1]} : vector<8x512xf32> to vector<8x128xf32>
      %78 = math.tanh %77 : vector<8x128xf32>
      %79 = vector.extract_strided_slice %64 {offsets = [0, 384], sizes = [8, 128], strides = [1, 1]} : vector<8x512xf32> to vector<8x128xf32>
      %80 = arith.negf %79 : vector<8x128xf32>
      %81 = math.exp %80 : vector<8x128xf32>
      %cst_37 = arith.constant 1.000000e+00 : f32
      %82 = vector.broadcast %cst_37 : f32 to vector<8x128xf32>
      %83 = arith.addf %82, %81 : vector<8x128xf32>
      %84 = arith.divf %82, %83 : vector<8x128xf32>
      %85 = arith.mulf %76, %51 : vector<8x128xf32>
      %86 = arith.mulf %70, %78 : vector<8x128xf32>
      %87 = arith.addf %85, %86 : vector<8x128xf32>
      %88 = math.tanh %87 : vector<8x128xf32>
      %89 = arith.mulf %84, %88 : vector<8x128xf32>
      %90 = arith.index_cast %59 : i32 to index
      %c0_38 = arith.constant 0 : index
      %91 = vector.load %arg9[%90, %c0_38] : memref<400x128xf32, #tpu.memory_space<vmem>>, vector<8x128xf32>
      tpu.vector_store %arg9[%90, %c0_38], %89 {strides = array<i32>} : memref<400x128xf32, #tpu.memory_space<vmem>>, vector<8x128xf32>,
      %c5_i32_39 = arith.constant 5 : i32
      %92 = arith.muli %arg10, %c5_i32_39 : i32
      %c2_i32 = arith.constant 2 : i32
      %93 = arith.addi %92, %c2_i32 : i32
      %c8_i32_40 = arith.constant 8 : i32
      %94 = arith.muli %93, %c8_i32_40 : i32
      %95 = tpu.assume_multiple %94, 8 : i32
      %96 = arith.index_cast %95 : i32 to index
      %c0_41 = arith.constant 0 : index
      %97 = vector.load %arg8[%96, %c0_41] : memref<400x512xf32, #tpu.memory_space<vmem>>, vector<8x512xf32>
      %98 = arith.truncf %89 : vector<8x128xf32> to vector<8x128xbf16>
      %cst_42 = arith.constant dense<0.000000e+00> : vector<8x512xf32>
      %99 = tpu.matmul %98, %9, %cst_42 {dimension_numbers = #tpu.dot_dimension_numbers<[1], [0], [0], [1], [0, 0, 1, 1], [], []>} : vector<8x128xbf16>, vector<128x512xbf16>, vector<8x512xf32> -> vector<8x512xf32>
      %100 = arith.addf %97, %99 : vector<8x512xf32>
      %101 = vector.extract_strided_slice %100 {offsets = [0, 0], sizes = [8, 128], strides = [1, 1]} : vector<8x512xf32> to vector<8x128xf32>
      %102 = arith.negf %101 : vector<8x128xf32>
      %103 = math.exp %102 : vector<8x128xf32>
      %cst_43 = arith.constant 1.000000e+00 : f32
      %104 = vector.broadcast %cst_43 : f32 to vector<8x128xf32>
      %105 = arith.addf %104, %103 : vector<8x128xf32>
      %106 = arith.divf %104, %105 : vector<8x128xf32>
      %107 = vector.extract_strided_slice %100 {offsets = [0, 128], sizes = [8, 128], strides = [1, 1]} : vector<8x512xf32> to vector<8x128xf32>
      %108 = arith.negf %107 : vector<8x128xf32>
      %109 = math.exp %108 : vector<8x128xf32>
      %cst_44 = arith.constant 1.000000e+00 : f32
      %110 = vector.broadcast %cst_44 : f32 to vector<8x128xf32>
      %111 = arith.addf %110, %109 : vector<8x128xf32>
      %112 = arith.divf %110, %111 : vector<8x128xf32>
      %113 = vector.extract_strided_slice %100 {offsets = [0, 256], sizes = [8, 128], strides = [1, 1]} : vector<8x512xf32> to vector<8x128xf32>
      %114 = math.tanh %113 : vector<8x128xf32>
      %115 = vector.extract_strided_slice %100 {offsets = [0, 384], sizes = [8, 128], strides = [1, 1]} : vector<8x512xf32> to vector<8x128xf32>
      %116 = arith.negf %115 : vector<8x128xf32>
      %117 = math.exp %116 : vector<8x128xf32>
      %cst_45 = arith.constant 1.000000e+00 : f32
      %118 = vector.broadcast %cst_45 : f32 to vector<8x128xf32>
      %119 = arith.addf %118, %117 : vector<8x128xf32>
      %120 = arith.divf %118, %119 : vector<8x128xf32>
      %121 = arith.mulf %112, %87 : vector<8x128xf32>
      %122 = arith.mulf %106, %114 : vector<8x128xf32>
      %123 = arith.addf %121, %122 : vector<8x128xf32>
      %124 = math.tanh %123 : vector<8x128xf32>
      %125 = arith.mulf %120, %124 : vector<8x128xf32>
      %126 = arith.index_cast %95 : i32 to index
      %c0_46 = arith.constant 0 : index
      %127 = vector.load %arg9[%126, %c0_46] : memref<400x128xf32, #tpu.memory_space<vmem>>, vector<8x128xf32>
      tpu.vector_store %arg9[%126, %c0_46], %125 {strides = array<i32>} : memref<400x128xf32, #tpu.memory_space<vmem>>, vector<8x128xf32>,
      %c5_i32_47 = arith.constant 5 : i32
      %128 = arith.muli %arg10, %c5_i32_47 : i32
      %c3_i32 = arith.constant 3 : i32
      %129 = arith.addi %128, %c3_i32 : i32
      %c8_i32_48 = arith.constant 8 : i32
      %130 = arith.muli %129, %c8_i32_48 : i32
      %131 = tpu.assume_multiple %130, 8 : i32
      %132 = arith.index_cast %131 : i32 to index
      %c0_49 = arith.constant 0 : index
      %133 = vector.load %arg8[%132, %c0_49] : memref<400x512xf32, #tpu.memory_space<vmem>>, vector<8x512xf32>
      %134 = arith.truncf %125 : vector<8x128xf32> to vector<8x128xbf16>
      %cst_50 = arith.constant dense<0.000000e+00> : vector<8x512xf32>
      %135 = tpu.matmul %134, %9, %cst_50 {dimension_numbers = #tpu.dot_dimension_numbers<[1], [0], [0], [1], [0, 0, 1, 1], [], []>} : vector<8x128xbf16>, vector<128x512xbf16>, vector<8x512xf32> -> vector<8x512xf32>
      %136 = arith.addf %133, %135 : vector<8x512xf32>
      %137 = vector.extract_strided_slice %136 {offsets = [0, 0], sizes = [8, 128], strides = [1, 1]} : vector<8x512xf32> to vector<8x128xf32>
      %138 = arith.negf %137 : vector<8x128xf32>
      %139 = math.exp %138 : vector<8x128xf32>
      %cst_51 = arith.constant 1.000000e+00 : f32
      %140 = vector.broadcast %cst_51 : f32 to vector<8x128xf32>
      %141 = arith.addf %140, %139 : vector<8x128xf32>
      %142 = arith.divf %140, %141 : vector<8x128xf32>
      %143 = vector.extract_strided_slice %136 {offsets = [0, 128], sizes = [8, 128], strides = [1, 1]} : vector<8x512xf32> to vector<8x128xf32>
      %144 = arith.negf %143 : vector<8x128xf32>
      %145 = math.exp %144 : vector<8x128xf32>
      %cst_52 = arith.constant 1.000000e+00 : f32
      %146 = vector.broadcast %cst_52 : f32 to vector<8x128xf32>
      %147 = arith.addf %146, %145 : vector<8x128xf32>
      %148 = arith.divf %146, %147 : vector<8x128xf32>
      %149 = vector.extract_strided_slice %136 {offsets = [0, 256], sizes = [8, 128], strides = [1, 1]} : vector<8x512xf32> to vector<8x128xf32>
      %150 = math.tanh %149 : vector<8x128xf32>
      %151 = vector.extract_strided_slice %136 {offsets = [0, 384], sizes = [8, 128], strides = [1, 1]} : vector<8x512xf32> to vector<8x128xf32>
      %152 = arith.negf %151 : vector<8x128xf32>
      %153 = math.exp %152 : vector<8x128xf32>
      %cst_53 = arith.constant 1.000000e+00 : f32
      %154 = vector.broadcast %cst_53 : f32 to vector<8x128xf32>
      %155 = arith.addf %154, %153 : vector<8x128xf32>
      %156 = arith.divf %154, %155 : vector<8x128xf32>
      %157 = arith.mulf %148, %123 : vector<8x128xf32>
      %158 = arith.mulf %142, %150 : vector<8x128xf32>
      %159 = arith.addf %157, %158 : vector<8x128xf32>
      %160 = math.tanh %159 : vector<8x128xf32>
      %161 = arith.mulf %156, %160 : vector<8x128xf32>
      %162 = arith.index_cast %131 : i32 to index
      %c0_54 = arith.constant 0 : index
      %163 = vector.load %arg9[%162, %c0_54] : memref<400x128xf32, #tpu.memory_space<vmem>>, vector<8x128xf32>
      tpu.vector_store %arg9[%162, %c0_54], %161 {strides = array<i32>} : memref<400x128xf32, #tpu.memory_space<vmem>>, vector<8x128xf32>,
      %c5_i32_55 = arith.constant 5 : i32
      %164 = arith.muli %arg10, %c5_i32_55 : i32
      %c4_i32 = arith.constant 4 : i32
      %165 = arith.addi %164, %c4_i32 : i32
      %c8_i32_56 = arith.constant 8 : i32
      %166 = arith.muli %165, %c8_i32_56 : i32
      %167 = tpu.assume_multiple %166, 8 : i32
      %168 = arith.index_cast %167 : i32 to index
      %c0_57 = arith.constant 0 : index
      %169 = vector.load %arg8[%168, %c0_57] : memref<400x512xf32, #tpu.memory_space<vmem>>, vector<8x512xf32>
      %170 = arith.truncf %161 : vector<8x128xf32> to vector<8x128xbf16>
      %cst_58 = arith.constant dense<0.000000e+00> : vector<8x512xf32>
      %171 = tpu.matmul %170, %9, %cst_58 {dimension_numbers = #tpu.dot_dimension_numbers<[1], [0], [0], [1], [0, 0, 1, 1], [], []>} : vector<8x128xbf16>, vector<128x512xbf16>, vector<8x512xf32> -> vector<8x512xf32>
      %172 = arith.addf %169, %171 : vector<8x512xf32>
      %173 = vector.extract_strided_slice %172 {offsets = [0, 0], sizes = [8, 128], strides = [1, 1]} : vector<8x512xf32> to vector<8x128xf32>
      %174 = arith.negf %173 : vector<8x128xf32>
      %175 = math.exp %174 : vector<8x128xf32>
      %cst_59 = arith.constant 1.000000e+00 : f32
      %176 = vector.broadcast %cst_59 : f32 to vector<8x128xf32>
      %177 = arith.addf %176, %175 : vector<8x128xf32>
      %178 = arith.divf %176, %177 : vector<8x128xf32>
      %179 = vector.extract_strided_slice %172 {offsets = [0, 128], sizes = [8, 128], strides = [1, 1]} : vector<8x512xf32> to vector<8x128xf32>
      %180 = arith.negf %179 : vector<8x128xf32>
      %181 = math.exp %180 : vector<8x128xf32>
      %cst_60 = arith.constant 1.000000e+00 : f32
      %182 = vector.broadcast %cst_60 : f32 to vector<8x128xf32>
      %183 = arith.addf %182, %181 : vector<8x128xf32>
      %184 = arith.divf %182, %183 : vector<8x128xf32>
      %185 = vector.extract_strided_slice %172 {offsets = [0, 256], sizes = [8, 128], strides = [1, 1]} : vector<8x512xf32> to vector<8x128xf32>
      %186 = math.tanh %185 : vector<8x128xf32>
      %187 = vector.extract_strided_slice %172 {offsets = [0, 384], sizes = [8, 128], strides = [1, 1]} : vector<8x512xf32> to vector<8x128xf32>
      %188 = arith.negf %187 : vector<8x128xf32>
      %189 = math.exp %188 : vector<8x128xf32>
      %cst_61 = arith.constant 1.000000e+00 : f32
      %190 = vector.broadcast %cst_61 : f32 to vector<8x128xf32>
      %191 = arith.addf %190, %189 : vector<8x128xf32>
      %192 = arith.divf %190, %191 : vector<8x128xf32>
      %193 = arith.mulf %184, %159 : vector<8x128xf32>
      %194 = arith.mulf %178, %186 : vector<8x128xf32>
      %195 = arith.addf %193, %194 : vector<8x128xf32>
      %196 = math.tanh %195 : vector<8x128xf32>
      %197 = arith.mulf %192, %196 : vector<8x128xf32>
      %198 = arith.index_cast %167 : i32 to index
      %c0_62 = arith.constant 0 : index
      %199 = vector.load %arg9[%198, %c0_62] : memref<400x128xf32, #tpu.memory_space<vmem>>, vector<8x128xf32>
      tpu.vector_store %arg9[%198, %c0_62], %197 {strides = array<i32>} : memref<400x128xf32, #tpu.memory_space<vmem>>, vector<8x128xf32>,
      scf.yield %197, %195 : vector<8x128xf32>, vector<8x128xf32>
    }
    %c10_i32_13 = arith.constant 10 : i32
    %c0_14 = arith.constant 0 : index
    %c0_15 = arith.constant 0 : index
    %12 = vector.load %arg9[%c0_14, %c0_15] : memref<400x128xf32, #tpu.memory_space<vmem>>, vector<400x128xf32>
    %13 = arith.truncf %12 : vector<400x128xf32> to vector<400x128xbf16>
    %c0_16 = arith.constant 0 : index
    %c0_17 = arith.constant 0 : index
    %14 = vector.load %arg5[%c0_16, %c0_17] : memref<128x512xbf16, #tpu.memory_space<vmem>>, vector<128x512xbf16>
    %cst_18 = arith.constant dense<0.000000e+00> : vector<400x512xf32>
    %15 = tpu.matmul %13, %14, %cst_18 {dimension_numbers = #tpu.dot_dimension_numbers<[1], [0], [0], [1], [0, 0, 1, 1], [], []>} : vector<400x128xbf16>, vector<128x512xbf16>, vector<400x512xf32> -> vector<400x512xf32>
    %c0_19 = arith.constant 0 : index
    %c0_20 = arith.constant 0 : index
    %16 = vector.load %arg6[%c0_19, %c0_20] : memref<1x512xf32, #tpu.memory_space<vmem>>, vector<1x512xf32>
    %17 = vector.broadcast %16 : vector<1x512xf32> to vector<400x512xf32>
    %18 = arith.addf %15, %17 : vector<400x512xf32>
    %c0_21 = arith.constant 0 : index
    %c0_22 = arith.constant 0 : index
    %19 = vector.load %arg7[%c0_21, %c0_22] : memref<400x512xf32, #tpu.memory_space<vmem>>, vector<400x512xf32>
    tpu.vector_store %arg7[%c0_21, %c0_22], %18 {strides = array<i32>} : memref<400x512xf32, #tpu.memory_space<vmem>>, vector<400x512xf32>,
    return
  }
}

</mosaic_0001>

<bundles_post_ra>
// kernel: bert_lstm1_forward.1
= control target key start
LH: loop header
LB: loop body
LE: loop exit
PB: predicated region body
PF: predicated region fallthrough
CT: control target
= control target key end

     0   :  { %v5634_v0 = vmov 0   ;;  %v167_v58 = vlaneseq  ;;  %vm1303_vm0 = vcmask 1041409   ;;  %vm1305_vm1 = vcmask 1042434   ;;  %s5622_s5 = inlined_call_operand.vmem [shape: bf16[128,512], index: 5, kind: input, shape index: {}]   ;;  %s5623_s6 = inlined_call_operand.vmem [shape: f32[1,512], index: 6, kind: input, shape index: {}]   ;;  %s5624_s7 = inlined_call_operand.vmem [shape: f32[400,512], index: 7, kind: output, shape index: {}]   ;;  %s5625_s2 = inlined_call_operand.vmem [shape: bf16[128,512], index: 2, kind: input, shape index: {}]   ;;  %s5626_s1 = inlined_call_operand.vmem [shape: bf16[400,128], index: 1, kind: input, shape index: {}]   ;;  %s5627_s4 = inlined_call_operand.vmem [shape: f32[1,512], index: 4, kind: input, shape index: {}]   ;;  %s5628_s0 = inlined_call_operand.vmem [shape: f32[8,8,128], index: 0, kind: input, shape index: {}]   ;;  %s5629_s3 = inlined_call_operand.vmem [shape: bf16[128,512], index: 3, kind: input, shape index: {}]  }
   0x1   :  { %529 = vmatprep.mubr.bf16.mxu0 %v5634_v0  ;;  %812 = vmatprep.mubr.bf16.mxu1 %v5634_v0  ;;  %v3405_v1 = vld [vmem:[%s5625_s2 + $0x4] ss:$16 sps:$4 sm:$0xff]   ;;  %v3407_v2 = vld [vmem:[%s5625_s2 + $0xc] ss:$16 sps:$4 sm:$0xff]   ;;  %v3409_v3 = vld [vmem:[%s5625_s2] ss:$16 sps:$4 sm:$0xff]  }
   0x2   :  { %497 = vmatprep.subr.bf16.mxu0 %v3405_v1  ;;  %v3410_v4 = vld [vmem:[%s5625_s2 + $0x8] ss:$16 sps:$4 sm:$0xff]   ;;  %780 = vmatprep.subr.bf16.mxu1 %v3407_v2  ;;  %v3411_v5 = vld [vmem:[%s5625_s2 + $0x24] ss:$16 sps:$4 sm:$0xff]   ;;  %v3413_v6 = vld [vmem:[%s5625_s2 + $0x2c] ss:$16 sps:$4 sm:$0xff]  }
   0x3   :  { %498 = vmatpush1.bf16.msra.mxu0 %v3409_v3  ;;  %781 = vmatpush1.bf16.msra.mxu1 %v3410_v4  ;;  %v3415_v7 = vld [vmem:[%s5625_s2 + $0x20] ss:$16 sps:$4 sm:$0xff]   ;;  %v3416_v8 = vld [vmem:[%s5625_s2 + $0x28] ss:$16 sps:$4 sm:$0xff]   ;;  %v3417_v9 = vld [vmem:[%s5625_s2 + $0x44] ss:$16 sps:$4 sm:$0xff]  }
   0x4   :  { %499 = vmatprep.subr.bf16.mxu0 %v3411_v5  ;;  %782 = vmatprep.subr.bf16.mxu1 %v3413_v6  ;;  %v3419_v10 = vld [vmem:[%s5625_s2 + $0x4c] ss:$16 sps:$4 sm:$0xff]   ;;  %v3421_v11 = vld [vmem:[%s5625_s2 + $0x40] ss:$16 sps:$4 sm:$0xff]   ;;  %v3422_v12 = vld [vmem:[%s5625_s2 + $0x48] ss:$16 sps:$4 sm:$0xff]  }
   0x5   :  { %v3423_v13 = vld [vmem:[%s5625_s2 + $0x64] ss:$16 sps:$4 sm:$0xff]   ;;  %v3425_v14 = vld [vmem:[%s5625_s2 + $0x6c] ss:$16 sps:$4 sm:$0xff]   ;;  %v3427_v15 = vld [vmem:[%s5625_s2 + $0x60] ss:$16 sps:$4 sm:$0xff]  }
   0x6   :  { %v3428_v16 = vld [vmem:[%s5625_s2 + $0x68] ss:$16 sps:$4 sm:$0xff]   ;;  %v3429_v17 = vld [vmem:[%s5625_s2 + $0x84] ss:$16 sps:$4 sm:$0xff]   ;;  %v3431_v18 = vld [vmem:[%s5625_s2 + $0x8c] ss:$16 sps:$4 sm:$0xff]  }
   0x7   :  { %500 = vmatpush1.bf16.msra.mxu0 %v3415_v7  ;;  %783 = vmatpush1.bf16.msra.mxu1 %v3416_v8  ;;  %v3433_v19 = vld [vmem:[%s5625_s2 + $0x80] ss:$16 sps:$4 sm:$0xff]   ;;  %v3434_v20 = vld [vmem:[%s5625_s2 + $0x88] ss:$16 sps:$4 sm:$0xff]   ;;  %v3435_v21 = vld [vmem:[%s5625_s2 + $0xa4] ss:$16 sps:$4 sm:$0xff]  }
   0x8   :  { %501 = vmatprep.subr.bf16.mxu0 %v3417_v9  ;;  %784 = vmatprep.subr.bf16.mxu1 %v3419_v10  ;;  %v3437_v22 = vld [vmem:[%s5625_s2 + $0xac] ss:$16 sps:$4 sm:$0xff]   ;;  %v3439_v23 = vld [vmem:[%s5625_s2 + $0xa0] ss:$16 sps:$4 sm:$0xff]   ;;  %v3440_v24 = vld [vmem:[%s5625_s2 + $0xa8] ss:$16 sps:$4 sm:$0xff]  }
   0x9   :  { %v3441_v25 = vld [vmem:[%s5625_s2 + $0xc4] ss:$16 sps:$4 sm:$0xff]   ;;  %v3443_v26 = vld [vmem:[%s5625_s2 + $0xcc] ss:$16 sps:$4 sm:$0xff]   ;;  %v3445_v27 = vld [vmem:[%s5625_s2 + $0xc0] ss:$16 sps:$4 sm:$0xff]  }
   0xa   :  { %v3446_v28 = vld [vmem:[%s5625_s2 + $0xc8] ss:$16 sps:$4 sm:$0xff]   ;;  %v3447_v29 = vld [vmem:[%s5625_s2 + $0xe4] ss:$16 sps:$4 sm:$0xff]   ;;  %v3449_v30 = vld [vmem:[%s5625_s2 + $0xec] ss:$16 sps:$4 sm:$0xff]  }
   0xb   :  { %502 = vmatpush1.bf16.msra.mxu0 %v3421_v11  ;;  %785 = vmatpush1.bf16.msra.mxu1 %v3422_v12  ;;  %v3451_v31 = vld [vmem:[%s5625_s2 + $0xe0] ss:$16 sps:$4 sm:$0xff]   ;;  %v3452_v32 = vld [vmem:[%s5625_s2 + $0xe8] ss:$16 sps:$4 sm:$0xff]   ;;  %v3893_v59 = vshrl.u32 %v167_v58, 7  ;;  %vm1307_vm2 = vcmask 1043459  }
   0xc   :  { %503 = vmatprep.subr.bf16.mxu0 %v3423_v13  ;;  %786 = vmatprep.subr.bf16.mxu1 %v3425_v14  ;;  %v3453_v33 = vld [vmem:[%s5626_s1] sm:$0xff]   ;;  %v3454_v34 = vld [vmem:[%s5626_s1 + $0x8] sm:$0xff]   ;;  %v3455_v35 = vld [vmem:[%s5626_s1 + $0x10] sm:$0xff]   ;;  %vm1309_vm3 = vcmask 1044484   ;;  %vm1311_vm4 = vcmask 1045509   ;;  %vm1313_vm5 = vcmask 1046534  }
   0xd   :  { %v3456_v36 = vld [vmem:[%s5626_s1 + $0x18] sm:$0xff]   ;;  %v3457_v37 = vld [vmem:[%s5626_s1 + $0x20] sm:$0xff]   ;;  %v3458_v38 = vld [vmem:[%s5626_s1 + $0x28] sm:$0xff]   ;;  %v5633_v60 = vsub.s32 0, %v3893_v59  ;;  %v5632_v62 = vsub.s32 2, %v3893_v59  ;;  %v5631_v63 = vsub.s32 1, %v3893_v59 }
   0xe   :  { %v3459_v39 = vld [vmem:[%s5626_s1 + $0x30] sm:$0xff]   ;;  %v3460_v40 = vld [vmem:[%s5626_s1 + $0x38] sm:$0xff]   ;;  %v3461_v41 = vld [vmem:[%s5626_s1 + $0x40] sm:$0xff]   ;;  %v5630_v1 = vsub.s32 3, %v3893_v59  ;;  %vm1315_vm6 = vcmask 1047559  }
   0xf   :  { %504 = vmatpush1.bf16.msra.mxu0 %v3427_v15  ;;  %787 = vmatpush1.bf16.msra.mxu1 %v3428_v16  ;;  %v3462_v42 = vld [vmem:[%s5626_s1 + $0x48] sm:$0xff]   ;;  %v3463_v43 = vld [vmem:[%s5626_s1 + $0x50] sm:$0xff]   ;;  %v3464_v44 = vld [vmem:[%s5626_s1 + $0x58] sm:$0xff]  }
  0x10   :  { %505 = vmatprep.subr.bf16.mxu0 %v3429_v17  ;;  %788 = vmatprep.subr.bf16.mxu1 %v3431_v18  ;;  %v3465_v45 = vld [vmem:[%s5626_s1 + $0x60] sm:$0xff]   ;;  %v3466_v46 = vld [vmem:[%s5626_s1 + $0x68] sm:$0xff]   ;;  %v3467_v47 = vld [vmem:[%s5626_s1 + $0x70] sm:$0xff]  }
  0x11   :  { %v3468_v48 = vld [vmem:[%s5626_s1 + $0x78] sm:$0xff]   ;;  %v3469_v49 = vld [vmem:[%s5626_s1 + $0x80] sm:$0xff]   ;;  %v3470_v50 = vld [vmem:[%s5626_s1 + $0x88] sm:$0xff]  }
  0x12   :  { %v3471_v51 = vld [vmem:[%s5626_s1 + $0x90] sm:$0xff]   ;;  %v3472_v52 = vld [vmem:[%s5626_s1 + $0x98] sm:$0xff]   ;;  %v3473_v53 = vld [vmem:[%s5626_s1 + $0xa0] sm:$0xff]  }
  0x13   :  { %506 = vmatpush1.bf16.msra.mxu0 %v3433_v19  ;;  %789 = vmatpush1.bf16.msra.mxu1 %v3434_v20  ;;  %v3474_v54 = vld [vmem:[%s5626_s1 + $0xa8] sm:$0xff]   ;;  %v3475_v55 = vld [vmem:[%s5626_s1 + $0xb0] sm:$0xff]   ;;  %v3476_v56 = vld [vmem:[%s5626_s1 + $0xb8] sm:$0xff]  }
  0x14   :  { %507 = vmatprep.subr.bf16.mxu0 %v3435_v21  ;;  %790 = vmatprep.subr.bf16.mxu1 %v3437_v22  ;;  %v3477_v57 = vld [vmem:[%s5626_s1 + $0xc0] sm:$0xff]  }
  0x15   :  { %v165_v61 = vld [vmem:[%s5627_s4] sm:$0xf] }
  0x16   :  { %v3904_v2 = vrot.slane %v165_v61, %v5633_v60  ;;  %v3908_v3 = vrot.slane %v165_v61, %v5632_v62  ;;  %v3912_v4 = vrot.slane %v165_v61, %v5631_v63  ;;  %v3916_v5 = vrot.slane %v165_v61, %v5630_v1 }
  0x17   :  { %508 = vmatpush1.bf16.msra.mxu0 %v3439_v23  ;;  %791 = vmatpush1.bf16.msra.mxu1 %v3440_v24 }
  0x18   :  { %509 = vmatprep.subr.bf16.mxu0 %v3441_v25  ;;  %792 = vmatprep.subr.bf16.mxu1 %v3443_v26 }
  0x1b   :  { %510 = vmatpush1.bf16.msra.mxu0 %v3445_v27  ;;  %793 = vmatpush1.bf16.msra.mxu1 %v3446_v28 }
  0x1c   :  { %511 = vmatprep.subr.bf16.mxu0 %v3447_v29  ;;  %794 = vmatprep.subr.bf16.mxu1 %v3449_v30 }
  0x1f   :  { %512 = vmatpush1.bf16.msra.mxu0 %v3451_v31  ;;  %795 = vmatpush1.bf16.msra.mxu1 %v3452_v32 }
  0x22   :  { %530 = vmatmul.mubr.bf16.vlgmr.msra.gmra.mrb[0].mxu0 %v3453_v33  ;;  %813 = vmatmul.mubr.bf16.vlgmr.msra.gmra.mrb[0].mxu1 %v3453_v33 }
  0x23   :  { %539 = vmatprep.mubr.bf16.mxu0 %v5634_v0  ;;  %822 = vmatprep.mubr.bf16.mxu1 %v5634_v0 }
  0x2a   :  { %540 = vmatmul.mubr.bf16.gmra.mrb[4].mxu0 %v3454_v34  ;;  %823 = vmatmul.mubr.bf16.gmra.mrb[4].mxu1 %v3454_v34 }
  0x2b   :  { %549 = vmatprep.mubr.bf16.mxu0 %v5634_v0  ;;  %832 = vmatprep.mubr.bf16.mxu1 %v5634_v0 }
  0x32   :  { %550 = vmatmul.mubr.bf16.gmra.mrb[8].mxu0 %v3455_v35  ;;  %833 = vmatmul.mubr.bf16.gmra.mrb[8].mxu1 %v3455_v35 }
  0x33   :  { %559 = vmatprep.mubr.bf16.mxu0 %v5634_v0  ;;  %842 = vmatprep.mubr.bf16.mxu1 %v5634_v0 }
  0x3a   :  { %560 = vmatmul.mubr.bf16.gmra.mrb[12].mxu0 %v3456_v36  ;;  %843 = vmatmul.mubr.bf16.gmra.mrb[12].mxu1 %v3456_v36 }
  0x3b   :  { %569 = vmatprep.mubr.bf16.mxu0 %v5634_v0  ;;  %852 = vmatprep.mubr.bf16.mxu1 %v5634_v0 }
  0x42   :  { %570 = vmatmul.mubr.bf16.gmra.mrb[16].mxu0 %v3457_v37  ;;  %853 = vmatmul.mubr.bf16.gmra.mrb[16].mxu1 %v3457_v37 }
  0x43   :  { %579 = vmatprep.mubr.bf16.mxu0 %v5634_v0  ;;  %862 = vmatprep.mubr.bf16.mxu1 %v5634_v0 }
  0x4a   :  { %580 = vmatmul.mubr.bf16.gmra.mrb[20].mxu0 %v3458_v38  ;;  %863 = vmatmul.mubr.bf16.gmra.mrb[20].mxu1 %v3458_v38 }
  0x4b   :  { %589 = vmatprep.mubr.bf16.mxu0 %v5634_v0  ;;  %872 = vmatprep.mubr.bf16.mxu1 %v5634_v0 }
  0x52   :  { %590 = vmatmul.mubr.bf16.gmra.mrb[24].mxu0 %v3459_v39  ;;  %873 = vmatmul.mubr.bf16.gmra.mrb[24].mxu1 %v3459_v39 }
  0x53   :  { %599 = vmatprep.mubr.bf16.mxu0 %v5634_v0  ;;  %882 = vmatprep.mubr.bf16.mxu1 %v5634_v0 }
  0x5a   :  { %600 = vmatmul.mubr.bf16.gmra.mrb[28].mxu0 %v3460_v40  ;;  %883 = vmatmul.mubr.bf16.gmra.mrb[28].mxu1 %v3460_v40 }
  0x5b   :  { %609 = vmatprep.mubr.bf16.mxu0 %v5634_v0  ;;  %892 = vmatprep.mubr.bf16.mxu1 %v5634_v0 }
  0x62   :  { %610 = vmatmul.mubr.bf16.gmra.mrb[32].mxu0 %v3461_v41  ;;  %893 = vmatmul.mubr.bf16.gmra.mrb[32].mxu1 %v3461_v41 }
  0x63   :  { %619 = vmatprep.mubr.bf16.mxu0 %v5634_v0  ;;  %902 = vmatprep.mubr.bf16.mxu1 %v5634_v0 }
  0x6a   :  { %620 = vmatmul.mubr.bf16.gmra.mrb[36].mxu0 %v3462_v42  ;;  %903 = vmatmul.mubr.bf16.gmra.mrb[36].mxu1 %v3462_v42 }
  0x6b   :  { %629 = vmatprep.mubr.bf16.mxu0 %v5634_v0  ;;  %912 = vmatprep.mubr.bf16.mxu1 %v5634_v0 }
  0x72   :  { %630 = vmatmul.mubr.bf16.gmra.mrb[40].mxu0 %v3463_v43  ;;  %913 = vmatmul.mubr.bf16.gmra.mrb[40].mxu1 %v3463_v43 }
  0x73   :  { %639 = vmatprep.mubr.bf16.mxu0 %v5634_v0  ;;  %922 = vmatprep.mubr.bf16.mxu1 %v5634_v0 }
  0x7a   :  { %640 = vmatmul.mubr.bf16.gmra.mrb[44].mxu0 %v3464_v44  ;;  %923 = vmatmul.mubr.bf16.gmra.mrb[44].mxu1 %v3464_v44 }
  0x7b   :  { %649 = vmatprep.mubr.bf16.mxu0 %v5634_v0  ;;  %932 = vmatprep.mubr.bf16.mxu1 %v5634_v0 }
  0x82   :  { %650 = vmatmul.mubr.bf16.gmra.mrb[48].mxu0 %v3465_v45  ;;  %933 = vmatmul.mubr.bf16.gmra.mrb[48].mxu1 %v3465_v45 }
  0x83   :  { %659 = vmatprep.mubr.bf16.mxu0 %v5634_v0  ;;  %942 = vmatprep.mubr.bf16.mxu1 %v5634_v0 }
  0x8a   :  { %660 = vmatmul.mubr.bf16.gmra.mrb[52].mxu0 %v3466_v46  ;;  %943 = vmatmul.mubr.bf16.gmra.mrb[52].mxu1 %v3466_v46 }
  0x8b   :  { %669 = vmatprep.mubr.bf16.mxu0 %v5634_v0  ;;  %952 = vmatprep.mubr.bf16.mxu1 %v5634_v0 }
  0x92   :  { %670 = vmatmul.mubr.bf16.gmra.mrb[56].mxu0 %v3467_v47  ;;  %953 = vmatmul.mubr.bf16.gmra.mrb[56].mxu1 %v3467_v47 }
  0x93   :  { %679 = vmatprep.mubr.bf16.mxu0 %v5634_v0  ;;  %962 = vmatprep.mubr.bf16.mxu1 %v5634_v0 }
  0x9a   :  { %680 = vmatmul.mubr.bf16.gmra.mrb[60].mxu0 %v3468_v48  ;;  %963 = vmatmul.mubr.bf16.gmra.mrb[60].mxu1 %v3468_v48 }
  0x9b   :  { %689 = vmatprep.mubr.bf16.mxu0 %v5634_v0  ;;  %972 = vmatprep.mubr.bf16.mxu1 %v5634_v0 }
  0xa2   :  { %690 = vmatmul.mubr.bf16.gmra.mrb[64].mxu0 %v3469_v49  ;;  %973 = vmatmul.mubr.bf16.gmra.mrb[64].mxu1 %v3469_v49 }
  0xa3   :  { %699 = vmatprep.mubr.bf16.mxu0 %v5634_v0  ;;  %982 = vmatprep.mubr.bf16.mxu1 %v5634_v0 }
  0xaa   :  { %700 = vmatmul.mubr.bf16.gmra.mrb[68].mxu0 %v3470_v50  ;;  %983 = vmatmul.mubr.bf16.gmra.mrb[68].mxu1 %v3470_v50 }
  0xab   :  { %709 = vmatprep.mubr.bf16.mxu0 %v5634_v0  ;;  %992 = vmatprep.mubr.bf16.mxu1 %v5634_v0 }
  0xb2   :  { %710 = vmatmul.mubr.bf16.gmra.mrb[72].mxu0 %v3471_v51  ;;  %993 = vmatmul.mubr.bf16.gmra.mrb[72].mxu1 %v3471_v51 }
  0xb3   :  { %719 = vmatprep.mubr.bf16.mxu0 %v5634_v0  ;;  %1002 = vmatprep.mubr.bf16.mxu1 %v5634_v0 }
  0xba   :  { %720 = vmatmul.mubr.bf16.gmra.mrb[76].mxu0 %v3472_v52  ;;  %1003 = vmatmul.mubr.bf16.gmra.mrb[76].mxu1 %v3472_v52 }
  0xbb   :  { %729 = vmatprep.mubr.bf16.mxu0 %v5634_v0  ;;  %1012 = vmatprep.mubr.bf16.mxu1 %v5634_v0 }
  0xc2   :  { %730 = vmatmul.mubr.bf16.gmra.mrb[80].mxu0 %v3473_v53  ;;  %1013 = vmatmul.mubr.bf16.gmra.mrb[80].mxu1 %v3473_v53 }
  0xc3   :  { %739 = vmatprep.mubr.bf16.mxu0 %v5634_v0  ;;  %1022 = vmatprep.mubr.bf16.mxu1 %v5634_v0 }
  0xca   :  { %740 = vmatmul.mubr.bf16.gmra.mrb[84].mxu0 %v3474_v54  ;;  %1023 = vmatmul.mubr.bf16.gmra.mrb[84].mxu1 %v3474_v54 }
  0xcb   :  { %749 = vmatprep.mubr.bf16.mxu0 %v5634_v0  ;;  %1032 = vmatprep.mubr.bf16.mxu1 %v5634_v0 }
  0xd2   :  { %750 = vmatmul.mubr.bf16.gmra.mrb[88].mxu0 %v3475_v55  ;;  %1033 = vmatmul.mubr.bf16.gmra.mrb[88].mxu1 %v3475_v55 }
  0xd3   :  { %759 = vmatprep.mubr.bf16.mxu0 %v5634_v0  ;;  %1042 = vmatprep.mubr.bf16.mxu1 %v5634_v0 }
  0xda   :  { %760 = vmatmul.mubr.bf16.gmra.mrb[92].mxu0 %v3476_v56  ;;  %1043 = vmatmul.mubr.bf16.gmra.mrb[92].mxu1 %v3476_v56 }
  0xdb   :  { %769 = vmatprep.mubr.bf16.mxu0 %v5634_v0  ;;  %1052 = vmatprep.mubr.bf16.mxu1 %v5634_v0 }
  0xe2   :  { %770 = vmatmul.mubr.bf16.gmra.mrb[96].mxu0 %v3477_v57  ;;  %1053 = vmatmul.mubr.bf16.gmra.mrb[96].mxu1 %v3477_v57 }
  0xf5   :  { %v531_v6 = vpop.f32.mrb[0].mxu0  ;;  %v814_v8 = vpop.f32.mrb[0].mxu1 }
  0xf6   :  { %v532_v7 = vadd.f32 %v531_v6, %v3904_v2  ;;  %v533_v9 = vpop.f32.mrb[1].mxu0  ;;  %v815_v10 = vadd.f32 %v814_v8, %v3908_v3  ;;  %v816_v12 = vpop.f32.mrb[1].mxu1 }
  0xf7   :  { %v534_v11 = vadd.f32 %v533_v9, %v3912_v4  ;;  %v535_v13 = vpop.f32.mrb[2].mxu0  ;;  %v817_v14 = vadd.f32 %v816_v12, %v3916_v5  ;;  %v818_v16 = vpop.f32.mrb[2].mxu1 }
  0xf8   :  { %1063 = vst [vmem:[#allocation2] sm:$0xff] %v532_v7  ;;  %v536_v15 = vadd.f32 %v535_v13, %v3904_v2  ;;  %v537_v17 = vpop.f32.mrb[3].mxu0  ;;  %1065 = vst [vmem:[#allocation2 + $0x10] sm:$0xff] %v815_v10  ;;  %v819_v18 = vadd.f32 %v818_v16, %v3908_v3  ;;  %v820_v20 = vpop.f32.mrb[3].mxu1 }
  0xf9   :  { %1064 = vst [vmem:[#allocation2 + $0x8] sm:$0xff] %v534_v11  ;;  %v538_v19 = vadd.f32 %v537_v17, %v3912_v4  ;;  %1066 = vst [vmem:[#allocation2 + $0x18] sm:$0xff] %v817_v14  ;;  %v821_v21 = vadd.f32 %v820_v20, %v3916_v5 }
  0xfa   :  { %1067 = vst [vmem:[#allocation2 + $0x20] sm:$0xff] %v536_v15  ;;  %1069 = vst [vmem:[#allocation2 + $0x30] sm:$0xff] %v819_v18 }
  0xfb   :  { %1068 = vst [vmem:[#allocation2 + $0x28] sm:$0xff] %v538_v19  ;;  %1070 = vst [vmem:[#allocation2 + $0x38] sm:$0xff] %v821_v21 }
  0xfd   :  { %v541_v22 = vpop.f32.mrb[4].mxu0  ;;  %v824_v24 = vpop.f32.mrb[4].mxu1 }
  0xfe   :  { %v542_v23 = vadd.f32 %v541_v22, %v3904_v2  ;;  %v543_v25 = vpop.f32.mrb[5].mxu0  ;;  %v825_v26 = vadd.f32 %v824_v24, %v3908_v3  ;;  %v826_v28 = vpop.f32.mrb[5].mxu1 }
  0xff   :  { %v544_v27 = vadd.f32 %v543_v25, %v3912_v4  ;;  %v545_v29 = vpop.f32.mrb[6].mxu0  ;;  %v827_v30 = vadd.f32 %v826_v28, %v3916_v5  ;;  %v828_v32 = vpop.f32.mrb[6].mxu1 }
 0x100   :  { %1071 = vst [vmem:[#allocation2 + $0x40] sm:$0xff] %v542_v23  ;;  %v546_v31 = vadd.f32 %v545_v29, %v3904_v2  ;;  %v547_v33 = vpop.f32.mrb[7].mxu0  ;;  %1073 = vst [vmem:[#allocation2 + $0x50] sm:$0xff] %v825_v26  ;;  %v829_v34 = vadd.f32 %v828_v32, %v3908_v3  ;;  %v830_v36 = vpop.f32.mrb[7].mxu1  ;;  %v27_v32 = vld [vmem:[%s5628_s0] sm:$0xff] }
 0x101   :  { %1072 = vst [vmem:[#allocation2 + $0x48] sm:$0xff] %v544_v27  ;;  %v548_v35 = vadd.f32 %v547_v33, %v3912_v4  ;;  %1074 = vst [vmem:[#allocation2 + $0x58] sm:$0xff] %v827_v30  ;;  %v831_v37 = vadd.f32 %v830_v36, %v3916_v5  ;;  %v28_v33 = vld [vmem:[%s5628_s0 + $0x8] sm:$0xff]  ;;  %v31_v36 = vld [vmem:[%s5628_s0 + $0x20] sm:$0xff] }
 0x102   :  { %1075 = vst [vmem:[#allocation2 + $0x60] sm:$0xff] %v546_v31  ;;  %1077 = vst [vmem:[#allocation2 + $0x70] sm:$0xff] %v829_v34  ;;  %v29_v34 = vld [vmem:[%s5628_s0 + $0x10] sm:$0xff] }
 0x103   :  { %1076 = vst [vmem:[#allocation2 + $0x68] sm:$0xff] %v548_v35  ;;  %1078 = vst [vmem:[#allocation2 + $0x78] sm:$0xff] %v831_v37  ;;  %v30_v35 = vld [vmem:[%s5628_s0 + $0x18] sm:$0xff] }
 0x105   :  { %v551_v38 = vpop.f32.mrb[8].mxu0  ;;  %v834_v40 = vpop.f32.mrb[8].mxu1 }
 0x106   :  { %v552_v39 = vadd.f32 %v551_v38, %v3904_v2  ;;  %v553_v41 = vpop.f32.mrb[9].mxu0  ;;  %v835_v42 = vadd.f32 %v834_v40, %v3908_v3  ;;  %v836_v44 = vpop.f32.mrb[9].mxu1  ;;  %v32_v38 = vld [vmem:[%s5628_s0 + $0x28] sm:$0xff]  ;;  %v35_v40 = vrot.slane %v27_v32, 4 }
 0x107   :  { %v554_v43 = vadd.f32 %v553_v41, %v3912_v4  ;;  %v555_v45 = vpop.f32.mrb[10].mxu0  ;;  %v837_v46 = vadd.f32 %v836_v44, %v3916_v5  ;;  %v838_v48 = vpop.f32.mrb[10].mxu1  ;;  %v41_v41 = vrot.slane %v28_v33, 4 }
 0x108   :  { %1079 = vst [vmem:[#allocation2 + $0x80] sm:$0xff] %v552_v39  ;;  %v556_v47 = vadd.f32 %v555_v45, %v3904_v2  ;;  %v557_v49 = vpop.f32.mrb[11].mxu0  ;;  %1081 = vst [vmem:[#allocation2 + $0x90] sm:$0xff] %v835_v42  ;;  %v839_v50 = vadd.f32 %v838_v48, %v3908_v3  ;;  %v840_v52 = vpop.f32.mrb[11].mxu1  ;;  %v33_v39 = vld [vmem:[%s5628_s0 + $0x30] sm:$0xff]  ;;  %v34_v45 = vld [vmem:[%s5628_s0 + $0x38] sm:$0xff] }
 0x109   :  { %1080 = vst [vmem:[#allocation2 + $0x88] sm:$0xff] %v554_v43  ;;  %v558_v51 = vadd.f32 %v557_v49, %v3912_v4  ;;  %1082 = vst [vmem:[#allocation2 + $0x98] sm:$0xff] %v837_v46  ;;  %v841_v53 = vadd.f32 %v840_v52, %v3916_v5  ;;  %v47_v46 = vrot.slane %v29_v34, 4  ;;  %v59_v52 = vrot.slane %v31_v36, 4 }
 0x10a   :  { %1083 = vst [vmem:[#allocation2 + $0xa0] sm:$0xff] %v556_v47  ;;  %1085 = vst [vmem:[#allocation2 + $0xb0] sm:$0xff] %v839_v50 }
 0x10b   :  { %1084 = vst [vmem:[#allocation2 + $0xa8] sm:$0xff] %v558_v51  ;;  %1086 = vst [vmem:[#allocation2 + $0xb8] sm:$0xff] %v841_v53  ;;  %v53_v51 = vrot.slane %v30_v35, 4 }
 0x10d   :  { %v561_v54 = vpop.f32.mrb[12].mxu0  ;;  %v844_v56 = vpop.f32.mrb[12].mxu1 }
 0x10e   :  { %v562_v55 = vadd.f32 %v561_v54, %v3904_v2  ;;  %v563_v57 = vpop.f32.mrb[13].mxu0  ;;  %v845_v58 = vadd.f32 %v844_v56, %v3908_v3  ;;  %v846_v6 = vpop.f32.mrb[13].mxu1 }
 0x10f   :  { %v564_v61 = vadd.f32 %v563_v57, %v3912_v4  ;;  %v565_v7 = vpop.f32.mrb[14].mxu0  ;;  %v847_v8 = vadd.f32 %v846_v6, %v3916_v5  ;;  %v848_v10 = vpop.f32.mrb[14].mxu1  ;;  %v65_v57 = vrot.slane %v32_v38, 4 }
 0x110   :  { %1087 = vst [vmem:[#allocation2 + $0xc0] sm:$0xff] %v562_v55  ;;  %v566_v9 = vadd.f32 %v565_v7, %v3904_v2  ;;  %v567_v11 = vpop.f32.mrb[15].mxu0  ;;  %1089 = vst [vmem:[#allocation2 + $0xd0] sm:$0xff] %v845_v58  ;;  %v849_v12 = vadd.f32 %v848_v10, %v3908_v3  ;;  %v850_v14 = vpop.f32.mrb[15].mxu1  ;;  %v71_v58 = vrot.slane %v33_v39, 4  ;;  %v77_v10 = vrot.slane %v34_v45, 4 }
 0x111   :  { %1088 = vst [vmem:[#allocation2 + $0xc8] sm:$0xff] %v564_v61  ;;  %v568_v13 = vadd.f32 %v567_v11, %v3912_v4  ;;  %1090 = vst [vmem:[#allocation2 + $0xd8] sm:$0xff] %v847_v8  ;;  %v851_v15 = vadd.f32 %v850_v14, %v3916_v5  ;;  %v36_v8 = vadd.f32 %v35_v40, %v27_v32 }
 0x112   :  { %1091 = vst [vmem:[#allocation2 + $0xe0] sm:$0xff] %v566_v9  ;;  %1093 = vst [vmem:[#allocation2 + $0xf0] sm:$0xff] %v849_v12  ;;  %v42_v9 = vadd.f32 %v41_v41, %v28_v33  ;;  %v48_v12 = vadd.f32 %v47_v46, %v29_v34  ;;  %v60_v14 = vadd.f32 %v59_v52, %v31_v36 }
 0x113   :  { %1092 = vst [vmem:[#allocation2 + $0xe8] sm:$0xff] %v568_v13  ;;  %1094 = vst [vmem:[#allocation2 + $0xf8] sm:$0xff] %v851_v15  ;;  %v54_v13 = vadd.f32 %v53_v51, %v30_v35  ;;  %v66_v15 = vadd.f32 %v65_v57, %v32_v38 }
 0x115   :  { %v571_v16 = vpop.f32.mrb[16].mxu0  ;;  %v854_v18 = vpop.f32.mrb[16].mxu1  ;;  %v67_v35 = vrot.slane %v66_v15, 2 }
 0x116   :  { %v572_v17 = vadd.f32 %v571_v16, %v3904_v2  ;;  %v573_v19 = vpop.f32.mrb[17].mxu0  ;;  %v855_v20 = vadd.f32 %v854_v18, %v3908_v3  ;;  %v856_v22 = vpop.f32.mrb[17].mxu1  ;;  %v72_v16 = vadd.f32 %v71_v58, %v33_v39  ;;  %v37_v18 = vrot.slane %v36_v8, 2 }
 0x117   :  { %v574_v21 = vadd.f32 %v573_v19, %v3912_v4  ;;  %v575_v23 = vpop.f32.mrb[18].mxu0  ;;  %v857_v24 = vadd.f32 %v856_v22, %v3916_v5  ;;  %v858_v26 = vpop.f32.mrb[18].mxu1  ;;  %v43_v19 = vrot.slane %v42_v9, 2 }
 0x118   :  { %1095 = vst [vmem:[#allocation2 + $0x100] sm:$0xff] %v572_v17  ;;  %v576_v25 = vadd.f32 %v575_v23, %v3904_v2  ;;  %v577_v27 = vpop.f32.mrb[19].mxu0  ;;  %1097 = vst [vmem:[#allocation2 + $0x110] sm:$0xff] %v855_v20  ;;  %v859_v28 = vadd.f32 %v858_v26, %v3908_v3  ;;  %v860_v30 = vpop.f32.mrb[19].mxu1  ;;  %v78_v20 = vadd.f32 %v77_v10, %v34_v45  ;;  %v73_v36 = vrot.slane %v72_v16, 2 }
 0x119   :  { %1096 = vst [vmem:[#allocation2 + $0x108] sm:$0xff] %v574_v21  ;;  %v578_v29 = vadd.f32 %v577_v27, %v3912_v4  ;;  %1098 = vst [vmem:[#allocation2 + $0x118] sm:$0xff] %v857_v24  ;;  %v861_v31 = vadd.f32 %v860_v30, %v3916_v5  ;;  %v49_v24 = vrot.slane %v48_v12, 2  ;;  %v61_v30 = vrot.slane %v60_v14, 2 }
 0x11a   :  { %1099 = vst [vmem:[#allocation2 + $0x120] sm:$0xff] %v576_v25  ;;  %1101 = vst [vmem:[#allocation2 + $0x130] sm:$0xff] %v859_v28  ;;  %v38_v40 = vadd.f32 %v37_v18, %v36_v8  ;;  %v44_v41 = vadd.f32 %v43_v19, %v42_v9 }
 0x11b   :  { %1100 = vst [vmem:[#allocation2 + $0x128] sm:$0xff] %v578_v29  ;;  %1102 = vst [vmem:[#allocation2 + $0x138] sm:$0xff] %v861_v31  ;;  %v55_v29 = vrot.slane %v54_v13, 2  ;;  %v62_v46 = vadd.f32 %v61_v30, %v60_v14 }
 0x11c   :  { %v45_v51 = vrot.slane %v44_v41, 1 }
 0x11d   :  { %v581_v37 = vpop.f32.mrb[20].mxu0  ;;  %v864_v43 = vpop.f32.mrb[20].mxu1  ;;  %v56_v45 = vadd.f32 %v55_v29, %v54_v13  ;;  %v63_v8 = vrot.slane %v62_v46, 1 }
 0x11e   :  { %v582_v42 = vadd.f32 %v581_v37, %v3904_v2  ;;  %v583_v44 = vpop.f32.mrb[21].mxu0  ;;  %v865_v47 = vadd.f32 %v864_v43, %v3908_v3  ;;  %v866_v49 = vpop.f32.mrb[21].mxu1  ;;  %v46_v19 = vadd.f32 %v45_v51, %v44_v41  ;;  %v4022_v51 = vld [vmem:[%s5629_s3 + $0x8] sm:$0xff] }
 0x11f   :  { %v584_v48 = vadd.f32 %v583_v44, %v3912_v4  ;;  %v585_v50 = vpop.f32.mrb[22].mxu0  ;;  %v867_v53 = vadd.f32 %v866_v49, %v3916_v5  ;;  %v868_v55 = vpop.f32.mrb[22].mxu1  ;;  %v50_v44 = vadd.f32 %v49_v24, %v48_v12  ;;  %v64_v24 = vadd.f32 %v63_v8, %v62_v46  ;;  %v4055_v8 = vld [vmem:[%s5629_s3 + $0x38] sm:$0xff] }
 0x120   :  { %1103 = vst [vmem:[#allocation2 + $0x140] sm:$0xff] %v582_v42  ;;  %v586_v54 = vadd.f32 %v585_v50, %v3904_v2  ;;  %v587_v56 = vpop.f32.mrb[23].mxu0  ;;  %1105 = vst [vmem:[#allocation2 + $0x150] sm:$0xff] %v865_v47  ;;  %v869_v61 = vadd.f32 %v868_v55, %v3908_v3  ;;  %v870_v7 = vpop.f32.mrb[23].mxu1  ;;  %v79_v42 = vrot.slane %v78_v20, 2  ;;  %v68_v47 = vadd.f32 %v67_v35, %v66_v15 }
 0x121   :  { %1104 = vst [vmem:[#allocation2 + $0x148] sm:$0xff] %v584_v48  ;;  %v588_v6 = vadd.f32 %v587_v56, %v3912_v4  ;;  %1106 = vst [vmem:[#allocation2 + $0x158] sm:$0xff] %v867_v53  ;;  %v871_v11 = vadd.f32 %v870_v7, %v3916_v5  ;;  %v74_v48 = vadd.f32 %v73_v36, %v72_v16  ;;  %v39_v50 = vrot.slane %v38_v40, 1 }
 0x122   :  { %1107 = vst [vmem:[#allocation2 + $0x160] sm:$0xff] %v586_v54  ;;  %1109 = vst [vmem:[#allocation2 + $0x170] sm:$0xff] %v869_v61  ;;  %v80_v52 = vadd.f32 %v79_v42, %v78_v20  ;;  %v51_v56 = vrot.slane %v50_v44, 1  ;;  %v57_v7 = vrot.slane %v56_v45, 1  ;;  %v69_v13 = vrot.slane %v68_v47, 1 }
 0x123   :  { %1108 = vst [vmem:[#allocation2 + $0x168] sm:$0xff] %v588_v6  ;;  %1110 = vst [vmem:[#allocation2 + $0x178] sm:$0xff] %v871_v11  ;;  %v75_v14 = vrot.slane %v74_v48, 1  ;;  %v40_v18 = vadd.f32 %v39_v50, %v38_v40  ;;  %v4017_v50 = vld [vmem:[%s5629_s3] sm:$0xff] }
 0x124   :  { %v81_v20 = vrot.slane %v80_v52, 1  ;;  %5664 = vst [vmem:[#allocation5_spill] sm:$0xff] %v4055_v8 }
 0x125   :  { %v591_v17 = vpop.f32.mrb[24].mxu0  ;;  %v874_v22 = vpop.f32.mrb[24].mxu1 }
 0x126   :  { %v592_v21 = vadd.f32 %v591_v17, %v3904_v2  ;;  %v593_v23 = vpop.f32.mrb[25].mxu0  ;;  %v875_v25 = vadd.f32 %v874_v22, %v3908_v3  ;;  %v876_v27 = vpop.f32.mrb[25].mxu1  ;;  %v52_v22 = vadd.f32 %v51_v56, %v50_v44  ;;  %v4039_v56 = vld [vmem:[%s5629_s3 + $0x20] sm:$0xff] }
 0x127   :  { %v594_v26 = vadd.f32 %v593_v23, %v3912_v4  ;;  %v595_v28 = vpop.f32.mrb[26].mxu0  ;;  %v877_v31 = vadd.f32 %v876_v27, %v3916_v5  ;;  %v878_v33 = vpop.f32.mrb[26].mxu1  ;;  %v58_v23 = vadd.f32 %v57_v7, %v56_v45  ;;  %v4050_v7 = vld [vmem:[%s5629_s3 + $0x30] sm:$0xff] }
 0x128   :  { %1111 = vst [vmem:[#allocation2 + $0x180] sm:$0xff] %v592_v21  ;;  %v596_v32 = vadd.f32 %v595_v28, %v3904_v2  ;;  %v597_v34 = vpop.f32.mrb[27].mxu0  ;;  %1113 = vst [vmem:[#allocation2 + $0x190] sm:$0xff] %v875_v25  ;;  %v879_v37 = vadd.f32 %v878_v33, %v3908_v3  ;;  %v880_v39 = vpop.f32.mrb[27].mxu1  ;;  %v70_v25 = vadd.f32 %v69_v13, %v68_v47 }
 0x129   :  { %1112 = vst [vmem:[#allocation2 + $0x188] sm:$0xff] %v594_v26  ;;  %v598_v38 = vadd.f32 %v597_v34, %v3912_v4  ;;  %1114 = vst [vmem:[#allocation2 + $0x198] sm:$0xff] %v877_v31  ;;  %v881_v43 = vadd.f32 %v880_v39, %v3916_v5  ;;  %v76_v26 = vadd.f32 %v75_v14, %v74_v48  ;;  %v4067_v14 = vld [vmem:[%s5629_s3 + $0x48] sm:$0xff] }
 0x12a   :  { %1115 = vst [vmem:[#allocation2 + $0x1a0] sm:$0xff] %v596_v32  ;;  %1117 = vst [vmem:[#allocation2 + $0x1b0] sm:$0xff] %v879_v37  ;;  %v82_v28 = vadd.f32 %v81_v20, %v80_v52  ;;  %v1304_v32 = vsel %vm1303_vm0, %v46_v19, %v40_v18  ;;  %v4027_v52 = vld [vmem:[%s5629_s3 + $0x10] sm:$0xff] }
 0x12b   :  { %1116 = vst [vmem:[#allocation2 + $0x1a8] sm:$0xff] %v598_v38  ;;  %1118 = vst [vmem:[#allocation2 + $0x1b8] sm:$0xff] %v881_v43  ;;  %v1306_v37 = vsel %vm1305_vm1, %v52_v22, %v1304_v32  ;;  %v4089_v22 = vld [vmem:[%s5629_s3 + $0x68] sm:$0xff]  ;;  %v4122_v32 = vld [vmem:[%s5629_s3 + $0x98] sm:$0xff] }
 0x12c   :  { %v1308_v42 = vsel %vm1307_vm2, %v58_v23, %v1306_v37  ;;  %5663 = vst [vmem:[#allocation4_spill] sm:$0xff] %v4050_v7  ;;  %5666 = vst [vmem:[#allocation7_spill] sm:$0xff] %v4067_v14  ;;  %v4094_v23 = vld [vmem:[%s5629_s3 + $0x70] sm:$0xff]  ;;  %v4147_v37 = vld [vmem:[%s5629_s3 + $0xc0] sm:$0xff] }
 0x12d   :  { %v601_v49 = vpop.f32.mrb[28].mxu0  ;;  %v884_v54 = vpop.f32.mrb[28].mxu1  ;;  %v1310_v46 = vsel %vm1309_vm3, %v64_v24, %v1308_v42  ;;  %5670 = vst [vmem:[#allocation11_spill] sm:$0xff] %v4089_v22  ;;  %5671 = vst [vmem:[#allocation12_spill] sm:$0xff] %v4094_v23  ;;  %v4167_v42 = vld [vmem:[%s5629_s3 + $0xe0] sm:$0xff] }
 0x12e   :  { %v602_v53 = vadd.f32 %v601_v49, %v3904_v2  ;;  %v603_v55 = vpop.f32.mrb[29].mxu0  ;;  %v885_v57 = vadd.f32 %v884_v54, %v3908_v3  ;;  %v886_v61 = vpop.f32.mrb[29].mxu1  ;;  %v1312_v48 = vsel %vm1311_vm4, %v70_v25, %v1310_v46  ;;  %5676 = vst [vmem:[#allocation17_spill] sm:$0xff] %v4122_v32  ;;  %5681 = vst [vmem:[#allocation22_spill] sm:$0xff] %v4147_v37 }
 0x12f   :  { %v604_v58 = vadd.f32 %v603_v55, %v3912_v4  ;;  %v605_v6 = vpop.f32.mrb[30].mxu0  ;;  %v887_v9 = vadd.f32 %v886_v61, %v3916_v5  ;;  %v888_v11 = vpop.f32.mrb[30].mxu1  ;;  %v1314_v49 = vsel %vm1313_vm5, %v76_v26, %v1312_v48  ;;  %v4034_v55 = vld [vmem:[%s5629_s3 + $0x18] sm:$0xff]  ;;  %5685 = vst [vmem:[#allocation26_spill] sm:$0xff] %v4167_v42 }
 0x130   :  { %1119 = vst [vmem:[#allocation2 + $0x1c0] sm:$0xff] %v602_v53  ;;  %v606_v10 = vadd.f32 %v605_v6, %v3904_v2  ;;  %v607_v12 = vpop.f32.mrb[31].mxu0  ;;  %1121 = vst [vmem:[#allocation2 + $0x1d0] sm:$0xff] %v885_v57  ;;  %v889_v15 = vadd.f32 %v888_v11, %v3908_v3  ;;  %v890_v17 = vpop.f32.mrb[31].mxu1  ;;  %v4029_v53 = vsel %vm1315_vm6, %v82_v28, %v1314_v49   ;;  %v4044_v57 = vld [vmem:[%s5629_s3 + $0x28] sm:$0xff]  ;;  %v4106_v28 = vld [vmem:[%s5629_s3 + $0x80] sm:$0xff] }
 0x131   :  { %1120 = vst [vmem:[#allocation2 + $0x1c8] sm:$0xff] %v604_v58  ;;  %v608_v16 = vadd.f32 %v607_v12, %v3912_v4  ;;  %1122 = vst [vmem:[#allocation2 + $0x1d8] sm:$0xff] %v887_v9  ;;  %v891_v21 = vadd.f32 %v890_v17, %v3916_v5  ;;  %v4060_v9 = vld [vmem:[%s5629_s3 + $0x40] sm:$0xff]  ;;  %v4183_v48 = vld [vmem:[%s5629_s3 + $0xf8] sm:$0xff] }
 0x132   :  { %1123 = vst [vmem:[#allocation2 + $0x1e0] sm:$0xff] %v606_v10  ;;  %1125 = vst [vmem:[#allocation2 + $0x1f0] sm:$0xff] %v889_v15  ;;  %v4072_v15 = vld [vmem:[%s5629_s3 + $0x50] sm:$0xff] }
 0x133   :  { %1124 = vst [vmem:[#allocation2 + $0x1e8] sm:$0xff] %v608_v16  ;;  %1126 = vst [vmem:[#allocation2 + $0x1f8] sm:$0xff] %v891_v21  ;;  %v4077_v16 = vld [vmem:[%s5629_s3 + $0x58] sm:$0xff]  ;;  %v4084_v21 = vld [vmem:[%s5629_s3 + $0x60] sm:$0xff] }
 0x134   :  { %5665 = vst [vmem:[#allocation6_spill] sm:$0xff] %v4060_v9  ;;  %5667 = vst [vmem:[#allocation8_spill] sm:$0xff] %v4072_v15 }
 0x135   :  { %v611_v27 = vpop.f32.mrb[32].mxu0  ;;  %v894_v30 = vpop.f32.mrb[32].mxu1  ;;  %5668 = vst [vmem:[#allocation9_spill] sm:$0xff] %v4077_v16  ;;  %5669 = vst [vmem:[#allocation10_spill] sm:$0xff] %v4084_v21 }
 0x136   :  { %v612_v29 = vadd.f32 %v611_v27, %v3904_v2  ;;  %v613_v31 = vpop.f32.mrb[33].mxu0  ;;  %v895_v33 = vadd.f32 %v894_v30, %v3908_v3  ;;  %v896_v35 = vpop.f32.mrb[33].mxu1  ;;  %v4101_v27 = vld [vmem:[%s5629_s3 + $0x78] sm:$0xff]  ;;  %5673 = vst [vmem:[#allocation14_spill] sm:$0xff] %v4106_v28 }
 0x137   :  { %v614_v34 = vadd.f32 %v613_v31, %v3912_v4  ;;  %v615_v36 = vpop.f32.mrb[34].mxu0  ;;  %v897_v38 = vadd.f32 %v896_v35, %v3916_v5  ;;  %v898_v40 = vpop.f32.mrb[34].mxu1  ;;  %5672 = vst [vmem:[#allocation13_spill] sm:$0xff] %v4101_v27  ;;  %v4117_v31 = vld [vmem:[%s5629_s3 + $0x90] sm:$0xff] }
 0x138   :  { %1127 = vst [vmem:[#allocation2 + $0x200] sm:$0xff] %v612_v29  ;;  %v616_v39 = vadd.f32 %v615_v36, %v3904_v2  ;;  %v617_v41 = vpop.f32.mrb[35].mxu0  ;;  %1129 = vst [vmem:[#allocation2 + $0x210] sm:$0xff] %v895_v33  ;;  %v899_v43 = vadd.f32 %v898_v40, %v3908_v3  ;;  %v900_v45 = vpop.f32.mrb[35].mxu1  ;;  %v4111_v29 = vld [vmem:[%s5629_s3 + $0x88] sm:$0xff]  ;;  %v4127_v33 = vld [vmem:[%s5629_s3 + $0xa0] sm:$0xff] }
 0x139   :  { %1128 = vst [vmem:[#allocation2 + $0x208] sm:$0xff] %v614_v34  ;;  %v618_v44 = vadd.f32 %v617_v41, %v3912_v4  ;;  %1130 = vst [vmem:[#allocation2 + $0x218] sm:$0xff] %v897_v38  ;;  %v901_v47 = vadd.f32 %v900_v45, %v3916_v5  ;;  %v4132_v34 = vld [vmem:[%s5629_s3 + $0xa8] sm:$0xff]  ;;  %v4137_v35 = vld [vmem:[%s5629_s3 + $0xb0] sm:$0xff] }
 0x13a   :  { %1131 = vst [vmem:[#allocation2 + $0x220] sm:$0xff] %v616_v39  ;;  %1133 = vst [vmem:[#allocation2 + $0x230] sm:$0xff] %v899_v43  ;;  %v4142_v36 = vld [vmem:[%s5629_s3 + $0xb8] sm:$0xff]  ;;  %v4152_v38 = vld [vmem:[%s5629_s3 + $0xc8] sm:$0xff] }
 0x13b   :  { %1132 = vst [vmem:[#allocation2 + $0x228] sm:$0xff] %v618_v44  ;;  %1134 = vst [vmem:[#allocation2 + $0x238] sm:$0xff] %v901_v47  ;;  %v4157_v39 = vld [vmem:[%s5629_s3 + $0xd0] sm:$0xff]  ;;  %v4162_v41 = vld [vmem:[%s5629_s3 + $0xd8] sm:$0xff] }
 0x13c   :  { %5674 = vst [vmem:[#allocation15_spill] sm:$0xff] %v4111_v29  ;;  %5675 = vst [vmem:[#allocation16_spill] sm:$0xff] %v4117_v31  ;;  %v4172_v43 = vld [vmem:[%s5629_s3 + $0xe8] sm:$0xff]  ;;  %v4178_v47 = vld [vmem:[%s5629_s3 + $0xf0] sm:$0xff]  ;;  %s4310_s3 = smov 0  }
 0x13d   :  { %v621_v54 = vpop.f32.mrb[36].mxu0  ;;  %v904_v61 = vpop.f32.mrb[36].mxu1  ;;  %5677 = vst [vmem:[#allocation18_spill] sm:$0xff] %v4127_v33  ;;  %5678 = vst [vmem:[#allocation19_spill] sm:$0xff] %v4132_v34 }
 0x13e   :  { %v622_v58 = vadd.f32 %v621_v54, %v3904_v2  ;;  %v623_v6 = vpop.f32.mrb[37].mxu0  ;;  %v905_v10 = vadd.f32 %v904_v61, %v3908_v3  ;;  %v906_v12 = vpop.f32.mrb[37].mxu1  ;;  %5679 = vst [vmem:[#allocation20_spill] sm:$0xff] %v4137_v35  ;;  %5680 = vst [vmem:[#allocation21_spill] sm:$0xff] %v4142_v36 }
 0x13f   :  { %v624_v11 = vadd.f32 %v623_v6, %v3912_v4  ;;  %v625_v13 = vpop.f32.mrb[38].mxu0  ;;  %v907_v17 = vadd.f32 %v906_v12, %v3916_v5  ;;  %v908_v19 = vpop.f32.mrb[38].mxu1  ;;  %5682 = vst [vmem:[#allocation23_spill] sm:$0xff] %v4152_v38  ;;  %5683 = vst [vmem:[#allocation24_spill] sm:$0xff] %v4157_v39 }
 0x140   :  { %1135 = vst [vmem:[#allocation2 + $0x240] sm:$0xff] %v622_v58  ;;  %v626_v18 = vadd.f32 %v625_v13, %v3904_v2  ;;  %v627_v20 = vpop.f32.mrb[39].mxu0  ;;  %1137 = vst [vmem:[#allocation2 + $0x250] sm:$0xff] %v905_v10  ;;  %v909_v24 = vadd.f32 %v908_v19, %v3908_v3  ;;  %v910_v26 = vpop.f32.mrb[39].mxu1 }
 0x141   :  { %1136 = vst [vmem:[#allocation2 + $0x248] sm:$0xff] %v624_v11  ;;  %v628_v25 = vadd.f32 %v627_v20, %v3912_v4  ;;  %1138 = vst [vmem:[#allocation2 + $0x258] sm:$0xff] %v907_v17  ;;  %v911_v30 = vadd.f32 %v910_v26, %v3916_v5 }
 0x142   :  { %1139 = vst [vmem:[#allocation2 + $0x260] sm:$0xff] %v626_v18  ;;  %1141 = vst [vmem:[#allocation2 + $0x270] sm:$0xff] %v909_v24 }
 0x143   :  { %1140 = vst [vmem:[#allocation2 + $0x268] sm:$0xff] %v628_v25  ;;  %1142 = vst [vmem:[#allocation2 + $0x278] sm:$0xff] %v911_v30 }
 0x144   :  { %5684 = vst [vmem:[#allocation25_spill] sm:$0xff] %v4162_v41  ;;  %5686 = vst [vmem:[#allocation27_spill] sm:$0xff] %v4172_v43 }
 0x145   :  { %v631_v40 = vpop.f32.mrb[40].mxu0  ;;  %v914_v45 = vpop.f32.mrb[40].mxu1  ;;  %5687 = vst [vmem:[#allocation28_spill] sm:$0xff] %v4178_v47 }
 0x146   :  { %v632_v44 = vadd.f32 %v631_v40, %v3904_v2  ;;  %v633_v46 = vpop.f32.mrb[41].mxu0  ;;  %v915_v49 = vadd.f32 %v914_v45, %v3908_v3  ;;  %v916_v58 = vpop.f32.mrb[41].mxu1 }
 0x147   :  { %v634_v54 = vadd.f32 %v633_v46, %v3912_v4  ;;  %v635_v61 = vpop.f32.mrb[42].mxu0  ;;  %v917_v6 = vadd.f32 %v916_v58, %v3916_v5  ;;  %v918_v11 = vpop.f32.mrb[42].mxu1 }
 0x148   :  { %1143 = vst [vmem:[#allocation2 + $0x280] sm:$0xff] %v632_v44  ;;  %v636_v10 = vadd.f32 %v635_v61, %v3904_v2  ;;  %v637_v12 = vpop.f32.mrb[43].mxu0  ;;  %1145 = vst [vmem:[#allocation2 + $0x290] sm:$0xff] %v915_v49  ;;  %v919_v13 = vadd.f32 %v918_v11, %v3908_v3  ;;  %v920_v18 = vpop.f32.mrb[43].mxu1 }
 0x149   :  { %1144 = vst [vmem:[#allocation2 + $0x288] sm:$0xff] %v634_v54  ;;  %v638_v17 = vadd.f32 %v637_v12, %v3912_v4  ;;  %1146 = vst [vmem:[#allocation2 + $0x298] sm:$0xff] %v917_v6  ;;  %v921_v19 = vadd.f32 %v920_v18, %v3916_v5 }
 0x14a   :  { %1147 = vst [vmem:[#allocation2 + $0x2a0] sm:$0xff] %v636_v10  ;;  %1149 = vst [vmem:[#allocation2 + $0x2b0] sm:$0xff] %v919_v13 }
 0x14b   :  { %1148 = vst [vmem:[#allocation2 + $0x2a8] sm:$0xff] %v638_v17  ;;  %1150 = vst [vmem:[#allocation2 + $0x2b8] sm:$0xff] %v921_v19 }
 0x14d   :  { %v641_v20 = vpop.f32.mrb[44].mxu0  ;;  %v924_v25 = vpop.f32.mrb[44].mxu1 }
 0x14e   :  { %v642_v24 = vadd.f32 %v641_v20, %v3904_v2  ;;  %v643_v26 = vpop.f32.mrb[45].mxu0  ;;  %v925_v30 = vadd.f32 %v924_v25, %v3908_v3  ;;  %v926_v44 = vpop.f32.mrb[45].mxu1 }
 0x14f   :  { %v644_v40 = vadd.f32 %v643_v26, %v3912_v4  ;;  %v645_v45 = vpop.f32.mrb[46].mxu0  ;;  %v927_v46 = vadd.f32 %v926_v44, %v3916_v5  ;;  %v928_v54 = vpop.f32.mrb[46].mxu1 }
 0x150   :  { %1151 = vst [vmem:[#allocation2 + $0x2c0] sm:$0xff] %v642_v24  ;;  %v646_v49 = vadd.f32 %v645_v45, %v3904_v2  ;;  %v647_v58 = vpop.f32.mrb[47].mxu0  ;;  %1153 = vst [vmem:[#allocation2 + $0x2d0] sm:$0xff] %v925_v30  ;;  %v929_v61 = vadd.f32 %v928_v54, %v3908_v3  ;;  %v930_v10 = vpop.f32.mrb[47].mxu1 }
 0x151   :  { %1152 = vst [vmem:[#allocation2 + $0x2c8] sm:$0xff] %v644_v40  ;;  %v648_v6 = vadd.f32 %v647_v58, %v3912_v4  ;;  %1154 = vst [vmem:[#allocation2 + $0x2d8] sm:$0xff] %v927_v46  ;;  %v931_v11 = vadd.f32 %v930_v10, %v3916_v5 }
 0x152   :  { %1155 = vst [vmem:[#allocation2 + $0x2e0] sm:$0xff] %v646_v49  ;;  %1157 = vst [vmem:[#allocation2 + $0x2f0] sm:$0xff] %v929_v61 }
 0x153   :  { %1156 = vst [vmem:[#allocation2 + $0x2e8] sm:$0xff] %v648_v6  ;;  %1158 = vst [vmem:[#allocation2 + $0x2f8] sm:$0xff] %v931_v11 }
 0x155   :  { %v651_v12 = vpop.f32.mrb[48].mxu0  ;;  %v934_v17 = vpop.f32.mrb[48].mxu1 }
 0x156   :  { %v652_v13 = vadd.f32 %v651_v12, %v3904_v2  ;;  %v653_v18 = vpop.f32.mrb[49].mxu0  ;;  %v935_v19 = vadd.f32 %v934_v17, %v3908_v3  ;;  %v936_v24 = vpop.f32.mrb[49].mxu1 }
 0x157   :  { %v654_v20 = vadd.f32 %v653_v18, %v3912_v4  ;;  %v655_v25 = vpop.f32.mrb[50].mxu0  ;;  %v937_v26 = vadd.f32 %v936_v24, %v3916_v5  ;;  %v938_v40 = vpop.f32.mrb[50].mxu1 }
 0x158   :  { %1159 = vst [vmem:[#allocation2 + $0x300] sm:$0xff] %v652_v13  ;;  %v656_v30 = vadd.f32 %v655_v25, %v3904_v2  ;;  %v657_v44 = vpop.f32.mrb[51].mxu0  ;;  %1161 = vst [vmem:[#allocation2 + $0x310] sm:$0xff] %v935_v19  ;;  %v939_v45 = vadd.f32 %v938_v40, %v3908_v3  ;;  %v940_v49 = vpop.f32.mrb[51].mxu1 }
 0x159   :  { %1160 = vst [vmem:[#allocation2 + $0x308] sm:$0xff] %v654_v20  ;;  %v658_v46 = vadd.f32 %v657_v44, %v3912_v4  ;;  %1162 = vst [vmem:[#allocation2 + $0x318] sm:$0xff] %v937_v26  ;;  %v941_v54 = vadd.f32 %v940_v49, %v3916_v5 }
 0x15a   :  { %1163 = vst [vmem:[#allocation2 + $0x320] sm:$0xff] %v656_v30  ;;  %1165 = vst [vmem:[#allocation2 + $0x330] sm:$0xff] %v939_v45 }
 0x15b   :  { %1164 = vst [vmem:[#allocation2 + $0x328] sm:$0xff] %v658_v46  ;;  %1166 = vst [vmem:[#allocation2 + $0x338] sm:$0xff] %v941_v54 }
 0x15d   :  { %v661_v58 = vpop.f32.mrb[52].mxu0  ;;  %v944_v6 = vpop.f32.mrb[52].mxu1 }
 0x15e   :  { %v662_v61 = vadd.f32 %v661_v58, %v3904_v2  ;;  %v663_v10 = vpop.f32.mrb[53].mxu0  ;;  %v945_v11 = vadd.f32 %v944_v6, %v3908_v3  ;;  %v946_v13 = vpop.f32.mrb[53].mxu1 }
 0x15f   :  { %v664_v12 = vadd.f32 %v663_v10, %v3912_v4  ;;  %v665_v17 = vpop.f32.mrb[54].mxu0  ;;  %v947_v18 = vadd.f32 %v946_v13, %v3916_v5  ;;  %v948_v20 = vpop.f32.mrb[54].mxu1 }
 0x160   :  { %1167 = vst [vmem:[#allocation2 + $0x340] sm:$0xff] %v662_v61  ;;  %v666_v19 = vadd.f32 %v665_v17, %v3904_v2  ;;  %v667_v24 = vpop.f32.mrb[55].mxu0  ;;  %1169 = vst [vmem:[#allocation2 + $0x350] sm:$0xff] %v945_v11  ;;  %v949_v25 = vadd.f32 %v948_v20, %v3908_v3  ;;  %v950_v30 = vpop.f32.mrb[55].mxu1 }
 0x161   :  { %1168 = vst [vmem:[#allocation2 + $0x348] sm:$0xff] %v664_v12  ;;  %v668_v26 = vadd.f32 %v667_v24, %v3912_v4  ;;  %1170 = vst [vmem:[#allocation2 + $0x358] sm:$0xff] %v947_v18  ;;  %v951_v40 = vadd.f32 %v950_v30, %v3916_v5 }
 0x162   :  { %1171 = vst [vmem:[#allocation2 + $0x360] sm:$0xff] %v666_v19  ;;  %1173 = vst [vmem:[#allocation2 + $0x370] sm:$0xff] %v949_v25 }
 0x163   :  { %1172 = vst [vmem:[#allocation2 + $0x368] sm:$0xff] %v668_v26  ;;  %1174 = vst [vmem:[#allocation2 + $0x378] sm:$0xff] %v951_v40 }
 0x165   :  { %v671_v44 = vpop.f32.mrb[56].mxu0  ;;  %v954_v46 = vpop.f32.mrb[56].mxu1 }
 0x166   :  { %v672_v45 = vadd.f32 %v671_v44, %v3904_v2  ;;  %v673_v49 = vpop.f32.mrb[57].mxu0  ;;  %v955_v54 = vadd.f32 %v954_v46, %v3908_v3  ;;  %v956_v61 = vpop.f32.mrb[57].mxu1 }
 0x167   :  { %v674_v58 = vadd.f32 %v673_v49, %v3912_v4  ;;  %v675_v6 = vpop.f32.mrb[58].mxu0  ;;  %v957_v10 = vadd.f32 %v956_v61, %v3916_v5  ;;  %v958_v12 = vpop.f32.mrb[58].mxu1 }
 0x168   :  { %1175 = vst [vmem:[#allocation2 + $0x380] sm:$0xff] %v672_v45  ;;  %v676_v11 = vadd.f32 %v675_v6, %v3904_v2  ;;  %v677_v13 = vpop.f32.mrb[59].mxu0  ;;  %1177 = vst [vmem:[#allocation2 + $0x390] sm:$0xff] %v955_v54  ;;  %v959_v17 = vadd.f32 %v958_v12, %v3908_v3  ;;  %v960_v19 = vpop.f32.mrb[59].mxu1 }
 0x169   :  { %1176 = vst [vmem:[#allocation2 + $0x388] sm:$0xff] %v674_v58  ;;  %v678_v18 = vadd.f32 %v677_v13, %v3912_v4  ;;  %1178 = vst [vmem:[#allocation2 + $0x398] sm:$0xff] %v957_v10  ;;  %v961_v20 = vadd.f32 %v960_v19, %v3916_v5 }
 0x16a   :  { %1179 = vst [vmem:[#allocation2 + $0x3a0] sm:$0xff] %v676_v11  ;;  %1181 = vst [vmem:[#allocation2 + $0x3b0] sm:$0xff] %v959_v17 }
 0x16b   :  { %1180 = vst [vmem:[#allocation2 + $0x3a8] sm:$0xff] %v678_v18  ;;  %1182 = vst [vmem:[#allocation2 + $0x3b8] sm:$0xff] %v961_v20 }
 0x16d   :  { %v681_v24 = vpop.f32.mrb[60].mxu0  ;;  %v964_v26 = vpop.f32.mrb[60].mxu1 }
 0x16e   :  { %v682_v25 = vadd.f32 %v681_v24, %v3904_v2  ;;  %v683_v30 = vpop.f32.mrb[61].mxu0  ;;  %v965_v40 = vadd.f32 %v964_v26, %v3908_v3  ;;  %v966_v45 = vpop.f32.mrb[61].mxu1 }
 0x16f   :  { %v684_v44 = vadd.f32 %v683_v30, %v3912_v4  ;;  %v685_v46 = vpop.f32.mrb[62].mxu0  ;;  %v967_v49 = vadd.f32 %v966_v45, %v3916_v5  ;;  %v968_v58 = vpop.f32.mrb[62].mxu1 }
 0x170   :  { %1183 = vst [vmem:[#allocation2 + $0x3c0] sm:$0xff] %v682_v25  ;;  %v686_v54 = vadd.f32 %v685_v46, %v3904_v2  ;;  %v687_v61 = vpop.f32.mrb[63].mxu0  ;;  %1185 = vst [vmem:[#allocation2 + $0x3d0] sm:$0xff] %v965_v40  ;;  %v969_v6 = vadd.f32 %v968_v58, %v3908_v3  ;;  %v970_v11 = vpop.f32.mrb[63].mxu1 }
 0x171   :  { %1184 = vst [vmem:[#allocation2 + $0x3c8] sm:$0xff] %v684_v44  ;;  %v688_v10 = vadd.f32 %v687_v61, %v3912_v4  ;;  %1186 = vst [vmem:[#allocation2 + $0x3d8] sm:$0xff] %v967_v49  ;;  %v971_v12 = vadd.f32 %v970_v11, %v3916_v5 }
 0x172   :  { %1187 = vst [vmem:[#allocation2 + $0x3e0] sm:$0xff] %v686_v54  ;;  %1189 = vst [vmem:[#allocation2 + $0x3f0] sm:$0xff] %v969_v6 }
 0x173   :  { %1188 = vst [vmem:[#allocation2 + $0x3e8] sm:$0xff] %v688_v10  ;;  %1190 = vst [vmem:[#allocation2 + $0x3f8] sm:$0xff] %v971_v12 }
 0x175   :  { %v691_v13 = vpop.f32.mrb[64].mxu0  ;;  %v974_v18 = vpop.f32.mrb[64].mxu1 }
 0x176   :  { %v692_v17 = vadd.f32 %v691_v13, %v3904_v2  ;;  %v693_v19 = vpop.f32.mrb[65].mxu0  ;;  %v975_v20 = vadd.f32 %v974_v18, %v3908_v3  ;;  %v976_v25 = vpop.f32.mrb[65].mxu1 }
 0x177   :  { %v694_v24 = vadd.f32 %v693_v19, %v3912_v4  ;;  %v695_v26 = vpop.f32.mrb[66].mxu0  ;;  %v977_v30 = vadd.f32 %v976_v25, %v3916_v5  ;;  %v978_v44 = vpop.f32.mrb[66].mxu1 }
 0x178   :  { %1191 = vst [vmem:[#allocation2 + $0x400] sm:$0xff] %v692_v17  ;;  %v696_v40 = vadd.f32 %v695_v26, %v3904_v2  ;;  %v697_v45 = vpop.f32.mrb[67].mxu0  ;;  %1193 = vst [vmem:[#allocation2 + $0x410] sm:$0xff] %v975_v20  ;;  %v979_v46 = vadd.f32 %v978_v44, %v3908_v3  ;;  %v980_v54 = vpop.f32.mrb[67].mxu1 }
 0x179   :  { %1192 = vst [vmem:[#allocation2 + $0x408] sm:$0xff] %v694_v24  ;;  %v698_v49 = vadd.f32 %v697_v45, %v3912_v4  ;;  %1194 = vst [vmem:[#allocation2 + $0x418] sm:$0xff] %v977_v30  ;;  %v981_v58 = vadd.f32 %v980_v54, %v3916_v5 }
 0x17a   :  { %1195 = vst [vmem:[#allocation2 + $0x420] sm:$0xff] %v696_v40  ;;  %1197 = vst [vmem:[#allocation2 + $0x430] sm:$0xff] %v979_v46 }
 0x17b   :  { %1196 = vst [vmem:[#allocation2 + $0x428] sm:$0xff] %v698_v49  ;;  %1198 = vst [vmem:[#allocation2 + $0x438] sm:$0xff] %v981_v58 }
 0x17d   :  { %v701_v61 = vpop.f32.mrb[68].mxu0  ;;  %v984_v10 = vpop.f32.mrb[68].mxu1 }
 0x17e   :  { %v702_v6 = vadd.f32 %v701_v61, %v3904_v2  ;;  %v703_v11 = vpop.f32.mrb[69].mxu0  ;;  %v985_v12 = vadd.f32 %v984_v10, %v3908_v3  ;;  %v986_v17 = vpop.f32.mrb[69].mxu1 }
 0x17f   :  { %v704_v13 = vadd.f32 %v703_v11, %v3912_v4  ;;  %v705_v18 = vpop.f32.mrb[70].mxu0  ;;  %v987_v19 = vadd.f32 %v986_v17, %v3916_v5  ;;  %v988_v24 = vpop.f32.mrb[70].mxu1 }
 0x180   :  { %1199 = vst [vmem:[#allocation2 + $0x440] sm:$0xff] %v702_v6  ;;  %v706_v20 = vadd.f32 %v705_v18, %v3904_v2  ;;  %v707_v25 = vpop.f32.mrb[71].mxu0  ;;  %1201 = vst [vmem:[#allocation2 + $0x450] sm:$0xff] %v985_v12  ;;  %v989_v26 = vadd.f32 %v988_v24, %v3908_v3  ;;  %v990_v40 = vpop.f32.mrb[71].mxu1 }
 0x181   :  { %1200 = vst [vmem:[#allocation2 + $0x448] sm:$0xff] %v704_v13  ;;  %v708_v30 = vadd.f32 %v707_v25, %v3912_v4  ;;  %1202 = vst [vmem:[#allocation2 + $0x458] sm:$0xff] %v987_v19  ;;  %v991_v44 = vadd.f32 %v990_v40, %v3916_v5 }
 0x182   :  { %1203 = vst [vmem:[#allocation2 + $0x460] sm:$0xff] %v706_v20  ;;  %1205 = vst [vmem:[#allocation2 + $0x470] sm:$0xff] %v989_v26 }
 0x183   :  { %1204 = vst [vmem:[#allocation2 + $0x468] sm:$0xff] %v708_v30  ;;  %1206 = vst [vmem:[#allocation2 + $0x478] sm:$0xff] %v991_v44 }
 0x185   :  { %v711_v45 = vpop.f32.mrb[72].mxu0  ;;  %v994_v49 = vpop.f32.mrb[72].mxu1 }
 0x186   :  { %v712_v46 = vadd.f32 %v711_v45, %v3904_v2  ;;  %v713_v54 = vpop.f32.mrb[73].mxu0  ;;  %v995_v58 = vadd.f32 %v994_v49, %v3908_v3  ;;  %v996_v6 = vpop.f32.mrb[73].mxu1 }
 0x187   :  { %v714_v61 = vadd.f32 %v713_v54, %v3912_v4  ;;  %v715_v10 = vpop.f32.mrb[74].mxu0  ;;  %v997_v11 = vadd.f32 %v996_v6, %v3916_v5  ;;  %v998_v13 = vpop.f32.mrb[74].mxu1 }
 0x188   :  { %1207 = vst [vmem:[#allocation2 + $0x480] sm:$0xff] %v712_v46  ;;  %v716_v12 = vadd.f32 %v715_v10, %v3904_v2  ;;  %v717_v17 = vpop.f32.mrb[75].mxu0  ;;  %1209 = vst [vmem:[#allocation2 + $0x490] sm:$0xff] %v995_v58  ;;  %v999_v18 = vadd.f32 %v998_v13, %v3908_v3  ;;  %v1000_v20 = vpop.f32.mrb[75].mxu1 }
 0x189   :  { %1208 = vst [vmem:[#allocation2 + $0x488] sm:$0xff] %v714_v61  ;;  %v718_v19 = vadd.f32 %v717_v17, %v3912_v4  ;;  %1210 = vst [vmem:[#allocation2 + $0x498] sm:$0xff] %v997_v11  ;;  %v1001_v24 = vadd.f32 %v1000_v20, %v3916_v5 }
 0x18a   :  { %1211 = vst [vmem:[#allocation2 + $0x4a0] sm:$0xff] %v716_v12  ;;  %1213 = vst [vmem:[#allocation2 + $0x4b0] sm:$0xff] %v999_v18 }
 0x18b   :  { %1212 = vst [vmem:[#allocation2 + $0x4a8] sm:$0xff] %v718_v19  ;;  %1214 = vst [vmem:[#allocation2 + $0x4b8] sm:$0xff] %v1001_v24 }
 0x18d   :  { %v721_v25 = vpop.f32.mrb[76].mxu0  ;;  %v1004_v30 = vpop.f32.mrb[76].mxu1 }
 0x18e   :  { %v722_v26 = vadd.f32 %v721_v25, %v3904_v2  ;;  %v723_v40 = vpop.f32.mrb[77].mxu0  ;;  %v1005_v44 = vadd.f32 %v1004_v30, %v3908_v3  ;;  %v1006_v46 = vpop.f32.mrb[77].mxu1 }
 0x18f   :  { %v724_v45 = vadd.f32 %v723_v40, %v3912_v4  ;;  %v725_v49 = vpop.f32.mrb[78].mxu0  ;;  %v1007_v54 = vadd.f32 %v1006_v46, %v3916_v5  ;;  %v1008_v61 = vpop.f32.mrb[78].mxu1 }
 0x190   :  { %1215 = vst [vmem:[#allocation2 + $0x4c0] sm:$0xff] %v722_v26  ;;  %v726_v58 = vadd.f32 %v725_v49, %v3904_v2  ;;  %v727_v6 = vpop.f32.mrb[79].mxu0  ;;  %1217 = vst [vmem:[#allocation2 + $0x4d0] sm:$0xff] %v1005_v44  ;;  %v1009_v10 = vadd.f32 %v1008_v61, %v3908_v3  ;;  %v1010_v12 = vpop.f32.mrb[79].mxu1 }
 0x191   :  { %1216 = vst [vmem:[#allocation2 + $0x4c8] sm:$0xff] %v724_v45  ;;  %v728_v11 = vadd.f32 %v727_v6, %v3912_v4  ;;  %1218 = vst [vmem:[#allocation2 + $0x4d8] sm:$0xff] %v1007_v54  ;;  %v1011_v13 = vadd.f32 %v1010_v12, %v3916_v5 }
 0x192   :  { %1219 = vst [vmem:[#allocation2 + $0x4e0] sm:$0xff] %v726_v58  ;;  %1221 = vst [vmem:[#allocation2 + $0x4f0] sm:$0xff] %v1009_v10 }
 0x193   :  { %1220 = vst [vmem:[#allocation2 + $0x4e8] sm:$0xff] %v728_v11  ;;  %1222 = vst [vmem:[#allocation2 + $0x4f8] sm:$0xff] %v1011_v13 }
 0x195   :  { %v731_v17 = vpop.f32.mrb[80].mxu0  ;;  %v1014_v19 = vpop.f32.mrb[80].mxu1 }
 0x196   :  { %v732_v18 = vadd.f32 %v731_v17, %v3904_v2  ;;  %v733_v20 = vpop.f32.mrb[81].mxu0  ;;  %v1015_v24 = vadd.f32 %v1014_v19, %v3908_v3  ;;  %v1016_v26 = vpop.f32.mrb[81].mxu1 }
 0x197   :  { %v734_v25 = vadd.f32 %v733_v20, %v3912_v4  ;;  %v735_v30 = vpop.f32.mrb[82].mxu0  ;;  %v1017_v40 = vadd.f32 %v1016_v26, %v3916_v5  ;;  %v1018_v45 = vpop.f32.mrb[82].mxu1 }
 0x198   :  { %1223 = vst [vmem:[#allocation2 + $0x500] sm:$0xff] %v732_v18  ;;  %v736_v44 = vadd.f32 %v735_v30, %v3904_v2  ;;  %v737_v46 = vpop.f32.mrb[83].mxu0  ;;  %1225 = vst [vmem:[#allocation2 + $0x510] sm:$0xff] %v1015_v24  ;;  %v1019_v49 = vadd.f32 %v1018_v45, %v3908_v3  ;;  %v1020_v58 = vpop.f32.mrb[83].mxu1 }
 0x199   :  { %1224 = vst [vmem:[#allocation2 + $0x508] sm:$0xff] %v734_v25  ;;  %v738_v54 = vadd.f32 %v737_v46, %v3912_v4  ;;  %1226 = vst [vmem:[#allocation2 + $0x518] sm:$0xff] %v1017_v40  ;;  %v1021_v61 = vadd.f32 %v1020_v58, %v3916_v5 }
 0x19a   :  { %1227 = vst [vmem:[#allocation2 + $0x520] sm:$0xff] %v736_v44  ;;  %1229 = vst [vmem:[#allocation2 + $0x530] sm:$0xff] %v1019_v49 }
 0x19b   :  { %1228 = vst [vmem:[#allocation2 + $0x528] sm:$0xff] %v738_v54  ;;  %1230 = vst [vmem:[#allocation2 + $0x538] sm:$0xff] %v1021_v61 }
 0x19d   :  { %v741_v6 = vpop.f32.mrb[84].mxu0  ;;  %v1024_v11 = vpop.f32.mrb[84].mxu1 }
 0x19e   :  { %v742_v10 = vadd.f32 %v741_v6, %v3904_v2  ;;  %v743_v12 = vpop.f32.mrb[85].mxu0  ;;  %v1025_v13 = vadd.f32 %v1024_v11, %v3908_v3  ;;  %v1026_v18 = vpop.f32.mrb[85].mxu1 }
 0x19f   :  { %v744_v17 = vadd.f32 %v743_v12, %v3912_v4  ;;  %v745_v19 = vpop.f32.mrb[86].mxu0  ;;  %v1027_v20 = vadd.f32 %v1026_v18, %v3916_v5  ;;  %v1028_v25 = vpop.f32.mrb[86].mxu1 }
 0x1a0   :  { %1231 = vst [vmem:[#allocation2 + $0x540] sm:$0xff] %v742_v10  ;;  %v746_v24 = vadd.f32 %v745_v19, %v3904_v2  ;;  %v747_v26 = vpop.f32.mrb[87].mxu0  ;;  %1233 = vst [vmem:[#allocation2 + $0x550] sm:$0xff] %v1025_v13  ;;  %v1029_v30 = vadd.f32 %v1028_v25, %v3908_v3  ;;  %v1030_v44 = vpop.f32.mrb[87].mxu1 }
 0x1a1   :  { %1232 = vst [vmem:[#allocation2 + $0x548] sm:$0xff] %v744_v17  ;;  %v748_v40 = vadd.f32 %v747_v26, %v3912_v4  ;;  %1234 = vst [vmem:[#allocation2 + $0x558] sm:$0xff] %v1027_v20  ;;  %v1031_v45 = vadd.f32 %v1030_v44, %v3916_v5 }
 0x1a2   :  { %1235 = vst [vmem:[#allocation2 + $0x560] sm:$0xff] %v746_v24  ;;  %1237 = vst [vmem:[#allocation2 + $0x570] sm:$0xff] %v1029_v30 }
 0x1a3   :  { %1236 = vst [vmem:[#allocation2 + $0x568] sm:$0xff] %v748_v40  ;;  %1238 = vst [vmem:[#allocation2 + $0x578] sm:$0xff] %v1031_v45 }
 0x1a5   :  { %v751_v46 = vpop.f32.mrb[88].mxu0  ;;  %v1034_v54 = vpop.f32.mrb[88].mxu1 }
 0x1a6   :  { %v752_v49 = vadd.f32 %v751_v46, %v3904_v2  ;;  %v753_v58 = vpop.f32.mrb[89].mxu0  ;;  %v1035_v61 = vadd.f32 %v1034_v54, %v3908_v3  ;;  %v1036_v10 = vpop.f32.mrb[89].mxu1 }
 0x1a7   :  { %v754_v6 = vadd.f32 %v753_v58, %v3912_v4  ;;  %v755_v11 = vpop.f32.mrb[90].mxu0  ;;  %v1037_v12 = vadd.f32 %v1036_v10, %v3916_v5  ;;  %v1038_v17 = vpop.f32.mrb[90].mxu1 }
 0x1a8   :  { %1239 = vst [vmem:[#allocation2 + $0x580] sm:$0xff] %v752_v49  ;;  %v756_v13 = vadd.f32 %v755_v11, %v3904_v2  ;;  %v757_v18 = vpop.f32.mrb[91].mxu0  ;;  %1241 = vst [vmem:[#allocation2 + $0x590] sm:$0xff] %v1035_v61  ;;  %v1039_v19 = vadd.f32 %v1038_v17, %v3908_v3  ;;  %v1040_v24 = vpop.f32.mrb[91].mxu1 }
 0x1a9   :  { %1240 = vst [vmem:[#allocation2 + $0x588] sm:$0xff] %v754_v6  ;;  %v758_v20 = vadd.f32 %v757_v18, %v3912_v4  ;;  %1242 = vst [vmem:[#allocation2 + $0x598] sm:$0xff] %v1037_v12  ;;  %v1041_v25 = vadd.f32 %v1040_v24, %v3916_v5 }
 0x1aa   :  { %1243 = vst [vmem:[#allocation2 + $0x5a0] sm:$0xff] %v756_v13  ;;  %1245 = vst [vmem:[#allocation2 + $0x5b0] sm:$0xff] %v1039_v19 }
 0x1ab   :  { %1244 = vst [vmem:[#allocation2 + $0x5a8] sm:$0xff] %v758_v20  ;;  %1246 = vst [vmem:[#allocation2 + $0x5b8] sm:$0xff] %v1041_v25 }
 0x1ad   :  { %v761_v26 = vpop.f32.mrb[92].mxu0  ;;  %v1044_v40 = vpop.f32.mrb[92].mxu1 }
 0x1ae   :  { %v762_v30 = vadd.f32 %v761_v26, %v3904_v2  ;;  %v763_v44 = vpop.f32.mrb[93].mxu0  ;;  %v1045_v45 = vadd.f32 %v1044_v40, %v3908_v3  ;;  %v1046_v49 = vpop.f32.mrb[93].mxu1 }
 0x1af   :  { %v764_v46 = vadd.f32 %v763_v44, %v3912_v4  ;;  %v765_v54 = vpop.f32.mrb[94].mxu0  ;;  %v1047_v58 = vadd.f32 %v1046_v49, %v3916_v5  ;;  %v1048_v6 = vpop.f32.mrb[94].mxu1 }
 0x1b0   :  { %1247 = vst [vmem:[#allocation2 + $0x5c0] sm:$0xff] %v762_v30  ;;  %v766_v61 = vadd.f32 %v765_v54, %v3904_v2  ;;  %v767_v10 = vpop.f32.mrb[95].mxu0  ;;  %1249 = vst [vmem:[#allocation2 + $0x5d0] sm:$0xff] %v1045_v45  ;;  %v1049_v11 = vadd.f32 %v1048_v6, %v3908_v3  ;;  %v1050_v13 = vpop.f32.mrb[95].mxu1 }
 0x1b1   :  { %1248 = vst [vmem:[#allocation2 + $0x5c8] sm:$0xff] %v764_v46  ;;  %v768_v12 = vadd.f32 %v767_v10, %v3912_v4  ;;  %1250 = vst [vmem:[#allocation2 + $0x5d8] sm:$0xff] %v1047_v58  ;;  %v1051_v17 = vadd.f32 %v1050_v13, %v3916_v5  ;;  %v5688_v10 = vmov %v4029_v53 }
 0x1b2   :  { %1251 = vst [vmem:[#allocation2 + $0x5e0] sm:$0xff] %v766_v61  ;;  %1253 = vst [vmem:[#allocation2 + $0x5f0] sm:$0xff] %v1049_v11 }
 0x1b3   :  { %1252 = vst [vmem:[#allocation2 + $0x5e8] sm:$0xff] %v768_v12  ;;  %1254 = vst [vmem:[#allocation2 + $0x5f8] sm:$0xff] %v1051_v17 }
 0x1b5   :  { %v771_v18 = vpop.f32.mrb[96].mxu0  ;;  %v1054_v20 = vpop.f32.mrb[96].mxu1 }
 0x1b6   :  { %v772_v19 = vadd.f32 %v771_v18, %v3904_v2  ;;  %v773_v24 = vpop.f32.mrb[97].mxu0  ;;  %v1055_v25 = vadd.f32 %v1054_v20, %v3908_v3  ;;  %v1056_v30 = vpop.f32.mrb[97].mxu1 }
 0x1b7   :  { %v774_v26 = vadd.f32 %v773_v24, %v3912_v4  ;;  %v775_v40 = vpop.f32.mrb[98].mxu0  ;;  %v1057_v44 = vadd.f32 %v1056_v30, %v3916_v5  ;;  %v1058_v46 = vpop.f32.mrb[98].mxu1 }
 0x1b8   :  { %1255 = vst [vmem:[#allocation2 + $0x600] sm:$0xff] %v772_v19  ;;  %v776_v45 = vadd.f32 %v775_v40, %v3904_v2  ;;  %v777_v49 = vpop.f32.mrb[99].mxu0  ;;  %1257 = vst [vmem:[#allocation2 + $0x610] sm:$0xff] %v1055_v25  ;;  %v1059_v54 = vadd.f32 %v1058_v46, %v3908_v3  ;;  %v1060_v61 = vpop.f32.mrb[99].mxu1 }
 0x1b9   :  { %1256 = vst [vmem:[#allocation2 + $0x608] sm:$0xff] %v774_v26  ;;  %v778_v58 = vadd.f32 %v777_v49, %v3912_v4  ;;  %1258 = vst [vmem:[#allocation2 + $0x618] sm:$0xff] %v1057_v44  ;;  %v1061_v6 = vadd.f32 %v1060_v61, %v3916_v5 }
 0x1ba   :  { %1259 = vst [vmem:[#allocation2 + $0x620] sm:$0xff] %v776_v45  ;;  %1261 = vst [vmem:[#allocation2 + $0x630] sm:$0xff] %v1059_v54 }
 0x1bb   :  { %1260 = vst [vmem:[#allocation2 + $0x628] sm:$0xff] %v778_v58  ;;  %1262 = vst [vmem:[#allocation2 + $0x638] sm:$0xff] %v1061_v6 }
 0x1bc LB: > { %v5689_v47 = vld [vmem:[#allocation28_spill] sm:$0xff]  ;;  %v5690_v43 = vld [vmem:[#allocation27_spill] sm:$0xff]  ;;  %v5691_v42 = vld [vmem:[#allocation26_spill] sm:$0xff]  ;;  %v4323_v2 = vcombine.high %v4017_v50, %v4027_v52  ;;  %v4327_v3 = vcombine.low %v4017_v50, %v4027_v52  ;;  %v4335_v5 = vcombine.high %v4022_v51, %v4034_v55  ;;  %v4340_v11 = vcombine.low %v4022_v51, %v4034_v55  ;;  %s4522_s22 = smul.u32 40, %s3628_s3  ;;  %s1323_s3 = sadd.s32 1, %s3628_s3   ;;  %v3620_v10 = vphi %v5688_v10, %v2101_v10   ;;  %s3628_s3 = sphi %s4310_s3, %s1323_s3   ;;  %v3624_v53 = vphi %v4029_v53, %v2103_v53  }
 0x1bd   : > { %v5692_v41 = vld [vmem:[#allocation25_spill] sm:$0xff]  ;;  %v5693_v39 = vld [vmem:[#allocation24_spill] sm:$0xff]  ;;  %v5694_v38 = vld [vmem:[#allocation23_spill] sm:$0xff]  ;;  %v5636_v20 = vmov 0   ;;  %v4457_v0 = vcombine.high %v5691_v42, %v5689_v47  ;;  %p1320_p0 = scmp.ge.s32.totalorder %s1323_s3, 10  }
 0x1be   : > { %v5695_v37 = vld [vmem:[#allocation22_spill] sm:$0xff]  ;;  %v5696_v36 = vld [vmem:[#allocation21_spill] sm:$0xff]  ;;  %v5697_v35 = vld [vmem:[#allocation20_spill] sm:$0xff]  ;;  %1497 = vmatprep.subr.bf16.mxu0 %v4323_v2  ;;  %1538 = vmatprep.subr.bf16.mxu1 %v4335_v5  ;;  %v4447_v62 = vcombine.high %v5694_v38, %v5692_v41  ;;  %s1327_s1 = sshra.s32 %s4522_s22, 3  ;;  %s4530_s23 = scalar_lea.vmem [#allocation3], %s4522_s22 }
 0x1bf   : > { %v5698_v34 = vld [vmem:[#allocation19_spill] sm:$0xff]  ;;  %v5699_v33 = vld [vmem:[#allocation18_spill] sm:$0xff]  ;;  %v5700_v32 = vld [vmem:[#allocation17_spill] sm:$0xff]  ;;  %1498 = vmatpush1.bf16.msra.mxu0 %v4327_v3  ;;  %1539 = vmatpush1.bf16.msra.mxu1 %v4340_v11  ;;  %v4437_v1 = vcombine.high %v5695_v37, %v5693_v39  ;;  %v4452_v60 = vcombine.low %v5695_v37, %v5693_v39  ;;  %s3362_s4 = sshll.u32 %s1327_s1, 5  ;;  %s3364_s24 = sadd.s32 8, %s4522_s22 }
 0x1c0   : > { %v5701_v31 = vld [vmem:[#allocation16_spill] sm:$0xff]  ;;  %v5702_v29 = vld [vmem:[#allocation15_spill] sm:$0xff]  ;;  %v5703_v28 = vld [vmem:[#allocation14_spill] sm:$0xff]  ;;  %1529 = vmatprep.mubr.bf16.mxu0 %v5636_v20  ;;  %1570 = vmatprep.mubr.bf16.mxu1 %v5636_v20  ;;  %v4417_v54 = vcombine.high %v5699_v33, %v5697_v35  ;;  %v4427_v61 = vcombine.high %v5698_v34, %v5696_v36  ;;  %v4432_v6 = vcombine.low %v5699_v33, %v5697_v35  ;;  %s1331_s2 = scalar_lea.vmem [#allocation2], %s3362_s4  ;;  %s1612_s25 = sshra.s32 %s3364_s24, 3 }
 0x1c1   : > { %v5704_v27 = vld [vmem:[#allocation13_spill] sm:$0xff]  ;;  %v5705_v23 = vld [vmem:[#allocation12_spill] sm:$0xff]  ;;  %v5706_v22 = vld [vmem:[#allocation11_spill] sm:$0xff]  ;;  %v4397_v44 = vcombine.high %v5703_v28, %v5701_v31  ;;  %v4407_v46 = vcombine.high %v5702_v29, %v5700_v32  ;;  %v4412_v49 = vcombine.low %v5703_v28, %v5701_v31  ;;  %v4422_v58 = vcombine.low %v5702_v29, %v5700_v32  ;;  %s3365_s26 = sshll.u32 %s1612_s25, 5  ;;  %s3367_s28 = sadd.s32 16, %s4522_s22 }
 0x1c2   : > { %v5707_v21 = vld [vmem:[#allocation10_spill] sm:$0xff]  ;;  %v5708_v16 = vld [vmem:[#allocation9_spill] sm:$0xff]  ;;  %v5709_v15 = vld [vmem:[#allocation8_spill] sm:$0xff]  ;;  %v4387_v30 = vcombine.high %v5706_v22, %v5704_v27  ;;  %v4402_v45 = vcombine.low %v5706_v22, %v5704_v27  ;;  %v4442_v63 = vcombine.low %v5698_v34, %v5696_v36  ;;  %v4462_v20 = vcombine.low %v5694_v38, %v5692_v41  ;;  %s1616_s27 = scalar_lea.vmem [#allocation2], %s3365_s26  ;;  %s1736_s29 = sshra.s32 %s3367_s28, 3 }
 0x1c3   : > { %v5710_v14 = vld [vmem:[#allocation7_spill] sm:$0xff]  ;;  %v5711_v9 = vld [vmem:[#allocation6_spill] sm:$0xff]  ;;  %v5712_v8 = vld [vmem:[#allocation5_spill] sm:$0xff]  ;;  %v4377_v25 = vcombine.high %v5707_v21, %v5705_v23  ;;  %v4392_v40 = vcombine.low %v5707_v21, %v5705_v23  ;;  %s3368_s30 = sshll.u32 %s1736_s29, 5  ;;  %s3370_s9 = sadd.s32 24, %s4522_s22 }
 0x1c4   : > { %v5713_v7 = vld [vmem:[#allocation4_spill] sm:$0xff]  ;;  %v4344_v12 = vcombine.high %v4044_v57, %v5712_v8  ;;  %v4355_v17 = vcombine.high %v5711_v9, %v5709_v15  ;;  %v4360_v18 = vcombine.low %v4044_v57, %v5712_v8  ;;  %v4365_v19 = vcombine.high %v5710_v14, %v5708_v16  ;;  %v1335_v35 = vld [vmem:[%s1331_s2 + $0x18] sm:$0xff]  ;;  %s1740_s8 = scalar_lea.vmem [#allocation2], %s3368_s30  ;;  %s1860_s10 = sshra.s32 %s3370_s9, 3 }
 0x1c5   : > { %v4331_v4 = vcombine.high %v4039_v56, %v5713_v7  ;;  %v4349_v13 = vcombine.low %v4039_v56, %v5713_v7  ;;  %v4371_v24 = vcombine.low %v5711_v9, %v5709_v15  ;;  %v4382_v26 = vcombine.low %v5710_v14, %v5708_v16  ;;  %v1334_v38 = vld [vmem:[%s1331_s2 + $0x10] sm:$0xff]  ;;  %s3371_s11 = sshll.u32 %s1860_s10, 5  ;;  %s3373_s0 = sadd.s32 32, %s4522_s22  ;;  %v3563_v50 = vld [vmem:[%s5622_s5 + $0x8] ss:$16 sps:$4 sm:$0xff] (%p1320_p0)  }
 0x1c6   : > { %1540 = vmatprep.subr.bf16.mxu1 %v4344_v12  ;;  %v4467_v7 = vcombine.high %v5690_v43, %v4183_v48  ;;  %v4472_v8 = vcombine.low %v5691_v42, %v5689_v47  ;;  %v4478_v9 = vcombine.low %v5690_v43, %v4183_v48  ;;  %v1336_v14 = vpack.c.bf16 %v3624_v53, %v3624_v53  ;;  %v1332_v53 = vld [vmem:[%s1331_s2] sm:$0xff]  ;;  %s1864_s12 = scalar_lea.vmem [#allocation2], %s3371_s11  ;;  %s1984_s13 = sshra.s32 %s3373_s0, 3  ;;  %v3566_v52 = vld [vmem:[%s5622_s5 + $0x2c] ss:$16 sps:$4 sm:$0xff] (%p1320_p0)  }
 0x1c7   : > { %1499 = vmatprep.subr.bf16.mxu0 %v4331_v4  ;;  %1541 = vmatpush1.bf16.msra.mxu1 %v4360_v18  ;;  %v5714_v15 = vmov 0   ;;  %s3374_s14 = sshll.u32 %s1984_s13, 5  ;;  %v3564_v51 = vld [vmem:[%s5622_s5 + $0x24] ss:$16 sps:$4 sm:$0xff] (%p1320_p0)   ;;  %v3568_v55 = vld [vmem:[%s5622_s5 + $0x20] ss:$16 sps:$4 sm:$0xff] (%p1320_p0)  }
 0x1c8   : > { %1500 = vmatpush1.bf16.msra.mxu0 %v4349_v13  ;;  %1542 = vmatprep.subr.bf16.mxu1 %v4365_v19  ;;  %s1988_s15 = scalar_lea.vmem [#allocation2], %s3374_s14  ;;  %v3569_v56 = vld [vmem:[%s5622_s5 + $0x28] ss:$16 sps:$4 sm:$0xff] (%p1320_p0)   ;;  %v3570_v57 = vld [vmem:[%s5622_s5 + $0x44] ss:$16 sps:$4 sm:$0xff] (%p1320_p0)  }
 0x1c9   : > { %1501 = vmatprep.subr.bf16.mxu0 %v4355_v17  ;;  %v3572_v48 = vld [vmem:[%s5622_s5 + $0x4c] ss:$16 sps:$4 sm:$0xff] (%p1320_p0)  }
 0x1cb   : > { %1543 = vmatpush1.bf16.msra.mxu1 %v4382_v26 }
 0x1cc   : > { %1502 = vmatpush1.bf16.msra.mxu0 %v4371_v24  ;;  %1544 = vmatprep.subr.bf16.mxu1 %v4387_v30 }
 0x1cd   : > { %1503 = vmatprep.subr.bf16.mxu0 %v4377_v25 }
 0x1cf   : > { %1545 = vmatpush1.bf16.msra.mxu1 %v4402_v45 }
 0x1d0   : > { %1504 = vmatpush1.bf16.msra.mxu0 %v4392_v40  ;;  %1546 = vmatprep.subr.bf16.mxu1 %v4407_v46 }
 0x1d1   : > { %1505 = vmatprep.subr.bf16.mxu0 %v4397_v44 }
 0x1d3   : > { %1547 = vmatpush1.bf16.msra.mxu1 %v4422_v58 }
 0x1d4   : > { %1506 = vmatpush1.bf16.msra.mxu0 %v4412_v49  ;;  %1548 = vmatprep.subr.bf16.mxu1 %v4427_v61 }
 0x1d5   : > { %1507 = vmatprep.subr.bf16.mxu0 %v4417_v54 }
 0x1d7   : > { %1549 = vmatpush1.bf16.msra.mxu1 %v4442_v63 }
 0x1d8   : > { %1508 = vmatpush1.bf16.msra.mxu0 %v4432_v6  ;;  %1550 = vmatprep.subr.bf16.mxu1 %v4447_v62 }
 0x1d9   : > { %1509 = vmatprep.subr.bf16.mxu0 %v4437_v1 }
 0x1db   : > { %1551 = vmatpush1.bf16.msra.mxu1 %v4462_v20 }
 0x1dc   : > { %1510 = vmatpush1.bf16.msra.mxu0 %v4452_v60  ;;  %1552 = vmatprep.subr.bf16.mxu1 %v4467_v7 }
 0x1dd   : > { %1511 = vmatprep.subr.bf16.mxu0 %v4457_v0 }
 0x1df   : > { %1553 = vmatpush1.bf16.msra.mxu1 %v4478_v9 }
 0x1e0   : > { %1512 = vmatpush1.bf16.msra.mxu0 %v4472_v8  ;;  %1663 = vmatprep.subr.bf16.mxu1 %v4335_v5 }
 0x1e1   : > { %1622 = vmatprep.subr.bf16.mxu0 %v4323_v2 }
 0x1e2   : > { %1571 = vmatmul.mubr.bf16.vlgmr.msra.gmra.mrb[0].mxu1 %v1336_v14 }
 0x1e3   : > { %1530 = vmatmul.mubr.bf16.vlgmr.msra.gmra.mrb[0].mxu0 %v1336_v14  ;;  %1664 = vmatpush1.bf16.msra.mxu1 %v4340_v11  ;;  %v1333_v14 = vld [vmem:[%s1331_s2 + $0x8] sm:$0xff] }
 0x1e4   : > { %1623 = vmatpush1.bf16.msra.mxu0 %v4327_v3  ;;  %1665 = vmatprep.subr.bf16.mxu1 %v4344_v12 }
 0x1e5   : > { %1624 = vmatprep.subr.bf16.mxu0 %v4331_v4  ;;  %1654 = vmatprep.mubr.bf16.mxu0 %v5714_v15 }
 0x1e6   : > { %1695 = vmatprep.mubr.bf16.mxu1 %v5714_v15 }
 0x1e7   : > { %1666 = vmatpush1.bf16.msra.mxu1 %v4360_v18 }
 0x1e8   : > { %1625 = vmatpush1.bf16.msra.mxu0 %v4349_v13  ;;  %1667 = vmatprep.subr.bf16.mxu1 %v4365_v19 }
 0x1e9   : > { %1626 = vmatprep.subr.bf16.mxu0 %v4355_v17 }
 0x1eb   : > { %1668 = vmatpush1.bf16.msra.mxu1 %v4382_v26 }
 0x1ec   : > { %1627 = vmatpush1.bf16.msra.mxu0 %v4371_v24  ;;  %1669 = vmatprep.subr.bf16.mxu1 %v4387_v30 }
 0x1ed   : > { %1628 = vmatprep.subr.bf16.mxu0 %v4377_v25 }
 0x1ef   : > { %1670 = vmatpush1.bf16.msra.mxu1 %v4402_v45 }
 0x1f0   : > { %1629 = vmatpush1.bf16.msra.mxu0 %v4392_v40  ;;  %1671 = vmatprep.subr.bf16.mxu1 %v4407_v46 }
 0x1f1   : > { %1630 = vmatprep.subr.bf16.mxu0 %v4397_v44 }
 0x1f3   : > { %1672 = vmatpush1.bf16.msra.mxu1 %v4422_v58 }
 0x1f4   : > { %1631 = vmatpush1.bf16.msra.mxu0 %v4412_v49  ;;  %1673 = vmatprep.subr.bf16.mxu1 %v4427_v61 }
 0x1f5   : > { %1632 = vmatprep.subr.bf16.mxu0 %v4417_v54 }
 0x1f7   : > { %1674 = vmatpush1.bf16.msra.mxu1 %v4442_v63 }
 0x1f8   : > { %1633 = vmatpush1.bf16.msra.mxu0 %v4432_v6  ;;  %1675 = vmatprep.subr.bf16.mxu1 %v4447_v62 }
 0x1f9   : > { %1634 = vmatprep.subr.bf16.mxu0 %v4437_v1 }
 0x1fb   : > { %1676 = vmatpush1.bf16.msra.mxu1 %v4462_v20 }
 0x1fc   : > { %1635 = vmatpush1.bf16.msra.mxu0 %v4452_v60  ;;  %1677 = vmatprep.subr.bf16.mxu1 %v4467_v7 }
 0x1fd   : > { %1636 = vmatprep.subr.bf16.mxu0 %v4457_v0 }
 0x1ff   : > { %1678 = vmatpush1.bf16.msra.mxu1 %v4478_v9 }
 0x200   : > { %1637 = vmatpush1.bf16.msra.mxu0 %v4472_v8  ;;  %1787 = vmatprep.subr.bf16.mxu1 %v4335_v5 }
 0x201   : > { %1746 = vmatprep.subr.bf16.mxu0 %v4323_v2 }
 0x2b5   : > { %v1572_v23 = vpop.f32.mrb[0].mxu1 }
 0x2b6   : > { %v1531_v16 = vpop.f32.mrb[0].mxu0  ;;  %v1574_v29 = vpop.f32.mrb[1].mxu1  ;;  %v1581_v41 = vadd.f32 %v1572_v23, %v1334_v38  ;;  %v1617_v38 = vld [vmem:[%s1616_s27] sm:$0xff] }
 0x2b7   : > { %v1579_v21 = vadd.f32 %v1531_v16, %v1332_v53  ;;  %v1533_v22 = vpop.f32.mrb[1].mxu0  ;;  %v1576_v33 = vpop.f32.mrb[2].mxu1  ;;  %v1582_v37 = vadd.f32 %v1574_v29, %v1335_v35 }
 0x2b8   : > { %v1580_v27 = vadd.f32 %v1533_v22, %v1333_v14  ;;  %v1535_v28 = vpop.f32.mrb[2].mxu0  ;;  %v1577_v36 = vpop.f32.mrb[3].mxu1 }
 0x2b9   : > { %v3295_v31 = vmul.f32 -1.442695, %v1579_v21  ;;  %v1536_v32 = vpop.f32.mrb[3].mxu0  ;;  %v3297_v39 = vmul.f32 -1.442695, %v1582_v37 }
 0x2ba   : > { %v3296_v34 = vmul.f32 -1.442695, %v1580_v27 }
 0x2bb   : > { %3478 = vpow2.f32 %v3295_v31 }
 0x2bc   : > { %3480 = vpow2.f32 %v3296_v34 }
 0x2bd   : > { %3482 = vpow2.f32 %v3297_v39  ;;  %v1618_v39 = vld [vmem:[%s1616_s27 + $0x8] sm:$0xff] }
 0x2be   : > { %3484 = vtanh.f32 %v1581_v41 }
 0x2c5   : > { %v3479_v42 = vpop.eup %3478 }
 0x2c6   : > { %v3481_v16 = vpop.eup %3480  ;;  %v1586_v53 = vadd.f32 1.0, %v3479_v42 }
 0x2c7   : > { %v1592_v22 = vadd.f32 1.0, %v3481_v16  ;;  %v3483_v21 = vpop.eup %3482 }
 0x2c8   : > { %3486 = vrcp.f32 %v1586_v53  ;;  %v3485_v28 = vpop.eup %3484  ;;  %v1599_v32 = vadd.f32 1.0, %v3483_v21 }
 0x2c9   : > { %3488 = vrcp.f32 %v1592_v22 }
 0x2ca   : > { %3490 = vrcp.f32 %v1599_v32 }
 0x2d2   : > { %v3487_v27 = vpop.eup %3486 }
 0x2d3   : > { %v3489_v33 = vpop.eup %3488  ;;  %v1603_v31 = vmul.f32 %v3487_v27, %v3485_v28 }
 0x2d4   : > { %v1602_v29 = vmul.f32 %v3620_v10, %v3489_v33  ;;  %v3491_v23 = vpop.eup %3490 }
 0x2d6   : > { %v4526_v34 = vadd.f32 %v1603_v31, %v1602_v29  ;;  %v1620_v31 = vld [vmem:[%s1616_s27 + $0x18] sm:$0xff] }
 0x2d8   : > { %3492 = vtanh.f32 %v4526_v34 }
 0x2e2   : > { %v3493_v35 = vpop.eup %3492 }
 0x2e3   : > { %v1606_v36 = vmul.f32 %v3493_v35, %v3491_v23  ;;  %v1619_v23 = vld [vmem:[%s1616_s27 + $0x10] sm:$0xff] }
 0x2e5   : > { %1608 = vst [vmem:[%s4530_s23] sm:$0xff] %v1606_v36  ;;  %v1621_v37 = vpack.c.bf16 %v1606_v36, %v1606_v36 }
 0x2e7   : > { %1655 = vmatmul.mubr.bf16.vlgmr.msra.gmra.mrb[4].mxu0 %v1621_v37  ;;  %1696 = vmatmul.mubr.bf16.vlgmr.msra.gmra.mrb[4].mxu1 %v1621_v37 }
 0x2e8   : > { %1747 = vmatpush1.bf16.msra.mxu0 %v4327_v3  ;;  %1788 = vmatpush1.bf16.msra.mxu1 %v4340_v11 }
 0x2e9   : > { %1748 = vmatprep.subr.bf16.mxu0 %v4331_v4  ;;  %1789 = vmatprep.subr.bf16.mxu1 %v4344_v12 }
 0x2ea   : > { %1778 = vmatprep.mubr.bf16.mxu0 %v5714_v15  ;;  %1819 = vmatprep.mubr.bf16.mxu1 %v5714_v15 }
 0x2ec   : > { %1749 = vmatpush1.bf16.msra.mxu0 %v4349_v13  ;;  %1790 = vmatpush1.bf16.msra.mxu1 %v4360_v18 }
 0x2ed   : > { %1750 = vmatprep.subr.bf16.mxu0 %v4355_v17  ;;  %1791 = vmatprep.subr.bf16.mxu1 %v4365_v19 }
 0x2f0   : > { %1751 = vmatpush1.bf16.msra.mxu0 %v4371_v24  ;;  %1792 = vmatpush1.bf16.msra.mxu1 %v4382_v26 }
 0x2f1   : > { %1752 = vmatprep.subr.bf16.mxu0 %v4377_v25  ;;  %1793 = vmatprep.subr.bf16.mxu1 %v4387_v30 }
 0x2f4   : > { %1753 = vmatpush1.bf16.msra.mxu0 %v4392_v40  ;;  %1794 = vmatpush1.bf16.msra.mxu1 %v4402_v45 }
 0x2f5   : > { %1754 = vmatprep.subr.bf16.mxu0 %v4397_v44  ;;  %1795 = vmatprep.subr.bf16.mxu1 %v4407_v46 }
 0x2f8   : > { %1755 = vmatpush1.bf16.msra.mxu0 %v4412_v49  ;;  %1796 = vmatpush1.bf16.msra.mxu1 %v4422_v58 }
 0x2f9   : > { %1756 = vmatprep.subr.bf16.mxu0 %v4417_v54  ;;  %1797 = vmatprep.subr.bf16.mxu1 %v4427_v61 }
 0x2fc   : > { %1757 = vmatpush1.bf16.msra.mxu0 %v4432_v6  ;;  %1798 = vmatpush1.bf16.msra.mxu1 %v4442_v63 }
 0x2fd   : > { %1758 = vmatprep.subr.bf16.mxu0 %v4437_v1  ;;  %1799 = vmatprep.subr.bf16.mxu1 %v4447_v62 }
 0x300   : > { %1759 = vmatpush1.bf16.msra.mxu0 %v4452_v60  ;;  %1800 = vmatpush1.bf16.msra.mxu1 %v4462_v20 }
 0x301   : > { %1760 = vmatprep.subr.bf16.mxu0 %v4457_v0  ;;  %1801 = vmatprep.subr.bf16.mxu1 %v4467_v7 }
 0x304   : > { %1761 = vmatpush1.bf16.msra.mxu0 %v4472_v8  ;;  %1802 = vmatpush1.bf16.msra.mxu1 %v4478_v9 }
 0x305   : > { %1870 = vmatprep.subr.bf16.mxu0 %v4323_v2  ;;  %1911 = vmatprep.subr.bf16.mxu1 %v4335_v5 }
 0x3ba   : > { %v1656_v41 = vpop.f32.mrb[4].mxu0  ;;  %v1697_v42 = vpop.f32.mrb[4].mxu1 }
 0x3bb   : > { %v1704_v10 = vadd.f32 %v1656_v41, %v1617_v38  ;;  %v1658_v14 = vpop.f32.mrb[5].mxu0  ;;  %v1699_v16 = vpop.f32.mrb[5].mxu1  ;;  %v1706_v36 = vadd.f32 %v1697_v42, %v1619_v23 }
 0x3bc   : > { %v1705_v53 = vadd.f32 %v1658_v14, %v1618_v39  ;;  %v1660_v22 = vpop.f32.mrb[6].mxu0  ;;  %v1701_v21 = vpop.f32.mrb[6].mxu1  ;;  %v1707_v29 = vadd.f32 %v1699_v16, %v1620_v31 }
 0x3bd   : > { %v3301_v28 = vmul.f32 -1.442695, %v1704_v10  ;;  %v1661_v27 = vpop.f32.mrb[7].mxu0  ;;  %v1702_v32 = vpop.f32.mrb[7].mxu1 }
 0x3be   : > { %v3302_v33 = vmul.f32 -1.442695, %v1705_v53  ;;  %v3303_v35 = vmul.f32 -1.442695, %v1707_v29 }
 0x3bf   : > { %3494 = vpow2.f32 %v3301_v28 }
 0x3c0   : > { %3496 = vpow2.f32 %v3302_v33 }
 0x3c1   : > { %3498 = vpow2.f32 %v3303_v35 }
 0x3c2   : > { %3500 = vtanh.f32 %v1706_v36 }
 0x3c9   : > { %v3495_v37 = vpop.eup %3494 }
 0x3ca   : > { %v3497_v43 = vpop.eup %3496  ;;  %v1711_v47 = vadd.f32 1.0, %v3495_v37 }
 0x3cb   : > { %v1717_v38 = vadd.f32 1.0, %v3497_v43  ;;  %v3499_v39 = vpop.eup %3498 }
 0x3cc   : > { %3502 = vrcp.f32 %v1711_v47  ;;  %v3501_v41 = vpop.eup %3500  ;;  %v1724_v22 = vadd.f32 1.0, %v3499_v39  ;;  %v1741_v47 = vld [vmem:[%s1740_s8] sm:$0xff] }
 0x3cd   : > { %3504 = vrcp.f32 %v1717_v38 }
 0x3ce   : > { %3506 = vrcp.f32 %v1724_v22 }
 0x3d6   : > { %v3503_v10 = vpop.eup %3502 }
 0x3d7   : > { %v3505_v14 = vpop.eup %3504  ;;  %v1728_v53 = vmul.f32 %v3503_v10, %v3501_v41 }
 0x3d8   : > { %v1727_v16 = vmul.f32 %v3505_v14, %v4526_v34  ;;  %v3507_v42 = vpop.eup %3506  ;;  %v1742_v34 = vld [vmem:[%s1740_s8 + $0x8] sm:$0xff]  ;;  %v1743_v14 = vld [vmem:[%s1740_s8 + $0x10] sm:$0xff] }
 0x3da   : > { %v4569_v21 = vadd.f32 %v1728_v53, %v1727_v16 }
 0x3dc   : > { %3508 = vtanh.f32 %v4569_v21 }
 0x3e6   : > { %v3509_v28 = vpop.eup %3508 }
 0x3e7   : > { %v1731_v27 = vmul.f32 %v3509_v28, %v3507_v42 }
 0x3e9   : > { %3305 = vst [vmem:[%s4530_s23 + $0x8] sm:$0xff] %v1731_v27  ;;  %v1745_v43 = vpack.c.bf16 %v1731_v27, %v1731_v27 }
 0x3eb   : > { %1779 = vmatmul.mubr.bf16.vlgmr.msra.gmra.mrb[8].mxu0 %v1745_v43  ;;  %1820 = vmatmul.mubr.bf16.vlgmr.msra.gmra.mrb[8].mxu1 %v1745_v43 }
 0x3ec   : > { %1871 = vmatpush1.bf16.msra.mxu0 %v4327_v3  ;;  %1912 = vmatpush1.bf16.msra.mxu1 %v4340_v11 }
 0x3ed   : > { %1872 = vmatprep.subr.bf16.mxu0 %v4331_v4  ;;  %1913 = vmatprep.subr.bf16.mxu1 %v4344_v12 }
 0x3ee   : > { %1902 = vmatprep.mubr.bf16.mxu0 %v5714_v15  ;;  %1943 = vmatprep.mubr.bf16.mxu1 %v5714_v15 }
 0x3f0   : > { %1873 = vmatpush1.bf16.msra.mxu0 %v4349_v13  ;;  %1914 = vmatpush1.bf16.msra.mxu1 %v4360_v18 }
 0x3f1   : > { %1874 = vmatprep.subr.bf16.mxu0 %v4355_v17  ;;  %1915 = vmatprep.subr.bf16.mxu1 %v4365_v19 }
 0x3f4   : > { %1875 = vmatpush1.bf16.msra.mxu0 %v4371_v24  ;;  %1916 = vmatpush1.bf16.msra.mxu1 %v4382_v26 }
 0x3f5   : > { %1876 = vmatprep.subr.bf16.mxu0 %v4377_v25  ;;  %1917 = vmatprep.subr.bf16.mxu1 %v4387_v30 }
 0x3f8   : > { %1877 = vmatpush1.bf16.msra.mxu0 %v4392_v40  ;;  %1918 = vmatpush1.bf16.msra.mxu1 %v4402_v45 }
 0x3f9   : > { %1878 = vmatprep.subr.bf16.mxu0 %v4397_v44  ;;  %1919 = vmatprep.subr.bf16.mxu1 %v4407_v46 }
 0x3fc   : > { %1879 = vmatpush1.bf16.msra.mxu0 %v4412_v49  ;;  %1920 = vmatpush1.bf16.msra.mxu1 %v4422_v58 }
 0x3fd   : > { %1880 = vmatprep.subr.bf16.mxu0 %v4417_v54  ;;  %1921 = vmatprep.subr.bf16.mxu1 %v4427_v61 }
 0x400   : > { %1881 = vmatpush1.bf16.msra.mxu0 %v4432_v6  ;;  %1922 = vmatpush1.bf16.msra.mxu1 %v4442_v63 }
 0x401   : > { %1882 = vmatprep.subr.bf16.mxu0 %v4437_v1  ;;  %1923 = vmatprep.subr.bf16.mxu1 %v4447_v62 }
 0x404   : > { %1883 = vmatpush1.bf16.msra.mxu0 %v4452_v60  ;;  %1924 = vmatpush1.bf16.msra.mxu1 %v4462_v20 }
 0x405   : > { %1884 = vmatprep.subr.bf16.mxu0 %v4457_v0  ;;  %1925 = vmatprep.subr.bf16.mxu1 %v4467_v7 }
 0x408   : > { %1885 = vmatpush1.bf16.msra.mxu0 %v4472_v8  ;;  %1926 = vmatpush1.bf16.msra.mxu1 %v4478_v9 }
 0x409   : > { %1994 = vmatprep.subr.bf16.mxu0 %v4323_v2  ;;  %2035 = vmatprep.subr.bf16.mxu1 %v4335_v5  ;;  %v1744_v5 = vld [vmem:[%s1740_s8 + $0x18] sm:$0xff] }
 0x4be   : > { %v1780_v32 = vpop.f32.mrb[8].mxu0  ;;  %v1821_v33 = vpop.f32.mrb[8].mxu1 }
 0x4bf   : > { %v1828_v31 = vadd.f32 %v1780_v32, %v1741_v47  ;;  %v1782_v29 = vpop.f32.mrb[9].mxu0  ;;  %v1823_v23 = vpop.f32.mrb[9].mxu1  ;;  %v1830_v22 = vadd.f32 %v1821_v33, %v1743_v14 }
 0x4c0   : > { %v1829_v35 = vadd.f32 %v1782_v29, %v1742_v34  ;;  %v1784_v36 = vpop.f32.mrb[10].mxu0  ;;  %v1825_v37 = vpop.f32.mrb[10].mxu1  ;;  %v1831_v10 = vadd.f32 %v1823_v23, %v1744_v5  ;;  %v1989_v5 = vld [vmem:[%s1988_s15] sm:$0xff] }
 0x4c1   : > { %v3309_v38 = vmul.f32 -1.442695, %v1828_v31  ;;  %v1785_v39 = vpop.f32.mrb[11].mxu0  ;;  %v1826_v41 = vpop.f32.mrb[11].mxu1 }
 0x4c2   : > { %v3310_v2 = vmul.f32 -1.442695, %v1829_v35  ;;  %v3311_v53 = vmul.f32 -1.442695, %v1831_v10  ;;  %v1990_v10 = vld [vmem:[%s1988_s15 + $0x8] sm:$0xff] }
 0x4c3   : > { %3510 = vpow2.f32 %v3309_v38 }
 0x4c4   : > { %3512 = vpow2.f32 %v3310_v2 }
 0x4c5   : > { %3514 = vpow2.f32 %v3311_v53 }
 0x4c6   : > { %3516 = vtanh.f32 %v1830_v22 }
 0x4cd   : > { %v3511_v16 = vpop.eup %3510 }
 0x4ce   : > { %v3513_v42 = vpop.eup %3512  ;;  %v1835_v28 = vadd.f32 1.0, %v3511_v16 }
 0x4cf   : > { %v1841_v27 = vadd.f32 1.0, %v3513_v42  ;;  %v3515_v43 = vpop.eup %3514 }
 0x4d0   : > { %3518 = vrcp.f32 %v1835_v28  ;;  %v3517_v47 = vpop.eup %3516  ;;  %v1848_v29 = vadd.f32 1.0, %v3515_v43 }
 0x4d1   : > { %3520 = vrcp.f32 %v1841_v27 }
 0x4d2   : > { %3522 = vrcp.f32 %v1848_v29  ;;  %v1992_v29 = vld [vmem:[%s1988_s15 + $0x18] sm:$0xff] }
 0x4da   : > { %v3519_v34 = vpop.eup %3518 }
 0x4db   : > { %v3521_v32 = vpop.eup %3520  ;;  %v1852_v31 = vmul.f32 %v3519_v34, %v3517_v47 }
 0x4dc   : > { %v1851_v23 = vmul.f32 %v3521_v32, %v4569_v21  ;;  %v3523_v33 = vpop.eup %3522 }
 0x4de   : > { %v4609_v35 = vadd.f32 %v1852_v31, %v1851_v23 }
 0x4e0   : > { %3524 = vtanh.f32 %v4609_v35 }
 0x4ea   : > { %v3525_v36 = vpop.eup %3524 }
 0x4eb   : > { %v1855_v37 = vmul.f32 %v3525_v36, %v3523_v33 }
 0x4ed   : > { %3313 = vst [vmem:[%s4530_s23 + $0x10] sm:$0xff] %v1855_v37  ;;  %v1869_v38 = vpack.c.bf16 %v1855_v37, %v1855_v37 }
 0x4ef   : > { %1903 = vmatmul.mubr.bf16.vlgmr.msra.gmra.mrb[12].mxu0 %v1869_v38  ;;  %1944 = vmatmul.mubr.bf16.vlgmr.msra.gmra.mrb[12].mxu1 %v1869_v38 }
 0x4f0   : > { %1995 = vmatpush1.bf16.msra.mxu0 %v4327_v3  ;;  %2036 = vmatpush1.bf16.msra.mxu1 %v4340_v11 }
 0x4f1   : > { %1996 = vmatprep.subr.bf16.mxu0 %v4331_v4  ;;  %2037 = vmatprep.subr.bf16.mxu1 %v4344_v12 }
 0x4f2   : > { %2026 = vmatprep.mubr.bf16.mxu0 %v5714_v15  ;;  %2067 = vmatprep.mubr.bf16.mxu1 %v5714_v15 }
 0x4f4   : > { %1997 = vmatpush1.bf16.msra.mxu0 %v4349_v13  ;;  %2038 = vmatpush1.bf16.msra.mxu1 %v4360_v18 }
 0x4f5   : > { %1998 = vmatprep.subr.bf16.mxu0 %v4355_v17  ;;  %2039 = vmatprep.subr.bf16.mxu1 %v4365_v19  ;;  %v1867_v19 = vld [vmem:[%s1864_s12 + $0x10] sm:$0xff] }
 0x4f8   : > { %1999 = vmatpush1.bf16.msra.mxu0 %v4371_v24  ;;  %2040 = vmatpush1.bf16.msra.mxu1 %v4382_v26 }
 0x4f9   : > { %2000 = vmatprep.subr.bf16.mxu0 %v4377_v25  ;;  %2041 = vmatprep.subr.bf16.mxu1 %v4387_v30 }
 0x4fc   : > { %2001 = vmatpush1.bf16.msra.mxu0 %v4392_v40  ;;  %2042 = vmatpush1.bf16.msra.mxu1 %v4402_v45 }
 0x4fd   : > { %2002 = vmatprep.subr.bf16.mxu0 %v4397_v44  ;;  %2043 = vmatprep.subr.bf16.mxu1 %v4407_v46 }
 0x500   : > { %2003 = vmatpush1.bf16.msra.mxu0 %v4412_v49  ;;  %2044 = vmatpush1.bf16.msra.mxu1 %v4422_v58 }
 0x501   : > { %2004 = vmatprep.subr.bf16.mxu0 %v4417_v54  ;;  %2045 = vmatprep.subr.bf16.mxu1 %v4427_v61 }
 0x504   : > { %2005 = vmatpush1.bf16.msra.mxu0 %v4432_v6  ;;  %2046 = vmatpush1.bf16.msra.mxu1 %v4442_v63  ;;  %v1865_v63 = vld [vmem:[%s1864_s12] sm:$0xff] }
 0x505   : > { %2006 = vmatprep.subr.bf16.mxu0 %v4437_v1  ;;  %2047 = vmatprep.subr.bf16.mxu1 %v4447_v62  ;;  %v1866_v1 = vld [vmem:[%s1864_s12 + $0x8] sm:$0xff] }
 0x508   : > { %2007 = vmatpush1.bf16.msra.mxu0 %v4452_v60  ;;  %2048 = vmatpush1.bf16.msra.mxu1 %v4462_v20 }
 0x509   : > { %2008 = vmatprep.subr.bf16.mxu0 %v4457_v0  ;;  %2049 = vmatprep.subr.bf16.mxu1 %v4467_v7 }
 0x50c   : > { %2009 = vmatpush1.bf16.msra.mxu0 %v4472_v8  ;;  %2050 = vmatpush1.bf16.msra.mxu1 %v4478_v9  ;;  %v1868_v9 = vld [vmem:[%s1864_s12 + $0x18] sm:$0xff] }
 0x5c2   : > { %v1904_v15 = vpop.f32.mrb[12].mxu0  ;;  %v1945_v62 = vpop.f32.mrb[12].mxu1 }
 0x5c3   : > { %v1952_v3 = vadd.f32 %v1904_v15, %v1865_v63  ;;  %v1906_v60 = vpop.f32.mrb[13].mxu0  ;;  %v1947_v4 = vpop.f32.mrb[13].mxu1  ;;  %v1954_v24 = vadd.f32 %v1945_v62, %v1867_v19  ;;  %v3575_v19 = vld [vmem:[%s5622_s5 + $0x48] ss:$16 sps:$4 sm:$0xff] (%p1320_p0)  }
 0x5c4   : > { %v1953_v11 = vadd.f32 %v1906_v60, %v1866_v1  ;;  %v1908_v12 = vpop.f32.mrb[14].mxu0  ;;  %v1949_v0 = vpop.f32.mrb[14].mxu1  ;;  %v1955_v18 = vadd.f32 %v1947_v4, %v1868_v9  ;;  %v3562_v9 = vld [vmem:[%s5622_s5] ss:$16 sps:$4 sm:$0xff] (%p1320_p0)  }
 0x5c5   : > { %v3317_v13 = vmul.f32 -1.442695, %v1952_v3  ;;  %v1909_v7 = vpop.f32.mrb[15].mxu0  ;;  %v1950_v17 = vpop.f32.mrb[15].mxu1 }
 0x5c6   : > { %v3318_v8 = vmul.f32 -1.442695, %v1953_v11  ;;  %v3319_v20 = vmul.f32 -1.442695, %v1955_v18  ;;  %v3558_v7 = vld [vmem:[%s5622_s5 + $0x4] ss:$16 sps:$4 sm:$0xff] (%p1320_p0)  }
 0x5c7   : > { %3526 = vpow2.f32 %v3317_v13  ;;  %v5715_v17 = vmov (%p1320_p0), 0   ;;  %2395 = vmatprep.subr.bf16.mxu0 (%p1320_p0), %v3558_v7  ;;  %v3574_v18 = vld [vmem:[%s5622_s5 + $0x40] ss:$16 sps:$4 sm:$0xff] (%p1320_p0)  }
 0x5c8   : > { %3528 = vpow2.f32 %v3318_v8  ;;  %v3560_v8 = vld [vmem:[%s5622_s5 + $0xc] ss:$16 sps:$4 sm:$0xff] (%p1320_p0)  }
 0x5c9   : > { %3530 = vpow2.f32 %v3319_v20  ;;  %2678 = vmatprep.subr.bf16.mxu1 (%p1320_p0), %v3560_v8  ;;  %v3576_v20 = vld [vmem:[%s5622_s5 + $0x64] ss:$16 sps:$4 sm:$0xff] (%p1320_p0)  }
 0x5ca   : > { %3532 = vtanh.f32 %v1954_v24  ;;  %v3578_v24 = vld [vmem:[%s5622_s5 + $0x6c] ss:$16 sps:$4 sm:$0xff] (%p1320_p0)  }
 0x5d1   : > { %v3527_v25 = vpop.eup %3526 }
 0x5d2   : > { %v3529_v26 = vpop.eup %3528  ;;  %v1959_v30 = vadd.f32 1.0, %v3527_v25  ;;  %v3580_v25 = vld [vmem:[%s5622_s5 + $0x60] ss:$16 sps:$4 sm:$0xff] (%p1320_p0)  }
 0x5d3   : > { %v1965_v40 = vadd.f32 1.0, %v3529_v26  ;;  %v3531_v44 = vpop.eup %3530  ;;  %v3581_v26 = vld [vmem:[%s5622_s5 + $0x68] ss:$16 sps:$4 sm:$0xff] (%p1320_p0)  }
 0x5d4   : > { %3534 = vrcp.f32 %v1959_v30  ;;  %v3533_v45 = vpop.eup %3532  ;;  %v1972_v58 = vadd.f32 1.0, %v3531_v44  ;;  %v3582_v30 = vld [vmem:[%s5622_s5 + $0x84] ss:$16 sps:$4 sm:$0xff] (%p1320_p0)   ;;  %v3586_v44 = vld [vmem:[%s5622_s5 + $0x80] ss:$16 sps:$4 sm:$0xff] (%p1320_p0)  }
 0x5d5   : > { %3536 = vrcp.f32 %v1965_v40  ;;  %v3584_v40 = vld [vmem:[%s5622_s5 + $0x8c] ss:$16 sps:$4 sm:$0xff] (%p1320_p0)  }
 0x5d6   : > { %3538 = vrcp.f32 %v1972_v58  ;;  %v3593_v58 = vld [vmem:[%s5622_s5 + $0xa8] ss:$16 sps:$4 sm:$0xff] (%p1320_p0)  }
 0x5de   : > { %v3535_v46 = vpop.eup %3534 }
 0x5df   : > { %v3537_v49 = vpop.eup %3536  ;;  %v1976_v54 = vmul.f32 %v3535_v46, %v3533_v45  ;;  %v3587_v45 = vld [vmem:[%s5622_s5 + $0x88] ss:$16 sps:$4 sm:$0xff] (%p1320_p0)   ;;  %v3588_v46 = vld [vmem:[%s5622_s5 + $0xa4] ss:$16 sps:$4 sm:$0xff] (%p1320_p0)  }
 0x5e0   : > { %v1975_v61 = vmul.f32 %v3537_v49, %v4609_v35  ;;  %v3539_v21 = vpop.eup %3538  ;;  %v1991_v35 = vld [vmem:[%s1988_s15 + $0x10] sm:$0xff]  ;;  %v3590_v49 = vld [vmem:[%s5622_s5 + $0xac] ss:$16 sps:$4 sm:$0xff] (%p1320_p0)  }
 0x5e2   : > { %v1977_v6 = vadd.f32 %v1976_v54, %v1975_v61  ;;  %v3592_v54 = vld [vmem:[%s5622_s5 + $0xa0] ss:$16 sps:$4 sm:$0xff] (%p1320_p0)   ;;  %v3594_v61 = vld [vmem:[%s5622_s5 + $0xc4] ss:$16 sps:$4 sm:$0xff] (%p1320_p0)  }
 0x5e4   : > { %3540 = vtanh.f32 %v1977_v6 }
 0x5ee   : > { %v3541_v39 = vpop.eup %3540 }
 0x5ef   : > { %v1979_v41 = vmul.f32 %v3541_v39, %v3539_v21  ;;  %v3598_v21 = vld [vmem:[%s5622_s5 + $0xc0] ss:$16 sps:$4 sm:$0xff] (%p1320_p0)   ;;  %v3599_v39 = vld [vmem:[%s5622_s5 + $0xc8] ss:$16 sps:$4 sm:$0xff] (%p1320_p0)  }
 0x5f1   : > { %3321 = vst [vmem:[%s4530_s23 + $0x18] sm:$0xff] %v1979_v41  ;;  %v1993_v2 = vpack.c.bf16 %v1979_v41, %v1979_v41  ;;  %v3600_v41 = vld [vmem:[%s5622_s5 + $0xe4] ss:$16 sps:$4 sm:$0xff] (%p1320_p0)  }
 0x5f3   : > { %2027 = vmatmul.mubr.bf16.vlgmr.msra.gmra.mrb[16].mxu0 %v1993_v2  ;;  %2068 = vmatmul.mubr.bf16.vlgmr.msra.gmra.mrb[16].mxu1 %v1993_v2  ;;  %v3602_v2 = vld [vmem:[%s5622_s5 + $0xec] ss:$16 sps:$4 sm:$0xff] (%p1320_p0)  }
 0x5f4   :  { %2427 = vmatprep.mubr.bf16.mxu0 (%p1320_p0), %v5715_v17  ;;  %2710 = vmatprep.mubr.bf16.mxu1 (%p1320_p0), %v5715_v17 }
 0x5f5   :  { %2396 = vmatpush1.bf16.msra.mxu0 (%p1320_p0), %v3562_v9  ;;  %2679 = vmatpush1.bf16.msra.mxu1 (%p1320_p0), %v3563_v50 }
 0x5f6   :  { %2397 = vmatprep.subr.bf16.mxu0 (%p1320_p0), %v3564_v51  ;;  %2680 = vmatprep.subr.bf16.mxu1 (%p1320_p0), %v3566_v52 }
 0x5f9   :  { %2398 = vmatpush1.bf16.msra.mxu0 (%p1320_p0), %v3568_v55  ;;  %2681 = vmatpush1.bf16.msra.mxu1 (%p1320_p0), %v3569_v56 }
 0x5fa   :  { %2399 = vmatprep.subr.bf16.mxu0 (%p1320_p0), %v3570_v57  ;;  %2682 = vmatprep.subr.bf16.mxu1 (%p1320_p0), %v3572_v48 }
 0x5fd   :  { %2400 = vmatpush1.bf16.msra.mxu0 (%p1320_p0), %v3574_v18  ;;  %2683 = vmatpush1.bf16.msra.mxu1 (%p1320_p0), %v3575_v19 }
 0x5fe   :  { %2401 = vmatprep.subr.bf16.mxu0 (%p1320_p0), %v3576_v20  ;;  %2684 = vmatprep.subr.bf16.mxu1 (%p1320_p0), %v3578_v24 }
 0x601   :  { %2402 = vmatpush1.bf16.msra.mxu0 (%p1320_p0), %v3580_v25  ;;  %2685 = vmatpush1.bf16.msra.mxu1 (%p1320_p0), %v3581_v26 }
 0x602   :  { %2403 = vmatprep.subr.bf16.mxu0 (%p1320_p0), %v3582_v30  ;;  %2686 = vmatprep.subr.bf16.mxu1 (%p1320_p0), %v3584_v40 }
 0x605   :  { %2404 = vmatpush1.bf16.msra.mxu0 (%p1320_p0), %v3586_v44  ;;  %2687 = vmatpush1.bf16.msra.mxu1 (%p1320_p0), %v3587_v45 }
 0x606   :  { %2405 = vmatprep.subr.bf16.mxu0 (%p1320_p0), %v3588_v46  ;;  %2688 = vmatprep.subr.bf16.mxu1 (%p1320_p0), %v3590_v49 }
 0x609   :  { %2406 = vmatpush1.bf16.msra.mxu0 (%p1320_p0), %v3592_v54  ;;  %2689 = vmatpush1.bf16.msra.mxu1 (%p1320_p0), %v3593_v58 }
 0x60a   :  { %2407 = vmatprep.subr.bf16.mxu0 (%p1320_p0), %v3594_v61 }
 0x60d   :  { %2408 = vmatpush1.bf16.msra.mxu0 (%p1320_p0), %v3598_v21 }
 0x60e   :  { %2409 = vmatprep.subr.bf16.mxu0 (%p1320_p0), %v3600_v41 }
 0x6c6   : > { %v2028_v14 = vpop.f32.mrb[16].mxu0  ;;  %v2069_v53 = vpop.f32.mrb[16].mxu1 }
 0x6c7   : > { %v2076_v22 = vadd.f32 %v2028_v14, %v1989_v5  ;;  %v2030_v16 = vpop.f32.mrb[17].mxu0  ;;  %v2071_v42 = vpop.f32.mrb[17].mxu1  ;;  %v2078_v36 = vadd.f32 %v2069_v53, %v1991_v35  ;;  %v3604_v5 = vld [vmem:[%s5622_s5 + $0xe0] ss:$16 sps:$4 sm:$0xff] (%p1320_p0)  }
 0x6c8   : > { %v2077_v28 = vadd.f32 %v2030_v16, %v1990_v10  ;;  %v2032_v27 = vpop.f32.mrb[18].mxu0  ;;  %v2073_v43 = vpop.f32.mrb[18].mxu1  ;;  %v2079_v23 = vadd.f32 %v2071_v42, %v1992_v29  ;;  %2410 = vmatpush1.bf16.msra.mxu0 (%p1320_p0), %v3604_v5 }
 0x6c9   : > { %v3325_v47 = vmul.f32 -1.442695, %v2076_v22  ;;  %v2033_v34 = vpop.f32.mrb[19].mxu0  ;;  %v2074_v32 = vpop.f32.mrb[19].mxu1 }
 0x6ca   : > { %v3326_v31 = vmul.f32 -1.442695, %v2077_v28  ;;  %v3327_v33 = vmul.f32 -1.442695, %v2079_v23 }
 0x6cb   : > { %3542 = vpow2.f32 %v3325_v47 }
 0x6cc   : > { %3544 = vpow2.f32 %v3326_v31 }
 0x6cd   : > { %3546 = vpow2.f32 %v3327_v33 }
 0x6ce   : > { %3548 = vtanh.f32 %v2078_v36 }
 0x6d5   : > { %v3543_v37 = vpop.eup %3542 }
 0x6d6   : > { %v3545_v38 = vpop.eup %3544  ;;  %v2083_v63 = vadd.f32 1.0, %v3543_v37 }
 0x6d7   : > { %v2089_v1 = vadd.f32 1.0, %v3545_v38  ;;  %v3547_v15 = vpop.eup %3546 }
 0x6d8   : > { %3550 = vrcp.f32 %v2083_v63  ;;  %v3549_v62 = vpop.eup %3548  ;;  %v2096_v11 = vadd.f32 1.0, %v3547_v15 }
 0x6d9   : > { %3552 = vrcp.f32 %v2089_v1 }
 0x6da   : > { %3554 = vrcp.f32 %v2096_v11 }
 0x6e2   : > { %v3551_v3 = vpop.eup %3550 }
 0x6e3   : > { %v3553_v60 = vpop.eup %3552  ;;  %v2100_v4 = vmul.f32 %v3551_v3, %v3549_v62 }
 0x6e4   : > { %v2099_v12 = vmul.f32 %v3553_v60, %v1977_v6  ;;  %v3555_v0 = vpop.eup %3554  ;;  %v3596_v6 = vld [vmem:[%s5622_s5 + $0xcc] ss:$16 sps:$4 sm:$0xff] (%p1320_p0)  }
 0x6e5   :  { %2690 = vmatprep.subr.bf16.mxu1 (%p1320_p0), %v3596_v6 }
 0x6e6   : > { %v2101_v10 = vadd.f32 %v2100_v4, %v2099_v12   ;;  %2691 = vmatpush1.bf16.msra.mxu1 (%p1320_p0), %v3599_v39 }
 0x6e7   :  { %2692 = vmatprep.subr.bf16.mxu1 (%p1320_p0), %v3602_v2 }
 0x6e8   : > { %3556 = vtanh.f32 %v2101_v10  ;;  %v3605_v10 = vld [vmem:[%s5622_s5 + $0xe8] ss:$16 sps:$4 sm:$0xff] (%p1320_p0)  }
 0x6ea   :  { %2693 = vmatpush1.bf16.msra.mxu1 (%p1320_p0), %v3605_v10 }
 0x6ef   :  { %1322 = sbr.rel (!%p1320_p0) target bundleno = 444 (0x1bc), region = 65 }
 0x6f2   : > { %v3557_v13 = vpop.eup %3556 }
 0x6f3   : > { %v2103_v53 = vmul.f32 %v3557_v13, %v3555_v0  }
 0x6f5   : > { %3329 = vst [vmem:[%s4530_s23 + $0x20] sm:$0xff] %v2103_v53 }
 0x6fc   :  { %v2106_v14 = vld [vmem:[#allocation3] sm:$0xff]  ;;  %v2107_v53 = vld [vmem:[#allocation3 + $0x8] sm:$0xff]  ;;  %v2108_v16 = vld [vmem:[#allocation3 + $0x10] sm:$0xff] }
 0x6fd   :  { %v2156_v22 = vpack.c.bf16 %v2107_v53, %v2106_v14  ;;  %v2109_v42 = vld [vmem:[#allocation3 + $0x18] sm:$0xff]  ;;  %v2110_v27 = vld [vmem:[#allocation3 + $0x20] sm:$0xff]  ;;  %v2111_v43 = vld [vmem:[#allocation3 + $0x28] sm:$0xff] }
 0x6fe   :  { %v2157_v28 = vpack.c.bf16 %v2109_v42, %v2108_v16  ;;  %v2158_v47 = vpack.c.bf16 %v2111_v43, %v2110_v27  ;;  %v2112_v34 = vld [vmem:[#allocation3 + $0x30] sm:$0xff]  ;;  %v2113_v32 = vld [vmem:[#allocation3 + $0x38] sm:$0xff]  ;;  %v2114_v29 = vld [vmem:[#allocation3 + $0x40] sm:$0xff] }
 0x6ff   :  { %2428 = vmatmul.mubr.bf16.vlgmr.msra.gmra.mrb[0].mxu0 %v2156_v22  ;;  %2711 = vmatmul.mubr.bf16.vlgmr.msra.gmra.mrb[0].mxu1 %v2156_v22  ;;  %v2159_v31 = vpack.c.bf16 %v2113_v32, %v2112_v34  ;;  %v2115_v23 = vld [vmem:[#allocation3 + $0x48] sm:$0xff]  ;;  %v2116_v33 = vld [vmem:[#allocation3 + $0x50] sm:$0xff]  ;;  %v2117_v36 = vld [vmem:[#allocation3 + $0x58] sm:$0xff] }
 0x700   :  { %2437 = vmatprep.mubr.bf16.mxu0 %v5715_v17  ;;  %2720 = vmatprep.mubr.bf16.mxu1 %v5715_v17  ;;  %v2160_v35 = vpack.c.bf16 %v2115_v23, %v2114_v29  ;;  %v2161_v37 = vpack.c.bf16 %v2117_v36, %v2116_v33  ;;  %v2118_v38 = vld [vmem:[#allocation3 + $0x60] sm:$0xff]  ;;  %v2119_v63 = vld [vmem:[#allocation3 + $0x68] sm:$0xff]  ;;  %v2120_v15 = vld [vmem:[#allocation3 + $0x70] sm:$0xff]  ;;  %v5717_v36 = vsub.s32 2, %v3893_v59 }
 0x701   :  { %v2162_v1 = vpack.c.bf16 %v2119_v63, %v2118_v38  ;;  %v2121_v62 = vld [vmem:[#allocation3 + $0x78] sm:$0xff]  ;;  %v2122_v60 = vld [vmem:[#allocation3 + $0x80] sm:$0xff]  ;;  %v2123_v4 = vld [vmem:[#allocation3 + $0x88] sm:$0xff]  ;;  %v5718_v38 = vsub.s32 1, %v3893_v59  ;;  %v5719_v63 = vsub.s32 3, %v3893_v59 }
 0x702   :  { %v2163_v3 = vpack.c.bf16 %v2121_v62, %v2120_v15  ;;  %v2164_v11 = vpack.c.bf16 %v2123_v4, %v2122_v60  ;;  %v2124_v12 = vld [vmem:[#allocation3 + $0x90] sm:$0xff]  ;;  %v2125_v0 = vld [vmem:[#allocation3 + $0x98] sm:$0xff]  ;;  %v2126_v7 = vld [vmem:[#allocation3 + $0xa0] sm:$0xff] }
 0x703   :  { %v2165_v13 = vpack.c.bf16 %v2125_v0, %v2124_v12  ;;  %v2127_v8 = vld [vmem:[#allocation3 + $0xa8] sm:$0xff]  ;;  %v2128_v50 = vld [vmem:[#allocation3 + $0xb0] sm:$0xff]  ;;  %v2129_v51 = vld [vmem:[#allocation3 + $0xb8] sm:$0xff] }
 0x704   :  { %v2166_v9 = vpack.c.bf16 %v2127_v8, %v2126_v7  ;;  %v2167_v52 = vpack.c.bf16 %v2129_v51, %v2128_v50  ;;  %v2130_v55 = vld [vmem:[#allocation3 + $0xc0] sm:$0xff]  ;;  %v2131_v56 = vld [vmem:[#allocation3 + $0xc8] sm:$0xff]  ;;  %v2132_v48 = vld [vmem:[#allocation3 + $0xd0] sm:$0xff] }
 0x705   :  { %v2168_v57 = vpack.c.bf16 %v2131_v56, %v2130_v55  ;;  %v2133_v18 = vld [vmem:[#allocation3 + $0xd8] sm:$0xff]  ;;  %v2134_v20 = vld [vmem:[#allocation3 + $0xe0] sm:$0xff]  ;;  %v2135_v24 = vld [vmem:[#allocation3 + $0xe8] sm:$0xff] }
 0x706   :  { %v2169_v19 = vpack.c.bf16 %v2133_v18, %v2132_v48  ;;  %v2170_v25 = vpack.c.bf16 %v2135_v24, %v2134_v20  ;;  %v2136_v26 = vld [vmem:[#allocation3 + $0xf0] sm:$0xff]  ;;  %v2137_v30 = vld [vmem:[#allocation3 + $0xf8] sm:$0xff]  ;;  %v2138_v44 = vld [vmem:[#allocation3 + $0x100] sm:$0xff] }
 0x707   :  { %2438 = vmatmul.mubr.bf16.gmra.mrb[4].mxu0 %v2157_v28  ;;  %2721 = vmatmul.mubr.bf16.gmra.mrb[4].mxu1 %v2157_v28  ;;  %v2171_v40 = vpack.c.bf16 %v2137_v30, %v2136_v26  ;;  %v2139_v45 = vld [vmem:[#allocation3 + $0x108] sm:$0xff]  ;;  %v2140_v49 = vld [vmem:[#allocation3 + $0x110] sm:$0xff]  ;;  %v2141_v54 = vld [vmem:[#allocation3 + $0x118] sm:$0xff] }
 0x708   :  { %2447 = vmatprep.mubr.bf16.mxu0 %v5715_v17  ;;  %2730 = vmatprep.mubr.bf16.mxu1 %v5715_v17  ;;  %v2172_v46 = vpack.c.bf16 %v2139_v45, %v2138_v44  ;;  %v2173_v58 = vpack.c.bf16 %v2141_v54, %v2140_v49  ;;  %v2142_v61 = vld [vmem:[#allocation3 + $0x120] sm:$0xff]  ;;  %v2143_v6 = vld [vmem:[#allocation3 + $0x128] sm:$0xff]  ;;  %v2144_v39 = vld [vmem:[#allocation3 + $0x130] sm:$0xff] }
 0x709   :  { %v2174_v21 = vpack.c.bf16 %v2143_v6, %v2142_v61  ;;  %v2145_v41 = vld [vmem:[#allocation3 + $0x138] sm:$0xff]  ;;  %v2146_v5 = vld [vmem:[#allocation3 + $0x140] sm:$0xff]  ;;  %v2147_v10 = vld [vmem:[#allocation3 + $0x148] sm:$0xff] }
 0x70a   :  { %v2175_v2 = vpack.c.bf16 %v2145_v41, %v2144_v39  ;;  %v2176_v14 = vpack.c.bf16 %v2147_v10, %v2146_v5  ;;  %v2148_v53 = vld [vmem:[#allocation3 + $0x150] sm:$0xff]  ;;  %v2149_v22 = vld [vmem:[#allocation3 + $0x158] sm:$0xff]  ;;  %v2150_v42 = vld [vmem:[#allocation3 + $0x160] sm:$0xff] }
 0x70b   :  { %v2177_v16 = vpack.c.bf16 %v2149_v22, %v2148_v53  ;;  %v2151_v28 = vld [vmem:[#allocation3 + $0x168] sm:$0xff]  ;;  %v2152_v43 = vld [vmem:[#allocation3 + $0x170] sm:$0xff]  ;;  %v2154_v32 = vld [vmem:[#allocation3 + $0x180] sm:$0xff] }
 0x70c   :  { %v2178_v27 = vpack.c.bf16 %v2151_v28, %v2150_v42  ;;  %v2213_v23 = vld [vmem:[%s5623_s6] sm:$0xf] }
 0x70f   :  { %2448 = vmatmul.mubr.bf16.gmra.mrb[8].mxu0 %v2158_v47  ;;  %2731 = vmatmul.mubr.bf16.gmra.mrb[8].mxu1 %v2158_v47  ;;  %v2153_v47 = vld [vmem:[#allocation3 + $0x178] sm:$0xff] }
 0x710   :  { %2457 = vmatprep.mubr.bf16.mxu0 %v5715_v17  ;;  %2740 = vmatprep.mubr.bf16.mxu1 %v5715_v17  ;;  %v2179_v34 = vpack.c.bf16 %v2153_v47, %v2152_v43 }
 0x717   :  { %2458 = vmatmul.mubr.bf16.gmra.mrb[12].mxu0 %v2159_v31  ;;  %2741 = vmatmul.mubr.bf16.gmra.mrb[12].mxu1 %v2159_v31  ;;  %v2155_v31 = vld [vmem:[#allocation3 + $0x188] sm:$0xff] }
 0x718   :  { %2467 = vmatprep.mubr.bf16.mxu0 %v5715_v17  ;;  %2750 = vmatprep.mubr.bf16.mxu1 %v5715_v17  ;;  %v2180_v29 = vpack.c.bf16 %v2155_v31, %v2154_v32 }
 0x71f   :  { %2468 = vmatmul.mubr.bf16.gmra.mrb[16].mxu0 %v2160_v35  ;;  %2751 = vmatmul.mubr.bf16.gmra.mrb[16].mxu1 %v2160_v35  ;;  %v5716_v35 = vsub.s32 0, %v3893_v59 }
 0x720   :  { %2477 = vmatprep.mubr.bf16.mxu0 %v5715_v17  ;;  %2760 = vmatprep.mubr.bf16.mxu1 %v5715_v17 }
 0x721   :  { %v4808_v33 = vrot.slane %v2213_v23, %v5716_v35 }
 0x727   :  { %2478 = vmatmul.mubr.bf16.gmra.mrb[20].mxu0 %v2161_v37  ;;  %2761 = vmatmul.mubr.bf16.gmra.mrb[20].mxu1 %v2161_v37  ;;  %v4812_v37 = vrot.slane %v2213_v23, %v5717_v36 }
 0x728   :  { %2487 = vmatprep.mubr.bf16.mxu0 %v5715_v17  ;;  %2770 = vmatprep.mubr.bf16.mxu1 %v5715_v17 }
 0x72f   :  { %2488 = vmatmul.mubr.bf16.gmra.mrb[24].mxu0 %v2162_v1  ;;  %2771 = vmatmul.mubr.bf16.gmra.mrb[24].mxu1 %v2162_v1  ;;  %v4820_v1 = vrot.slane %v2213_v23, %v5719_v63 }
 0x730   :  { %2497 = vmatprep.mubr.bf16.mxu0 %v5715_v17  ;;  %2780 = vmatprep.mubr.bf16.mxu1 %v5715_v17 }
 0x737   :  { %2498 = vmatmul.mubr.bf16.gmra.mrb[28].mxu0 %v2163_v3  ;;  %2781 = vmatmul.mubr.bf16.gmra.mrb[28].mxu1 %v2163_v3 }
 0x738   :  { %2507 = vmatprep.mubr.bf16.mxu0 %v5715_v17  ;;  %2790 = vmatprep.mubr.bf16.mxu1 %v5715_v17 }
 0x73f   :  { %2508 = vmatmul.mubr.bf16.gmra.mrb[32].mxu0 %v2164_v11  ;;  %2791 = vmatmul.mubr.bf16.gmra.mrb[32].mxu1 %v2164_v11 }
 0x740   :  { %2517 = vmatprep.mubr.bf16.mxu0 %v5715_v17  ;;  %2800 = vmatprep.mubr.bf16.mxu1 %v5715_v17 }
 0x747   :  { %2518 = vmatmul.mubr.bf16.gmra.mrb[36].mxu0 %v2165_v13  ;;  %2801 = vmatmul.mubr.bf16.gmra.mrb[36].mxu1 %v2165_v13 }
 0x748   :  { %2527 = vmatprep.mubr.bf16.mxu0 %v5715_v17  ;;  %2810 = vmatprep.mubr.bf16.mxu1 %v5715_v17 }
 0x74f   :  { %2528 = vmatmul.mubr.bf16.gmra.mrb[40].mxu0 %v2166_v9  ;;  %2811 = vmatmul.mubr.bf16.gmra.mrb[40].mxu1 %v2166_v9 }
 0x750   :  { %2537 = vmatprep.mubr.bf16.mxu0 %v5715_v17  ;;  %2820 = vmatprep.mubr.bf16.mxu1 %v5715_v17 }
 0x757   :  { %2538 = vmatmul.mubr.bf16.gmra.mrb[44].mxu0 %v2167_v52  ;;  %2821 = vmatmul.mubr.bf16.gmra.mrb[44].mxu1 %v2167_v52 }
 0x758   :  { %2547 = vmatprep.mubr.bf16.mxu0 %v5715_v17  ;;  %2830 = vmatprep.mubr.bf16.mxu1 %v5715_v17 }
 0x75f   :  { %2548 = vmatmul.mubr.bf16.gmra.mrb[48].mxu0 %v2168_v57  ;;  %2831 = vmatmul.mubr.bf16.gmra.mrb[48].mxu1 %v2168_v57 }
 0x760   :  { %2557 = vmatprep.mubr.bf16.mxu0 %v5715_v17  ;;  %2840 = vmatprep.mubr.bf16.mxu1 %v5715_v17 }
 0x767   :  { %2558 = vmatmul.mubr.bf16.gmra.mrb[52].mxu0 %v2169_v19  ;;  %2841 = vmatmul.mubr.bf16.gmra.mrb[52].mxu1 %v2169_v19 }
 0x768   :  { %2567 = vmatprep.mubr.bf16.mxu0 %v5715_v17  ;;  %2850 = vmatprep.mubr.bf16.mxu1 %v5715_v17 }
 0x76f   :  { %2568 = vmatmul.mubr.bf16.gmra.mrb[56].mxu0 %v2170_v25  ;;  %2851 = vmatmul.mubr.bf16.gmra.mrb[56].mxu1 %v2170_v25 }
 0x770   :  { %2577 = vmatprep.mubr.bf16.mxu0 %v5715_v17  ;;  %2860 = vmatprep.mubr.bf16.mxu1 %v5715_v17 }
 0x777   :  { %2578 = vmatmul.mubr.bf16.gmra.mrb[60].mxu0 %v2171_v40  ;;  %2861 = vmatmul.mubr.bf16.gmra.mrb[60].mxu1 %v2171_v40 }
 0x778   :  { %2587 = vmatprep.mubr.bf16.mxu0 %v5715_v17  ;;  %2870 = vmatprep.mubr.bf16.mxu1 %v5715_v17 }
 0x77f   :  { %2588 = vmatmul.mubr.bf16.gmra.mrb[64].mxu0 %v2172_v46  ;;  %2871 = vmatmul.mubr.bf16.gmra.mrb[64].mxu1 %v2172_v46 }
 0x780   :  { %2597 = vmatprep.mubr.bf16.mxu0 %v5715_v17  ;;  %2880 = vmatprep.mubr.bf16.mxu1 %v5715_v17 }
 0x787   :  { %2598 = vmatmul.mubr.bf16.gmra.mrb[68].mxu0 %v2173_v58  ;;  %2881 = vmatmul.mubr.bf16.gmra.mrb[68].mxu1 %v2173_v58 }
 0x788   :  { %2607 = vmatprep.mubr.bf16.mxu0 %v5715_v17  ;;  %2890 = vmatprep.mubr.bf16.mxu1 %v5715_v17 }
 0x78f   :  { %2608 = vmatmul.mubr.bf16.gmra.mrb[72].mxu0 %v2174_v21  ;;  %2891 = vmatmul.mubr.bf16.gmra.mrb[72].mxu1 %v2174_v21 }
 0x790   :  { %2617 = vmatprep.mubr.bf16.mxu0 %v5715_v17  ;;  %2900 = vmatprep.mubr.bf16.mxu1 %v5715_v17 }
 0x797   :  { %2618 = vmatmul.mubr.bf16.gmra.mrb[76].mxu0 %v2175_v2  ;;  %2901 = vmatmul.mubr.bf16.gmra.mrb[76].mxu1 %v2175_v2 }
 0x798   :  { %2627 = vmatprep.mubr.bf16.mxu0 %v5715_v17  ;;  %2910 = vmatprep.mubr.bf16.mxu1 %v5715_v17 }
 0x79f   :  { %2628 = vmatmul.mubr.bf16.gmra.mrb[80].mxu0 %v2176_v14  ;;  %2911 = vmatmul.mubr.bf16.gmra.mrb[80].mxu1 %v2176_v14 }
 0x7a0   :  { %2637 = vmatprep.mubr.bf16.mxu0 %v5715_v17  ;;  %2920 = vmatprep.mubr.bf16.mxu1 %v5715_v17 }
 0x7a7   :  { %2638 = vmatmul.mubr.bf16.gmra.mrb[84].mxu0 %v2177_v16  ;;  %2921 = vmatmul.mubr.bf16.gmra.mrb[84].mxu1 %v2177_v16 }
 0x7a8   :  { %2647 = vmatprep.mubr.bf16.mxu0 %v5715_v17  ;;  %2930 = vmatprep.mubr.bf16.mxu1 %v5715_v17 }
 0x7af   :  { %2648 = vmatmul.mubr.bf16.gmra.mrb[88].mxu0 %v2178_v27  ;;  %2931 = vmatmul.mubr.bf16.gmra.mrb[88].mxu1 %v2178_v27 }
 0x7b0   :  { %2657 = vmatprep.mubr.bf16.mxu0 %v5715_v17  ;;  %2940 = vmatprep.mubr.bf16.mxu1 %v5715_v17 }
 0x7b7   :  { %2658 = vmatmul.mubr.bf16.gmra.mrb[92].mxu0 %v2179_v34  ;;  %2941 = vmatmul.mubr.bf16.gmra.mrb[92].mxu1 %v2179_v34 }
 0x7b8   :  { %2667 = vmatprep.mubr.bf16.mxu0 %v5715_v17  ;;  %2950 = vmatprep.mubr.bf16.mxu1 %v5715_v17  ;;  %v4816_v17 = vrot.slane %v2213_v23, %v5718_v38 }
 0x7bf   :  { %2668 = vmatmul.mubr.bf16.gmra.mrb[96].mxu0 %v2180_v29  ;;  %2951 = vmatmul.mubr.bf16.gmra.mrb[96].mxu1 %v2180_v29 }
 0x7d2   :  { %v2429_v15 = vpop.f32.mrb[0].mxu0  ;;  %v2712_v62 = vpop.f32.mrb[0].mxu1 }
 0x7d3   :  { %v2430_v3 = vadd.f32 %v2429_v15, %v4808_v33  ;;  %v2713_v60 = vadd.f32 %v2712_v62, %v4812_v37  ;;  %v2431_v4 = vpop.f32.mrb[1].mxu0  ;;  %v2714_v11 = vpop.f32.mrb[1].mxu1 }
 0x7d4   :  { %v2432_v12 = vadd.f32 %v2431_v4, %v4816_v17  ;;  %v2715_v0 = vadd.f32 %v2714_v11, %v4820_v1  ;;  %v2433_v13 = vpop.f32.mrb[2].mxu0  ;;  %v2716_v7 = vpop.f32.mrb[2].mxu1 }
 0x7d5   :  { %2961 = vst [vmem:[%s5624_s7] sm:$0xff] %v2430_v3  ;;  %2963 = vst [vmem:[%s5624_s7 + $0x10] sm:$0xff] %v2713_v60  ;;  %v2434_v59 = vadd.f32 %v2433_v13, %v4808_v33  ;;  %v2717_v8 = vadd.f32 %v2716_v7, %v4812_v37  ;;  %v2435_v9 = vpop.f32.mrb[3].mxu0  ;;  %v2718_v50 = vpop.f32.mrb[3].mxu1 }
 0x7d6   :  { %2962 = vst [vmem:[%s5624_s7 + $0x8] sm:$0xff] %v2432_v12  ;;  %2964 = vst [vmem:[%s5624_s7 + $0x18] sm:$0xff] %v2715_v0  ;;  %v2436_v51 = vadd.f32 %v2435_v9, %v4816_v17  ;;  %v2719_v52 = vadd.f32 %v2718_v50, %v4820_v1 }
 0x7d7   :  { %2965 = vst [vmem:[%s5624_s7 + $0x20] sm:$0xff] %v2434_v59  ;;  %2967 = vst [vmem:[%s5624_s7 + $0x30] sm:$0xff] %v2717_v8 }
 0x7d8   :  { %2966 = vst [vmem:[%s5624_s7 + $0x28] sm:$0xff] %v2436_v51  ;;  %2968 = vst [vmem:[%s5624_s7 + $0x38] sm:$0xff] %v2719_v52 }
 0x7da   :  { %v2439_v55 = vpop.f32.mrb[4].mxu0  ;;  %v2722_v56 = vpop.f32.mrb[4].mxu1 }
 0x7db   :  { %v2440_v57 = vadd.f32 %v2439_v55, %v4808_v33  ;;  %v2723_v48 = vadd.f32 %v2722_v56, %v4812_v37  ;;  %v2441_v18 = vpop.f32.mrb[5].mxu0  ;;  %v2724_v19 = vpop.f32.mrb[5].mxu1 }
 0x7dc   :  { %v2442_v20 = vadd.f32 %v2441_v18, %v4816_v17  ;;  %v2725_v24 = vadd.f32 %v2724_v19, %v4820_v1  ;;  %v2443_v25 = vpop.f32.mrb[6].mxu0  ;;  %v2726_v26 = vpop.f32.mrb[6].mxu1 }
 0x7dd   :  { %2969 = vst [vmem:[%s5624_s7 + $0x40] sm:$0xff] %v2440_v57  ;;  %2971 = vst [vmem:[%s5624_s7 + $0x50] sm:$0xff] %v2723_v48  ;;  %v2444_v30 = vadd.f32 %v2443_v25, %v4808_v33  ;;  %v2727_v40 = vadd.f32 %v2726_v26, %v4812_v37  ;;  %v2445_v44 = vpop.f32.mrb[7].mxu0  ;;  %v2728_v45 = vpop.f32.mrb[7].mxu1 }
 0x7de   :  { %2970 = vst [vmem:[%s5624_s7 + $0x48] sm:$0xff] %v2442_v20  ;;  %2972 = vst [vmem:[%s5624_s7 + $0x58] sm:$0xff] %v2725_v24  ;;  %v2446_v46 = vadd.f32 %v2445_v44, %v4816_v17  ;;  %v2729_v49 = vadd.f32 %v2728_v45, %v4820_v1 }
 0x7df   :  { %2973 = vst [vmem:[%s5624_s7 + $0x60] sm:$0xff] %v2444_v30  ;;  %2975 = vst [vmem:[%s5624_s7 + $0x70] sm:$0xff] %v2727_v40 }
 0x7e0   :  { %2974 = vst [vmem:[%s5624_s7 + $0x68] sm:$0xff] %v2446_v46  ;;  %2976 = vst [vmem:[%s5624_s7 + $0x78] sm:$0xff] %v2729_v49 }
 0x7e2   :  { %v2449_v54 = vpop.f32.mrb[8].mxu0  ;;  %v2732_v58 = vpop.f32.mrb[8].mxu1 }
 0x7e3   :  { %v2450_v61 = vadd.f32 %v2449_v54, %v4808_v33  ;;  %v2733_v6 = vadd.f32 %v2732_v58, %v4812_v37  ;;  %v2451_v21 = vpop.f32.mrb[9].mxu0  ;;  %v2734_v39 = vpop.f32.mrb[9].mxu1 }
 0x7e4   :  { %v2452_v41 = vadd.f32 %v2451_v21, %v4816_v17  ;;  %v2735_v2 = vadd.f32 %v2734_v39, %v4820_v1  ;;  %v2453_v5 = vpop.f32.mrb[10].mxu0  ;;  %v2736_v10 = vpop.f32.mrb[10].mxu1 }
 0x7e5   :  { %2977 = vst [vmem:[%s5624_s7 + $0x80] sm:$0xff] %v2450_v61  ;;  %2979 = vst [vmem:[%s5624_s7 + $0x90] sm:$0xff] %v2733_v6  ;;  %v2454_v14 = vadd.f32 %v2453_v5, %v4808_v33  ;;  %v2737_v53 = vadd.f32 %v2736_v10, %v4812_v37  ;;  %v2455_v22 = vpop.f32.mrb[11].mxu0  ;;  %v2738_v16 = vpop.f32.mrb[11].mxu1 }
 0x7e6   :  { %2978 = vst [vmem:[%s5624_s7 + $0x88] sm:$0xff] %v2452_v41  ;;  %2980 = vst [vmem:[%s5624_s7 + $0x98] sm:$0xff] %v2735_v2  ;;  %v2456_v42 = vadd.f32 %v2455_v22, %v4816_v17  ;;  %v2739_v28 = vadd.f32 %v2738_v16, %v4820_v1 }
 0x7e7   :  { %2981 = vst [vmem:[%s5624_s7 + $0xa0] sm:$0xff] %v2454_v14  ;;  %2983 = vst [vmem:[%s5624_s7 + $0xb0] sm:$0xff] %v2737_v53 }
 0x7e8   :  { %2982 = vst [vmem:[%s5624_s7 + $0xa8] sm:$0xff] %v2456_v42  ;;  %2984 = vst [vmem:[%s5624_s7 + $0xb8] sm:$0xff] %v2739_v28 }
 0x7ea   :  { %v2459_v27 = vpop.f32.mrb[12].mxu0  ;;  %v2742_v43 = vpop.f32.mrb[12].mxu1 }
 0x7eb   :  { %v2460_v47 = vadd.f32 %v2459_v27, %v4808_v33  ;;  %v2743_v34 = vadd.f32 %v2742_v43, %v4812_v37  ;;  %v2461_v32 = vpop.f32.mrb[13].mxu0  ;;  %v2744_v31 = vpop.f32.mrb[13].mxu1 }
 0x7ec   :  { %v2462_v29 = vadd.f32 %v2461_v32, %v4816_v17  ;;  %v2745_v23 = vadd.f32 %v2744_v31, %v4820_v1  ;;  %v2463_v35 = vpop.f32.mrb[14].mxu0  ;;  %v2746_v36 = vpop.f32.mrb[14].mxu1 }
 0x7ed   :  { %2985 = vst [vmem:[%s5624_s7 + $0xc0] sm:$0xff] %v2460_v47  ;;  %2987 = vst [vmem:[%s5624_s7 + $0xd0] sm:$0xff] %v2743_v34  ;;  %v2464_v38 = vadd.f32 %v2463_v35, %v4808_v33  ;;  %v2747_v63 = vadd.f32 %v2746_v36, %v4812_v37  ;;  %v2465_v15 = vpop.f32.mrb[15].mxu0  ;;  %v2748_v62 = vpop.f32.mrb[15].mxu1 }
 0x7ee   :  { %2986 = vst [vmem:[%s5624_s7 + $0xc8] sm:$0xff] %v2462_v29  ;;  %2988 = vst [vmem:[%s5624_s7 + $0xd8] sm:$0xff] %v2745_v23  ;;  %v2466_v3 = vadd.f32 %v2465_v15, %v4816_v17  ;;  %v2749_v60 = vadd.f32 %v2748_v62, %v4820_v1 }
 0x7ef   :  { %2989 = vst [vmem:[%s5624_s7 + $0xe0] sm:$0xff] %v2464_v38  ;;  %2991 = vst [vmem:[%s5624_s7 + $0xf0] sm:$0xff] %v2747_v63 }
 0x7f0   :  { %2990 = vst [vmem:[%s5624_s7 + $0xe8] sm:$0xff] %v2466_v3  ;;  %2992 = vst [vmem:[%s5624_s7 + $0xf8] sm:$0xff] %v2749_v60 }
 0x7f2   :  { %v2469_v4 = vpop.f32.mrb[16].mxu0  ;;  %v2752_v11 = vpop.f32.mrb[16].mxu1 }
 0x7f3   :  { %v2470_v12 = vadd.f32 %v2469_v4, %v4808_v33  ;;  %v2753_v0 = vadd.f32 %v2752_v11, %v4812_v37  ;;  %v2471_v13 = vpop.f32.mrb[17].mxu0  ;;  %v2754_v7 = vpop.f32.mrb[17].mxu1 }
 0x7f4   :  { %v2472_v59 = vadd.f32 %v2471_v13, %v4816_v17  ;;  %v2755_v8 = vadd.f32 %v2754_v7, %v4820_v1  ;;  %v2473_v9 = vpop.f32.mrb[18].mxu0  ;;  %v2756_v50 = vpop.f32.mrb[18].mxu1 }
 0x7f5   :  { %2993 = vst [vmem:[%s5624_s7 + $0x100] sm:$0xff] %v2470_v12  ;;  %2995 = vst [vmem:[%s5624_s7 + $0x110] sm:$0xff] %v2753_v0  ;;  %v2474_v51 = vadd.f32 %v2473_v9, %v4808_v33  ;;  %v2757_v52 = vadd.f32 %v2756_v50, %v4812_v37  ;;  %v2475_v55 = vpop.f32.mrb[19].mxu0  ;;  %v2758_v56 = vpop.f32.mrb[19].mxu1 }
 0x7f6   :  { %2994 = vst [vmem:[%s5624_s7 + $0x108] sm:$0xff] %v2472_v59  ;;  %2996 = vst [vmem:[%s5624_s7 + $0x118] sm:$0xff] %v2755_v8  ;;  %v2476_v57 = vadd.f32 %v2475_v55, %v4816_v17  ;;  %v2759_v48 = vadd.f32 %v2758_v56, %v4820_v1 }
 0x7f7   :  { %2997 = vst [vmem:[%s5624_s7 + $0x120] sm:$0xff] %v2474_v51  ;;  %2999 = vst [vmem:[%s5624_s7 + $0x130] sm:$0xff] %v2757_v52 }
 0x7f8   :  { %2998 = vst [vmem:[%s5624_s7 + $0x128] sm:$0xff] %v2476_v57  ;;  %3000 = vst [vmem:[%s5624_s7 + $0x138] sm:$0xff] %v2759_v48 }
 0x7fa   :  { %v2479_v18 = vpop.f32.mrb[20].mxu0  ;;  %v2762_v19 = vpop.f32.mrb[20].mxu1 }
 0x7fb   :  { %v2480_v20 = vadd.f32 %v2479_v18, %v4808_v33  ;;  %v2763_v24 = vadd.f32 %v2762_v19, %v4812_v37  ;;  %v2481_v25 = vpop.f32.mrb[21].mxu0  ;;  %v2764_v26 = vpop.f32.mrb[21].mxu1 }
 0x7fc   :  { %v2482_v30 = vadd.f32 %v2481_v25, %v4816_v17  ;;  %v2765_v40 = vadd.f32 %v2764_v26, %v4820_v1  ;;  %v2483_v44 = vpop.f32.mrb[22].mxu0  ;;  %v2766_v45 = vpop.f32.mrb[22].mxu1 }
 0x7fd   :  { %3001 = vst [vmem:[%s5624_s7 + $0x140] sm:$0xff] %v2480_v20  ;;  %3003 = vst [vmem:[%s5624_s7 + $0x150] sm:$0xff] %v2763_v24  ;;  %v2484_v46 = vadd.f32 %v2483_v44, %v4808_v33  ;;  %v2767_v49 = vadd.f32 %v2766_v45, %v4812_v37  ;;  %v2485_v54 = vpop.f32.mrb[23].mxu0  ;;  %v2768_v58 = vpop.f32.mrb[23].mxu1 }
 0x7fe   :  { %3002 = vst [vmem:[%s5624_s7 + $0x148] sm:$0xff] %v2482_v30  ;;  %3004 = vst [vmem:[%s5624_s7 + $0x158] sm:$0xff] %v2765_v40  ;;  %v2486_v61 = vadd.f32 %v2485_v54, %v4816_v17  ;;  %v2769_v6 = vadd.f32 %v2768_v58, %v4820_v1 }
 0x7ff   :  { %3005 = vst [vmem:[%s5624_s7 + $0x160] sm:$0xff] %v2484_v46  ;;  %3007 = vst [vmem:[%s5624_s7 + $0x170] sm:$0xff] %v2767_v49 }
 0x800   :  { %3006 = vst [vmem:[%s5624_s7 + $0x168] sm:$0xff] %v2486_v61  ;;  %3008 = vst [vmem:[%s5624_s7 + $0x178] sm:$0xff] %v2769_v6 }
 0x802   :  { %v2489_v21 = vpop.f32.mrb[24].mxu0  ;;  %v2772_v39 = vpop.f32.mrb[24].mxu1 }
 0x803   :  { %v2490_v41 = vadd.f32 %v2489_v21, %v4808_v33  ;;  %v2773_v2 = vadd.f32 %v2772_v39, %v4812_v37  ;;  %v2491_v5 = vpop.f32.mrb[25].mxu0  ;;  %v2774_v10 = vpop.f32.mrb[25].mxu1 }
 0x804   :  { %v2492_v14 = vadd.f32 %v2491_v5, %v4816_v17  ;;  %v2775_v53 = vadd.f32 %v2774_v10, %v4820_v1  ;;  %v2493_v22 = vpop.f32.mrb[26].mxu0  ;;  %v2776_v16 = vpop.f32.mrb[26].mxu1 }
 0x805   :  { %3009 = vst [vmem:[%s5624_s7 + $0x180] sm:$0xff] %v2490_v41  ;;  %3011 = vst [vmem:[%s5624_s7 + $0x190] sm:$0xff] %v2773_v2  ;;  %v2494_v42 = vadd.f32 %v2493_v22, %v4808_v33  ;;  %v2777_v28 = vadd.f32 %v2776_v16, %v4812_v37  ;;  %v2495_v27 = vpop.f32.mrb[27].mxu0  ;;  %v2778_v43 = vpop.f32.mrb[27].mxu1 }
 0x806   :  { %3010 = vst [vmem:[%s5624_s7 + $0x188] sm:$0xff] %v2492_v14  ;;  %3012 = vst [vmem:[%s5624_s7 + $0x198] sm:$0xff] %v2775_v53  ;;  %v2496_v47 = vadd.f32 %v2495_v27, %v4816_v17  ;;  %v2779_v34 = vadd.f32 %v2778_v43, %v4820_v1 }
 0x807   :  { %3013 = vst [vmem:[%s5624_s7 + $0x1a0] sm:$0xff] %v2494_v42  ;;  %3015 = vst [vmem:[%s5624_s7 + $0x1b0] sm:$0xff] %v2777_v28 }
 0x808   :  { %3014 = vst [vmem:[%s5624_s7 + $0x1a8] sm:$0xff] %v2496_v47  ;;  %3016 = vst [vmem:[%s5624_s7 + $0x1b8] sm:$0xff] %v2779_v34 }
 0x80a   :  { %v2499_v32 = vpop.f32.mrb[28].mxu0  ;;  %v2782_v31 = vpop.f32.mrb[28].mxu1 }
 0x80b   :  { %v2500_v29 = vadd.f32 %v2499_v32, %v4808_v33  ;;  %v2783_v23 = vadd.f32 %v2782_v31, %v4812_v37  ;;  %v2501_v35 = vpop.f32.mrb[29].mxu0  ;;  %v2784_v36 = vpop.f32.mrb[29].mxu1 }
 0x80c   :  { %v2502_v38 = vadd.f32 %v2501_v35, %v4816_v17  ;;  %v2785_v63 = vadd.f32 %v2784_v36, %v4820_v1  ;;  %v2503_v15 = vpop.f32.mrb[30].mxu0  ;;  %v2786_v62 = vpop.f32.mrb[30].mxu1 }
 0x80d   :  { %3017 = vst [vmem:[%s5624_s7 + $0x1c0] sm:$0xff] %v2500_v29  ;;  %3019 = vst [vmem:[%s5624_s7 + $0x1d0] sm:$0xff] %v2783_v23  ;;  %v2504_v3 = vadd.f32 %v2503_v15, %v4808_v33  ;;  %v2787_v60 = vadd.f32 %v2786_v62, %v4812_v37  ;;  %v2505_v4 = vpop.f32.mrb[31].mxu0  ;;  %v2788_v11 = vpop.f32.mrb[31].mxu1 }
 0x80e   :  { %3018 = vst [vmem:[%s5624_s7 + $0x1c8] sm:$0xff] %v2502_v38  ;;  %3020 = vst [vmem:[%s5624_s7 + $0x1d8] sm:$0xff] %v2785_v63  ;;  %v2506_v12 = vadd.f32 %v2505_v4, %v4816_v17  ;;  %v2789_v0 = vadd.f32 %v2788_v11, %v4820_v1 }
 0x80f   :  { %3021 = vst [vmem:[%s5624_s7 + $0x1e0] sm:$0xff] %v2504_v3  ;;  %3023 = vst [vmem:[%s5624_s7 + $0x1f0] sm:$0xff] %v2787_v60 }
 0x810   :  { %3022 = vst [vmem:[%s5624_s7 + $0x1e8] sm:$0xff] %v2506_v12  ;;  %3024 = vst [vmem:[%s5624_s7 + $0x1f8] sm:$0xff] %v2789_v0 }
 0x812   :  { %v2509_v13 = vpop.f32.mrb[32].mxu0  ;;  %v2792_v7 = vpop.f32.mrb[32].mxu1 }
 0x813   :  { %v2510_v59 = vadd.f32 %v2509_v13, %v4808_v33  ;;  %v2793_v8 = vadd.f32 %v2792_v7, %v4812_v37  ;;  %v2511_v9 = vpop.f32.mrb[33].mxu0  ;;  %v2794_v50 = vpop.f32.mrb[33].mxu1 }
 0x814   :  { %v2512_v51 = vadd.f32 %v2511_v9, %v4816_v17  ;;  %v2795_v52 = vadd.f32 %v2794_v50, %v4820_v1  ;;  %v2513_v55 = vpop.f32.mrb[34].mxu0  ;;  %v2796_v56 = vpop.f32.mrb[34].mxu1 }
 0x815   :  { %3025 = vst [vmem:[%s5624_s7 + $0x200] sm:$0xff] %v2510_v59  ;;  %3027 = vst [vmem:[%s5624_s7 + $0x210] sm:$0xff] %v2793_v8  ;;  %v2514_v57 = vadd.f32 %v2513_v55, %v4808_v33  ;;  %v2797_v48 = vadd.f32 %v2796_v56, %v4812_v37  ;;  %v2515_v18 = vpop.f32.mrb[35].mxu0  ;;  %v2798_v19 = vpop.f32.mrb[35].mxu1 }
 0x816   :  { %3026 = vst [vmem:[%s5624_s7 + $0x208] sm:$0xff] %v2512_v51  ;;  %3028 = vst [vmem:[%s5624_s7 + $0x218] sm:$0xff] %v2795_v52  ;;  %v2516_v20 = vadd.f32 %v2515_v18, %v4816_v17  ;;  %v2799_v24 = vadd.f32 %v2798_v19, %v4820_v1 }
 0x817   :  { %3029 = vst [vmem:[%s5624_s7 + $0x220] sm:$0xff] %v2514_v57  ;;  %3031 = vst [vmem:[%s5624_s7 + $0x230] sm:$0xff] %v2797_v48 }
 0x818   :  { %3030 = vst [vmem:[%s5624_s7 + $0x228] sm:$0xff] %v2516_v20  ;;  %3032 = vst [vmem:[%s5624_s7 + $0x238] sm:$0xff] %v2799_v24 }
 0x81a   :  { %v2519_v25 = vpop.f32.mrb[36].mxu0  ;;  %v2802_v26 = vpop.f32.mrb[36].mxu1 }
 0x81b   :  { %v2520_v30 = vadd.f32 %v2519_v25, %v4808_v33  ;;  %v2803_v40 = vadd.f32 %v2802_v26, %v4812_v37  ;;  %v2521_v44 = vpop.f32.mrb[37].mxu0  ;;  %v2804_v45 = vpop.f32.mrb[37].mxu1 }
 0x81c   :  { %v2522_v46 = vadd.f32 %v2521_v44, %v4816_v17  ;;  %v2805_v49 = vadd.f32 %v2804_v45, %v4820_v1  ;;  %v2523_v54 = vpop.f32.mrb[38].mxu0  ;;  %v2806_v58 = vpop.f32.mrb[38].mxu1 }
 0x81d   :  { %3033 = vst [vmem:[%s5624_s7 + $0x240] sm:$0xff] %v2520_v30  ;;  %3035 = vst [vmem:[%s5624_s7 + $0x250] sm:$0xff] %v2803_v40  ;;  %v2524_v61 = vadd.f32 %v2523_v54, %v4808_v33  ;;  %v2807_v6 = vadd.f32 %v2806_v58, %v4812_v37  ;;  %v2525_v21 = vpop.f32.mrb[39].mxu0  ;;  %v2808_v39 = vpop.f32.mrb[39].mxu1 }
 0x81e   :  { %3034 = vst [vmem:[%s5624_s7 + $0x248] sm:$0xff] %v2522_v46  ;;  %3036 = vst [vmem:[%s5624_s7 + $0x258] sm:$0xff] %v2805_v49  ;;  %v2526_v41 = vadd.f32 %v2525_v21, %v4816_v17  ;;  %v2809_v2 = vadd.f32 %v2808_v39, %v4820_v1 }
 0x81f   :  { %3037 = vst [vmem:[%s5624_s7 + $0x260] sm:$0xff] %v2524_v61  ;;  %3039 = vst [vmem:[%s5624_s7 + $0x270] sm:$0xff] %v2807_v6 }
 0x820   :  { %3038 = vst [vmem:[%s5624_s7 + $0x268] sm:$0xff] %v2526_v41  ;;  %3040 = vst [vmem:[%s5624_s7 + $0x278] sm:$0xff] %v2809_v2 }
 0x822   :  { %v2529_v5 = vpop.f32.mrb[40].mxu0  ;;  %v2812_v10 = vpop.f32.mrb[40].mxu1 }
 0x823   :  { %v2530_v14 = vadd.f32 %v2529_v5, %v4808_v33  ;;  %v2813_v53 = vadd.f32 %v2812_v10, %v4812_v37  ;;  %v2531_v22 = vpop.f32.mrb[41].mxu0  ;;  %v2814_v16 = vpop.f32.mrb[41].mxu1 }
 0x824   :  { %v2532_v42 = vadd.f32 %v2531_v22, %v4816_v17  ;;  %v2815_v28 = vadd.f32 %v2814_v16, %v4820_v1  ;;  %v2533_v27 = vpop.f32.mrb[42].mxu0  ;;  %v2816_v43 = vpop.f32.mrb[42].mxu1 }
 0x825   :  { %3041 = vst [vmem:[%s5624_s7 + $0x280] sm:$0xff] %v2530_v14  ;;  %3043 = vst [vmem:[%s5624_s7 + $0x290] sm:$0xff] %v2813_v53  ;;  %v2534_v47 = vadd.f32 %v2533_v27, %v4808_v33  ;;  %v2817_v34 = vadd.f32 %v2816_v43, %v4812_v37  ;;  %v2535_v32 = vpop.f32.mrb[43].mxu0  ;;  %v2818_v31 = vpop.f32.mrb[43].mxu1 }
 0x826   :  { %3042 = vst [vmem:[%s5624_s7 + $0x288] sm:$0xff] %v2532_v42  ;;  %3044 = vst [vmem:[%s5624_s7 + $0x298] sm:$0xff] %v2815_v28  ;;  %v2536_v29 = vadd.f32 %v2535_v32, %v4816_v17  ;;  %v2819_v23 = vadd.f32 %v2818_v31, %v4820_v1 }
 0x827   :  { %3045 = vst [vmem:[%s5624_s7 + $0x2a0] sm:$0xff] %v2534_v47  ;;  %3047 = vst [vmem:[%s5624_s7 + $0x2b0] sm:$0xff] %v2817_v34 }
 0x828   :  { %3046 = vst [vmem:[%s5624_s7 + $0x2a8] sm:$0xff] %v2536_v29  ;;  %3048 = vst [vmem:[%s5624_s7 + $0x2b8] sm:$0xff] %v2819_v23 }
 0x82a   :  { %v2539_v35 = vpop.f32.mrb[44].mxu0  ;;  %v2822_v36 = vpop.f32.mrb[44].mxu1 }
 0x82b   :  { %v2540_v38 = vadd.f32 %v2539_v35, %v4808_v33  ;;  %v2823_v63 = vadd.f32 %v2822_v36, %v4812_v37  ;;  %v2541_v15 = vpop.f32.mrb[45].mxu0  ;;  %v2824_v62 = vpop.f32.mrb[45].mxu1 }
 0x82c   :  { %v2542_v3 = vadd.f32 %v2541_v15, %v4816_v17  ;;  %v2825_v60 = vadd.f32 %v2824_v62, %v4820_v1  ;;  %v2543_v4 = vpop.f32.mrb[46].mxu0  ;;  %v2826_v11 = vpop.f32.mrb[46].mxu1 }
 0x82d   :  { %3049 = vst [vmem:[%s5624_s7 + $0x2c0] sm:$0xff] %v2540_v38  ;;  %3051 = vst [vmem:[%s5624_s7 + $0x2d0] sm:$0xff] %v2823_v63  ;;  %v2544_v12 = vadd.f32 %v2543_v4, %v4808_v33  ;;  %v2827_v0 = vadd.f32 %v2826_v11, %v4812_v37  ;;  %v2545_v13 = vpop.f32.mrb[47].mxu0  ;;  %v2828_v7 = vpop.f32.mrb[47].mxu1 }
 0x82e   :  { %3050 = vst [vmem:[%s5624_s7 + $0x2c8] sm:$0xff] %v2542_v3  ;;  %3052 = vst [vmem:[%s5624_s7 + $0x2d8] sm:$0xff] %v2825_v60  ;;  %v2546_v59 = vadd.f32 %v2545_v13, %v4816_v17  ;;  %v2829_v8 = vadd.f32 %v2828_v7, %v4820_v1 }
 0x82f   :  { %3053 = vst [vmem:[%s5624_s7 + $0x2e0] sm:$0xff] %v2544_v12  ;;  %3055 = vst [vmem:[%s5624_s7 + $0x2f0] sm:$0xff] %v2827_v0 }
 0x830   :  { %3054 = vst [vmem:[%s5624_s7 + $0x2e8] sm:$0xff] %v2546_v59  ;;  %3056 = vst [vmem:[%s5624_s7 + $0x2f8] sm:$0xff] %v2829_v8 }
 0x832   :  { %v2549_v9 = vpop.f32.mrb[48].mxu0  ;;  %v2832_v50 = vpop.f32.mrb[48].mxu1 }
 0x833   :  { %v2550_v51 = vadd.f32 %v2549_v9, %v4808_v33  ;;  %v2833_v52 = vadd.f32 %v2832_v50, %v4812_v37  ;;  %v2551_v55 = vpop.f32.mrb[49].mxu0  ;;  %v2834_v56 = vpop.f32.mrb[49].mxu1 }
 0x834   :  { %v2552_v57 = vadd.f32 %v2551_v55, %v4816_v17  ;;  %v2835_v48 = vadd.f32 %v2834_v56, %v4820_v1  ;;  %v2553_v18 = vpop.f32.mrb[50].mxu0  ;;  %v2836_v19 = vpop.f32.mrb[50].mxu1 }
 0x835   :  { %3057 = vst [vmem:[%s5624_s7 + $0x300] sm:$0xff] %v2550_v51  ;;  %3059 = vst [vmem:[%s5624_s7 + $0x310] sm:$0xff] %v2833_v52  ;;  %v2554_v20 = vadd.f32 %v2553_v18, %v4808_v33  ;;  %v2837_v24 = vadd.f32 %v2836_v19, %v4812_v37  ;;  %v2555_v25 = vpop.f32.mrb[51].mxu0  ;;  %v2838_v26 = vpop.f32.mrb[51].mxu1 }
 0x836   :  { %3058 = vst [vmem:[%s5624_s7 + $0x308] sm:$0xff] %v2552_v57  ;;  %3060 = vst [vmem:[%s5624_s7 + $0x318] sm:$0xff] %v2835_v48  ;;  %v2556_v30 = vadd.f32 %v2555_v25, %v4816_v17  ;;  %v2839_v40 = vadd.f32 %v2838_v26, %v4820_v1 }
 0x837   :  { %3061 = vst [vmem:[%s5624_s7 + $0x320] sm:$0xff] %v2554_v20  ;;  %3063 = vst [vmem:[%s5624_s7 + $0x330] sm:$0xff] %v2837_v24 }
 0x838   :  { %3062 = vst [vmem:[%s5624_s7 + $0x328] sm:$0xff] %v2556_v30  ;;  %3064 = vst [vmem:[%s5624_s7 + $0x338] sm:$0xff] %v2839_v40 }
 0x83a   :  { %v2559_v44 = vpop.f32.mrb[52].mxu0  ;;  %v2842_v45 = vpop.f32.mrb[52].mxu1 }
 0x83b   :  { %v2560_v46 = vadd.f32 %v2559_v44, %v4808_v33  ;;  %v2843_v49 = vadd.f32 %v2842_v45, %v4812_v37  ;;  %v2561_v54 = vpop.f32.mrb[53].mxu0  ;;  %v2844_v58 = vpop.f32.mrb[53].mxu1 }
 0x83c   :  { %v2562_v61 = vadd.f32 %v2561_v54, %v4816_v17  ;;  %v2845_v6 = vadd.f32 %v2844_v58, %v4820_v1  ;;  %v2563_v21 = vpop.f32.mrb[54].mxu0  ;;  %v2846_v39 = vpop.f32.mrb[54].mxu1 }
 0x83d   :  { %3065 = vst [vmem:[%s5624_s7 + $0x340] sm:$0xff] %v2560_v46  ;;  %3067 = vst [vmem:[%s5624_s7 + $0x350] sm:$0xff] %v2843_v49  ;;  %v2564_v41 = vadd.f32 %v2563_v21, %v4808_v33  ;;  %v2847_v2 = vadd.f32 %v2846_v39, %v4812_v37  ;;  %v2565_v5 = vpop.f32.mrb[55].mxu0  ;;  %v2848_v10 = vpop.f32.mrb[55].mxu1 }
 0x83e   :  { %3066 = vst [vmem:[%s5624_s7 + $0x348] sm:$0xff] %v2562_v61  ;;  %3068 = vst [vmem:[%s5624_s7 + $0x358] sm:$0xff] %v2845_v6  ;;  %v2566_v14 = vadd.f32 %v2565_v5, %v4816_v17  ;;  %v2849_v53 = vadd.f32 %v2848_v10, %v4820_v1 }
 0x83f   :  { %3069 = vst [vmem:[%s5624_s7 + $0x360] sm:$0xff] %v2564_v41  ;;  %3071 = vst [vmem:[%s5624_s7 + $0x370] sm:$0xff] %v2847_v2 }
 0x840   :  { %3070 = vst [vmem:[%s5624_s7 + $0x368] sm:$0xff] %v2566_v14  ;;  %3072 = vst [vmem:[%s5624_s7 + $0x378] sm:$0xff] %v2849_v53 }
 0x842   :  { %v2569_v22 = vpop.f32.mrb[56].mxu0  ;;  %v2852_v16 = vpop.f32.mrb[56].mxu1 }
 0x843   :  { %v2570_v42 = vadd.f32 %v2569_v22, %v4808_v33  ;;  %v2853_v28 = vadd.f32 %v2852_v16, %v4812_v37  ;;  %v2571_v27 = vpop.f32.mrb[57].mxu0  ;;  %v2854_v43 = vpop.f32.mrb[57].mxu1 }
 0x844   :  { %v2572_v47 = vadd.f32 %v2571_v27, %v4816_v17  ;;  %v2855_v34 = vadd.f32 %v2854_v43, %v4820_v1  ;;  %v2573_v32 = vpop.f32.mrb[58].mxu0  ;;  %v2856_v31 = vpop.f32.mrb[58].mxu1 }
 0x845   :  { %3073 = vst [vmem:[%s5624_s7 + $0x380] sm:$0xff] %v2570_v42  ;;  %3075 = vst [vmem:[%s5624_s7 + $0x390] sm:$0xff] %v2853_v28  ;;  %v2574_v29 = vadd.f32 %v2573_v32, %v4808_v33  ;;  %v2857_v23 = vadd.f32 %v2856_v31, %v4812_v37  ;;  %v2575_v35 = vpop.f32.mrb[59].mxu0  ;;  %v2858_v36 = vpop.f32.mrb[59].mxu1 }
 0x846   :  { %3074 = vst [vmem:[%s5624_s7 + $0x388] sm:$0xff] %v2572_v47  ;;  %3076 = vst [vmem:[%s5624_s7 + $0x398] sm:$0xff] %v2855_v34  ;;  %v2576_v38 = vadd.f32 %v2575_v35, %v4816_v17  ;;  %v2859_v63 = vadd.f32 %v2858_v36, %v4820_v1 }
 0x847   :  { %3077 = vst [vmem:[%s5624_s7 + $0x3a0] sm:$0xff] %v2574_v29  ;;  %3079 = vst [vmem:[%s5624_s7 + $0x3b0] sm:$0xff] %v2857_v23 }
 0x848   :  { %3078 = vst [vmem:[%s5624_s7 + $0x3a8] sm:$0xff] %v2576_v38  ;;  %3080 = vst [vmem:[%s5624_s7 + $0x3b8] sm:$0xff] %v2859_v63 }
 0x84a   :  { %v2579_v15 = vpop.f32.mrb[60].mxu0  ;;  %v2862_v62 = vpop.f32.mrb[60].mxu1 }
 0x84b   :  { %v2580_v3 = vadd.f32 %v2579_v15, %v4808_v33  ;;  %v2863_v60 = vadd.f32 %v2862_v62, %v4812_v37  ;;  %v2581_v4 = vpop.f32.mrb[61].mxu0  ;;  %v2864_v11 = vpop.f32.mrb[61].mxu1 }
 0x84c   :  { %v2582_v12 = vadd.f32 %v2581_v4, %v4816_v17  ;;  %v2865_v0 = vadd.f32 %v2864_v11, %v4820_v1  ;;  %v2583_v13 = vpop.f32.mrb[62].mxu0  ;;  %v2866_v7 = vpop.f32.mrb[62].mxu1 }
 0x84d   :  { %3081 = vst [vmem:[%s5624_s7 + $0x3c0] sm:$0xff] %v2580_v3  ;;  %3083 = vst [vmem:[%s5624_s7 + $0x3d0] sm:$0xff] %v2863_v60  ;;  %v2584_v59 = vadd.f32 %v2583_v13, %v4808_v33  ;;  %v2867_v8 = vadd.f32 %v2866_v7, %v4812_v37  ;;  %v2585_v9 = vpop.f32.mrb[63].mxu0  ;;  %v2868_v50 = vpop.f32.mrb[63].mxu1 }
 0x84e   :  { %3082 = vst [vmem:[%s5624_s7 + $0x3c8] sm:$0xff] %v2582_v12  ;;  %3084 = vst [vmem:[%s5624_s7 + $0x3d8] sm:$0xff] %v2865_v0  ;;  %v2586_v51 = vadd.f32 %v2585_v9, %v4816_v17  ;;  %v2869_v52 = vadd.f32 %v2868_v50, %v4820_v1 }
 0x84f   :  { %3085 = vst [vmem:[%s5624_s7 + $0x3e0] sm:$0xff] %v2584_v59  ;;  %3087 = vst [vmem:[%s5624_s7 + $0x3f0] sm:$0xff] %v2867_v8 }
 0x850   :  { %3086 = vst [vmem:[%s5624_s7 + $0x3e8] sm:$0xff] %v2586_v51  ;;  %3088 = vst [vmem:[%s5624_s7 + $0x3f8] sm:$0xff] %v2869_v52 }
 0x852   :  { %v2589_v55 = vpop.f32.mrb[64].mxu0  ;;  %v2872_v56 = vpop.f32.mrb[64].mxu1 }
 0x853   :  { %v2590_v57 = vadd.f32 %v2589_v55, %v4808_v33  ;;  %v2873_v48 = vadd.f32 %v2872_v56, %v4812_v37  ;;  %v2591_v18 = vpop.f32.mrb[65].mxu0  ;;  %v2874_v19 = vpop.f32.mrb[65].mxu1 }
 0x854   :  { %v2592_v20 = vadd.f32 %v2591_v18, %v4816_v17  ;;  %v2875_v24 = vadd.f32 %v2874_v19, %v4820_v1  ;;  %v2593_v25 = vpop.f32.mrb[66].mxu0  ;;  %v2876_v26 = vpop.f32.mrb[66].mxu1 }
 0x855   :  { %3089 = vst [vmem:[%s5624_s7 + $0x400] sm:$0xff] %v2590_v57  ;;  %3091 = vst [vmem:[%s5624_s7 + $0x410] sm:$0xff] %v2873_v48  ;;  %v2594_v30 = vadd.f32 %v2593_v25, %v4808_v33  ;;  %v2877_v40 = vadd.f32 %v2876_v26, %v4812_v37  ;;  %v2595_v44 = vpop.f32.mrb[67].mxu0  ;;  %v2878_v45 = vpop.f32.mrb[67].mxu1 }
 0x856   :  { %3090 = vst [vmem:[%s5624_s7 + $0x408] sm:$0xff] %v2592_v20  ;;  %3092 = vst [vmem:[%s5624_s7 + $0x418] sm:$0xff] %v2875_v24  ;;  %v2596_v46 = vadd.f32 %v2595_v44, %v4816_v17  ;;  %v2879_v49 = vadd.f32 %v2878_v45, %v4820_v1 }
 0x857   :  { %3093 = vst [vmem:[%s5624_s7 + $0x420] sm:$0xff] %v2594_v30  ;;  %3095 = vst [vmem:[%s5624_s7 + $0x430] sm:$0xff] %v2877_v40 }
 0x858   :  { %3094 = vst [vmem:[%s5624_s7 + $0x428] sm:$0xff] %v2596_v46  ;;  %3096 = vst [vmem:[%s5624_s7 + $0x438] sm:$0xff] %v2879_v49 }
 0x85a   :  { %v2599_v54 = vpop.f32.mrb[68].mxu0  ;;  %v2882_v58 = vpop.f32.mrb[68].mxu1 }
 0x85b   :  { %v2600_v61 = vadd.f32 %v2599_v54, %v4808_v33  ;;  %v2883_v6 = vadd.f32 %v2882_v58, %v4812_v37  ;;  %v2601_v21 = vpop.f32.mrb[69].mxu0  ;;  %v2884_v39 = vpop.f32.mrb[69].mxu1 }
 0x85c   :  { %v2602_v41 = vadd.f32 %v2601_v21, %v4816_v17  ;;  %v2885_v2 = vadd.f32 %v2884_v39, %v4820_v1  ;;  %v2603_v5 = vpop.f32.mrb[70].mxu0  ;;  %v2886_v10 = vpop.f32.mrb[70].mxu1 }
 0x85d   :  { %3097 = vst [vmem:[%s5624_s7 + $0x440] sm:$0xff] %v2600_v61  ;;  %3099 = vst [vmem:[%s5624_s7 + $0x450] sm:$0xff] %v2883_v6  ;;  %v2604_v14 = vadd.f32 %v2603_v5, %v4808_v33  ;;  %v2887_v53 = vadd.f32 %v2886_v10, %v4812_v37  ;;  %v2605_v22 = vpop.f32.mrb[71].mxu0  ;;  %v2888_v16 = vpop.f32.mrb[71].mxu1 }
 0x85e   :  { %3098 = vst [vmem:[%s5624_s7 + $0x448] sm:$0xff] %v2602_v41  ;;  %3100 = vst [vmem:[%s5624_s7 + $0x458] sm:$0xff] %v2885_v2  ;;  %v2606_v42 = vadd.f32 %v2605_v22, %v4816_v17  ;;  %v2889_v28 = vadd.f32 %v2888_v16, %v4820_v1 }
 0x85f   :  { %3101 = vst [vmem:[%s5624_s7 + $0x460] sm:$0xff] %v2604_v14  ;;  %3103 = vst [vmem:[%s5624_s7 + $0x470] sm:$0xff] %v2887_v53 }
 0x860   :  { %3102 = vst [vmem:[%s5624_s7 + $0x468] sm:$0xff] %v2606_v42  ;;  %3104 = vst [vmem:[%s5624_s7 + $0x478] sm:$0xff] %v2889_v28 }
 0x862   :  { %v2609_v27 = vpop.f32.mrb[72].mxu0  ;;  %v2892_v43 = vpop.f32.mrb[72].mxu1 }
 0x863   :  { %v2610_v47 = vadd.f32 %v2609_v27, %v4808_v33  ;;  %v2893_v34 = vadd.f32 %v2892_v43, %v4812_v37  ;;  %v2611_v32 = vpop.f32.mrb[73].mxu0  ;;  %v2894_v31 = vpop.f32.mrb[73].mxu1 }
 0x864   :  { %v2612_v29 = vadd.f32 %v2611_v32, %v4816_v17  ;;  %v2895_v23 = vadd.f32 %v2894_v31, %v4820_v1  ;;  %v2613_v35 = vpop.f32.mrb[74].mxu0  ;;  %v2896_v36 = vpop.f32.mrb[74].mxu1 }
 0x865   :  { %3105 = vst [vmem:[%s5624_s7 + $0x480] sm:$0xff] %v2610_v47  ;;  %3107 = vst [vmem:[%s5624_s7 + $0x490] sm:$0xff] %v2893_v34  ;;  %v2614_v38 = vadd.f32 %v2613_v35, %v4808_v33  ;;  %v2897_v63 = vadd.f32 %v2896_v36, %v4812_v37  ;;  %v2615_v15 = vpop.f32.mrb[75].mxu0  ;;  %v2898_v62 = vpop.f32.mrb[75].mxu1 }
 0x866   :  { %3106 = vst [vmem:[%s5624_s7 + $0x488] sm:$0xff] %v2612_v29  ;;  %3108 = vst [vmem:[%s5624_s7 + $0x498] sm:$0xff] %v2895_v23  ;;  %v2616_v3 = vadd.f32 %v2615_v15, %v4816_v17  ;;  %v2899_v60 = vadd.f32 %v2898_v62, %v4820_v1 }
 0x867   :  { %3109 = vst [vmem:[%s5624_s7 + $0x4a0] sm:$0xff] %v2614_v38  ;;  %3111 = vst [vmem:[%s5624_s7 + $0x4b0] sm:$0xff] %v2897_v63 }
 0x868   :  { %3110 = vst [vmem:[%s5624_s7 + $0x4a8] sm:$0xff] %v2616_v3  ;;  %3112 = vst [vmem:[%s5624_s7 + $0x4b8] sm:$0xff] %v2899_v60 }
 0x86a   :  { %v2619_v4 = vpop.f32.mrb[76].mxu0  ;;  %v2902_v11 = vpop.f32.mrb[76].mxu1 }
 0x86b   :  { %v2620_v12 = vadd.f32 %v2619_v4, %v4808_v33  ;;  %v2903_v0 = vadd.f32 %v2902_v11, %v4812_v37  ;;  %v2621_v13 = vpop.f32.mrb[77].mxu0  ;;  %v2904_v7 = vpop.f32.mrb[77].mxu1 }
 0x86c   :  { %v2622_v59 = vadd.f32 %v2621_v13, %v4816_v17  ;;  %v2905_v8 = vadd.f32 %v2904_v7, %v4820_v1  ;;  %v2623_v9 = vpop.f32.mrb[78].mxu0  ;;  %v2906_v50 = vpop.f32.mrb[78].mxu1 }
 0x86d   :  { %3113 = vst [vmem:[%s5624_s7 + $0x4c0] sm:$0xff] %v2620_v12  ;;  %3115 = vst [vmem:[%s5624_s7 + $0x4d0] sm:$0xff] %v2903_v0  ;;  %v2624_v51 = vadd.f32 %v2623_v9, %v4808_v33  ;;  %v2907_v52 = vadd.f32 %v2906_v50, %v4812_v37  ;;  %v2625_v55 = vpop.f32.mrb[79].mxu0  ;;  %v2908_v56 = vpop.f32.mrb[79].mxu1 }
 0x86e   :  { %3114 = vst [vmem:[%s5624_s7 + $0x4c8] sm:$0xff] %v2622_v59  ;;  %3116 = vst [vmem:[%s5624_s7 + $0x4d8] sm:$0xff] %v2905_v8  ;;  %v2626_v57 = vadd.f32 %v2625_v55, %v4816_v17  ;;  %v2909_v48 = vadd.f32 %v2908_v56, %v4820_v1 }
 0x86f   :  { %3117 = vst [vmem:[%s5624_s7 + $0x4e0] sm:$0xff] %v2624_v51  ;;  %3119 = vst [vmem:[%s5624_s7 + $0x4f0] sm:$0xff] %v2907_v52 }
 0x870   :  { %3118 = vst [vmem:[%s5624_s7 + $0x4e8] sm:$0xff] %v2626_v57  ;;  %3120 = vst [vmem:[%s5624_s7 + $0x4f8] sm:$0xff] %v2909_v48 }
 0x872   :  { %v2629_v18 = vpop.f32.mrb[80].mxu0  ;;  %v2912_v19 = vpop.f32.mrb[80].mxu1 }
 0x873   :  { %v2630_v20 = vadd.f32 %v2629_v18, %v4808_v33  ;;  %v2913_v24 = vadd.f32 %v2912_v19, %v4812_v37  ;;  %v2631_v25 = vpop.f32.mrb[81].mxu0  ;;  %v2914_v26 = vpop.f32.mrb[81].mxu1 }
 0x874   :  { %v2632_v30 = vadd.f32 %v2631_v25, %v4816_v17  ;;  %v2915_v40 = vadd.f32 %v2914_v26, %v4820_v1  ;;  %v2633_v44 = vpop.f32.mrb[82].mxu0  ;;  %v2916_v45 = vpop.f32.mrb[82].mxu1 }
 0x875   :  { %3121 = vst [vmem:[%s5624_s7 + $0x500] sm:$0xff] %v2630_v20  ;;  %3123 = vst [vmem:[%s5624_s7 + $0x510] sm:$0xff] %v2913_v24  ;;  %v2634_v46 = vadd.f32 %v2633_v44, %v4808_v33  ;;  %v2917_v49 = vadd.f32 %v2916_v45, %v4812_v37  ;;  %v2635_v54 = vpop.f32.mrb[83].mxu0  ;;  %v2918_v58 = vpop.f32.mrb[83].mxu1 }
 0x876   :  { %3122 = vst [vmem:[%s5624_s7 + $0x508] sm:$0xff] %v2632_v30  ;;  %3124 = vst [vmem:[%s5624_s7 + $0x518] sm:$0xff] %v2915_v40  ;;  %v2636_v61 = vadd.f32 %v2635_v54, %v4816_v17  ;;  %v2919_v6 = vadd.f32 %v2918_v58, %v4820_v1 }
 0x877   :  { %3125 = vst [vmem:[%s5624_s7 + $0x520] sm:$0xff] %v2634_v46  ;;  %3127 = vst [vmem:[%s5624_s7 + $0x530] sm:$0xff] %v2917_v49 }
 0x878   :  { %3126 = vst [vmem:[%s5624_s7 + $0x528] sm:$0xff] %v2636_v61  ;;  %3128 = vst [vmem:[%s5624_s7 + $0x538] sm:$0xff] %v2919_v6 }
 0x87a   :  { %v2639_v21 = vpop.f32.mrb[84].mxu0  ;;  %v2922_v39 = vpop.f32.mrb[84].mxu1 }
 0x87b   :  { %v2640_v41 = vadd.f32 %v2639_v21, %v4808_v33  ;;  %v2923_v2 = vadd.f32 %v2922_v39, %v4812_v37  ;;  %v2641_v5 = vpop.f32.mrb[85].mxu0  ;;  %v2924_v10 = vpop.f32.mrb[85].mxu1 }
 0x87c   :  { %v2642_v14 = vadd.f32 %v2641_v5, %v4816_v17  ;;  %v2925_v53 = vadd.f32 %v2924_v10, %v4820_v1  ;;  %v2643_v22 = vpop.f32.mrb[86].mxu0  ;;  %v2926_v16 = vpop.f32.mrb[86].mxu1 }
 0x87d   :  { %3129 = vst [vmem:[%s5624_s7 + $0x540] sm:$0xff] %v2640_v41  ;;  %3131 = vst [vmem:[%s5624_s7 + $0x550] sm:$0xff] %v2923_v2  ;;  %v2644_v42 = vadd.f32 %v2643_v22, %v4808_v33  ;;  %v2927_v28 = vadd.f32 %v2926_v16, %v4812_v37  ;;  %v2645_v27 = vpop.f32.mrb[87].mxu0  ;;  %v2928_v43 = vpop.f32.mrb[87].mxu1 }
 0x87e   :  { %3130 = vst [vmem:[%s5624_s7 + $0x548] sm:$0xff] %v2642_v14  ;;  %3132 = vst [vmem:[%s5624_s7 + $0x558] sm:$0xff] %v2925_v53  ;;  %v2646_v47 = vadd.f32 %v2645_v27, %v4816_v17  ;;  %v2929_v34 = vadd.f32 %v2928_v43, %v4820_v1 }
 0x87f   :  { %3133 = vst [vmem:[%s5624_s7 + $0x560] sm:$0xff] %v2644_v42  ;;  %3135 = vst [vmem:[%s5624_s7 + $0x570] sm:$0xff] %v2927_v28 }
 0x880   :  { %3134 = vst [vmem:[%s5624_s7 + $0x568] sm:$0xff] %v2646_v47  ;;  %3136 = vst [vmem:[%s5624_s7 + $0x578] sm:$0xff] %v2929_v34 }
 0x882   :  { %v2649_v32 = vpop.f32.mrb[88].mxu0  ;;  %v2932_v31 = vpop.f32.mrb[88].mxu1 }
 0x883   :  { %v2650_v29 = vadd.f32 %v2649_v32, %v4808_v33  ;;  %v2933_v23 = vadd.f32 %v2932_v31, %v4812_v37  ;;  %v2651_v35 = vpop.f32.mrb[89].mxu0  ;;  %v2934_v36 = vpop.f32.mrb[89].mxu1 }
 0x884   :  { %v2652_v38 = vadd.f32 %v2651_v35, %v4816_v17  ;;  %v2935_v63 = vadd.f32 %v2934_v36, %v4820_v1  ;;  %v2653_v15 = vpop.f32.mrb[90].mxu0  ;;  %v2936_v62 = vpop.f32.mrb[90].mxu1 }
 0x885   :  { %3137 = vst [vmem:[%s5624_s7 + $0x580] sm:$0xff] %v2650_v29  ;;  %3139 = vst [vmem:[%s5624_s7 + $0x590] sm:$0xff] %v2933_v23  ;;  %v2654_v3 = vadd.f32 %v2653_v15, %v4808_v33  ;;  %v2937_v60 = vadd.f32 %v2936_v62, %v4812_v37  ;;  %v2655_v4 = vpop.f32.mrb[91].mxu0  ;;  %v2938_v11 = vpop.f32.mrb[91].mxu1 }
 0x886   :  { %3138 = vst [vmem:[%s5624_s7 + $0x588] sm:$0xff] %v2652_v38  ;;  %3140 = vst [vmem:[%s5624_s7 + $0x598] sm:$0xff] %v2935_v63  ;;  %v2656_v12 = vadd.f32 %v2655_v4, %v4816_v17  ;;  %v2939_v0 = vadd.f32 %v2938_v11, %v4820_v1 }
 0x887   :  { %3141 = vst [vmem:[%s5624_s7 + $0x5a0] sm:$0xff] %v2654_v3  ;;  %3143 = vst [vmem:[%s5624_s7 + $0x5b0] sm:$0xff] %v2937_v60 }
 0x888   :  { %3142 = vst [vmem:[%s5624_s7 + $0x5a8] sm:$0xff] %v2656_v12  ;;  %3144 = vst [vmem:[%s5624_s7 + $0x5b8] sm:$0xff] %v2939_v0 }
 0x88a   :  { %v2659_v13 = vpop.f32.mrb[92].mxu0  ;;  %v2942_v7 = vpop.f32.mrb[92].mxu1 }
 0x88b   :  { %v2660_v59 = vadd.f32 %v2659_v13, %v4808_v33  ;;  %v2943_v8 = vadd.f32 %v2942_v7, %v4812_v37  ;;  %v2661_v9 = vpop.f32.mrb[93].mxu0  ;;  %v2944_v50 = vpop.f32.mrb[93].mxu1 }
 0x88c   :  { %v2662_v51 = vadd.f32 %v2661_v9, %v4816_v17  ;;  %v2945_v52 = vadd.f32 %v2944_v50, %v4820_v1  ;;  %v2663_v55 = vpop.f32.mrb[94].mxu0  ;;  %v2946_v56 = vpop.f32.mrb[94].mxu1 }
 0x88d   :  { %3145 = vst [vmem:[%s5624_s7 + $0x5c0] sm:$0xff] %v2660_v59  ;;  %3147 = vst [vmem:[%s5624_s7 + $0x5d0] sm:$0xff] %v2943_v8  ;;  %v2664_v57 = vadd.f32 %v2663_v55, %v4808_v33  ;;  %v2947_v48 = vadd.f32 %v2946_v56, %v4812_v37  ;;  %v2665_v18 = vpop.f32.mrb[95].mxu0  ;;  %v2948_v19 = vpop.f32.mrb[95].mxu1 }
 0x88e   :  { %3146 = vst [vmem:[%s5624_s7 + $0x5c8] sm:$0xff] %v2662_v51  ;;  %3148 = vst [vmem:[%s5624_s7 + $0x5d8] sm:$0xff] %v2945_v52  ;;  %v2666_v20 = vadd.f32 %v2665_v18, %v4816_v17  ;;  %v2949_v24 = vadd.f32 %v2948_v19, %v4820_v1 }
 0x88f   :  { %3149 = vst [vmem:[%s5624_s7 + $0x5e0] sm:$0xff] %v2664_v57  ;;  %3151 = vst [vmem:[%s5624_s7 + $0x5f0] sm:$0xff] %v2947_v48 }
 0x890   :  { %3150 = vst [vmem:[%s5624_s7 + $0x5e8] sm:$0xff] %v2666_v20  ;;  %3152 = vst [vmem:[%s5624_s7 + $0x5f8] sm:$0xff] %v2949_v24 }
 0x892   :  { %v2669_v25 = vpop.f32.mrb[96].mxu0  ;;  %v2952_v26 = vpop.f32.mrb[96].mxu1 }
 0x893   :  { %v2670_v30 = vadd.f32 %v2669_v25, %v4808_v33  ;;  %v2953_v40 = vadd.f32 %v2952_v26, %v4812_v37  ;;  %v2671_v44 = vpop.f32.mrb[97].mxu0  ;;  %v2954_v45 = vpop.f32.mrb[97].mxu1 }
 0x894   :  { %v2672_v46 = vadd.f32 %v2671_v44, %v4816_v17  ;;  %v2955_v49 = vadd.f32 %v2954_v45, %v4820_v1  ;;  %v2673_v54 = vpop.f32.mrb[98].mxu0  ;;  %v2956_v58 = vpop.f32.mrb[98].mxu1 }
 0x895   :  { %3153 = vst [vmem:[%s5624_s7 + $0x600] sm:$0xff] %v2670_v30  ;;  %3155 = vst [vmem:[%s5624_s7 + $0x610] sm:$0xff] %v2953_v40  ;;  %v2674_v61 = vadd.f32 %v2673_v54, %v4808_v33  ;;  %v2957_v6 = vadd.f32 %v2956_v58, %v4812_v37  ;;  %v2675_v21 = vpop.f32.mrb[99].mxu0  ;;  %v2958_v39 = vpop.f32.mrb[99].mxu1 }
 0x896   :  { %3154 = vst [vmem:[%s5624_s7 + $0x608] sm:$0xff] %v2672_v46  ;;  %3156 = vst [vmem:[%s5624_s7 + $0x618] sm:$0xff] %v2955_v49  ;;  %v2676_v41 = vadd.f32 %v2675_v21, %v4816_v17  ;;  %v2959_v2 = vadd.f32 %v2958_v39, %v4820_v1 }
 0x897   :  { %3157 = vst [vmem:[%s5624_s7 + $0x620] sm:$0xff] %v2674_v61  ;;  %3159 = vst [vmem:[%s5624_s7 + $0x630] sm:$0xff] %v2957_v6 }
 0x898   :  { %3158 = vst [vmem:[%s5624_s7 + $0x628] sm:$0xff] %v2676_v41  ;;  %3160 = vst [vmem:[%s5624_s7 + $0x638] sm:$0xff] %v2959_v2 }

</bundles_post_ra>
